<compile_context>
chip_gen: v7x
topology: tpu7x:2x2x1
jax: 0.10.0
libtpu: 0.0.40
codegen_flags: <defaults>
</compile_context>

<pallas_src>
import jax
import jax.numpy as jnp
from jax.experimental import pallas as pl
from jax.experimental.pallas import tpu as pltpu


def _round_up(x, m):
    return (x + m - 1) // m * m


def _bottleneck_kernel(x_ref,
                       w1_ref, s1_ref, b1_ref,
                       w2_ref, s2_ref, b2_ref,
                       w3_ref, s3_ref, b3_ref,
                       wd_ref, sd_ref, bd_ref,
                       out_ref,
                       s_ref):
    """One batch element per grid step (stride=1, dilation=1, eval-mode BN)."""
    _, H, W, Cin = x_ref.shape
    Cmid = w1_ref.shape[1]
    Cout = w3_ref.shape[1]
    C3 = s_ref.shape[2]                       # 3 * Cmid
    f32 = jnp.float32
    bf16 = jnp.bfloat16

    # Zero only the scratch regions NOT overwritten below (top/bottom halo rows
    # plus the single border column of the dj=0 / dj=2 channel blocks).  Done
    # every grid step so the kernel stays correct when the batch axis is
    # sharded across TensorCores.
    s_ref[0:1, :, :] = jnp.zeros((1, W, C3), bf16)
    s_ref[H + 1:H + 2, :, :] = jnp.zeros((1, W, C3), bf16)
    s_ref[1:H + 1, 0:1, 0:Cmid] = jnp.zeros((H, 1, Cmid), bf16)
    s_ref[1:H + 1, W - 1:W, 2 * Cmid:3 * Cmid] = jnp.zeros((H, 1, Cmid), bf16)

    # conv1x1 -> bn1 -> relu: single whole-image slab matmul + f32 epilogue,
    # stored once as bf16 (MXU inputs are bf16 anyway, so numerics unchanged).
    x_slab = x_ref[0].reshape(H * W, Cin)                           # bf16
    h1 = jnp.dot(x_slab, w1_ref[...], preferred_element_type=f32)   # (H*W, Cmid)
    h1 = jnp.maximum(h1 * s1_ref[...] + b1_ref[...], 0.0)
    h1 = h1.astype(bf16).reshape(H, W, Cmid)

    # Scatter h1 into the width-im2col scratch: channel block dj holds the
    # image shifted left by dj (zero-padded at the edges).
    s_ref[1:H + 1, 1:W, 0:Cmid] = h1[:, 0:W - 1, :]
    s_ref[1:H + 1, :, Cmid:2 * Cmid] = h1
    s_ref[1:H + 1, 0:W - 1, 2 * Cmid:3 * Cmid] = h1[:, 1:W, :]

    # conv3x3 -> bn2 -> relu: 3 fused-K (K = 3*Cmid) dots, f32 accumulation
    # initialized with the first tap-row (no zeros slab, no extra add).
    # Row-range slices + (H, W, C)->(H*W, C) reshapes are free views when
    # W % 8 == 0 (keep W a multiple of 8 for real workloads).
    acc = jnp.dot(s_ref[0:H].reshape(H * W, C3), w2_ref[0],
                  preferred_element_type=f32)
    acc += jnp.dot(s_ref[1:H + 1].reshape(H * W, C3), w2_ref[1],
                   preferred_element_type=f32)
    acc += jnp.dot(s_ref[2:H + 2].reshape(H * W, C3), w2_ref[2],
                   preferred_element_type=f32)
    h2 = jnp.maximum(acc * s2_ref[...] + b2_ref[...], 0.0).astype(bf16)

    # conv1x1 -> bn3.
    h3 = jnp.dot(h2, w3_ref[...], preferred_element_type=f32)       # (H*W, Cout)
    h3 = h3 * s3_ref[...] + b3_ref[...]

    # Downsample identity (conv1x1 -> bn), computed late so the (H*W, Cout)
    # f32 value is not live across the conv3x3/conv3 dots.  x_ref's block is
    # resident for the whole grid step, so this is a VMEM re-read, not HBM.
    ident = jnp.dot(x_ref[0].reshape(H * W, Cin), wd_ref[...],
                    preferred_element_type=f32)
    ident = ident * sd_ref[...] + bd_ref[...]

    # Residual add + final relu, bf16 writeback.
    out_ref[0] = jnp.maximum(h3 + ident, 0.0).reshape(H, W, Cout).astype(out_ref.dtype)


def _fold_bn(gamma, beta, mean, var, cpad, eps=1e-5):
    scale = gamma / jnp.sqrt(var + eps)
    bias = beta - mean * scale
    scale = jnp.pad(scale, (0, cpad - scale.shape[0]))
    bias = jnp.pad(bias, (0, cpad - bias.shape[0]))
    return (scale.reshape(1, -1).astype(jnp.float32),
            bias.reshape(1, -1).astype(jnp.float32))


def _pad2(w, r, c):
    return jnp.pad(w, ((0, r - w.shape[0]), (0, c - w.shape[1])))


def bottleneck_forward_nhwc(x_nchw, params, *, stride=1, dilation=1):
    """Run the Bottleneck block; returns bf16 NHWC with channels padded to 128.

    Chained NHWC consumers should use this output directly (no extra slice /
    transpose pass over HBM); `bottleneck_forward` converts back to the
    PyTorch NCHW/f32 convention for the semantics check.
    """
    assert stride == 1 and dilation == 1, "only module defaults are supported"
    N, Cin, H, W = x_nchw.shape
    Cmid = params["conv1_w"].shape[0]
    Cout = params["conv3_w"].shape[0]

    LANE = 128
    Cin_p = _round_up(Cin, LANE)
    Cmid_p = _round_up(Cmid, LANE)
    Cout_p = _round_up(Cout, LANE)

    # NHWC, channels zero-padded to a lane-dense multiple of 128, bf16 inputs.
    x = jnp.transpose(x_nchw, (0, 2, 3, 1)).astype(jnp.float32)
    x = jnp.pad(x, ((0, 0), (0, 0), (0, 0), (0, Cin_p - Cin))).astype(jnp.bfloat16)

    # PyTorch conv weights are (out, in, kh, kw); convert to matmul form.
    w1 = _pad2(params["conv1_w"][:, :, 0, 0].T, Cin_p, Cmid_p).astype(jnp.bfloat16)
    # conv2: (kh, kw, in, out) padded per-tap, then the kw taps of each kh row
    # are stacked along K -> (3, 3*Cmid_p, Cmid_p) matching the im2col scratch.
    w2 = jnp.transpose(params["conv2_w"], (2, 3, 1, 0))
    w2 = jnp.pad(w2, ((0, 0), (0, 0), (0, Cmid_p - Cmid), (0, Cmid_p - Cmid)))
    w2 = w2.reshape(3, 3 * Cmid_p, Cmid_p).astype(jnp.bfloat16)
    w3 = _pad2(params["conv3_w"][:, :, 0, 0].T, Cmid_p, Cout_p).astype(jnp.bfloat16)
    wd = _pad2(params["down_w"][:, :, 0, 0].T, Cin_p, Cout_p).astype(jnp.bfloat16)

    s1, b1 = _fold_bn(params["bn1_g"], params["bn1_b"], params["bn1_m"], params["bn1_v"], Cmid_p)
    s2, b2 = _fold_bn(params["bn2_g"], params["bn2_b"], params["bn2_m"], params["bn2_v"], Cmid_p)
    s3, b3 = _fold_bn(params["bn3_g"], params["bn3_b"], params["bn3_m"], params["bn3_v"], Cout_p)
    sd, bd = _fold_bn(params["dbn_g"], params["dbn_b"], params["dbn_m"], params["dbn_v"], Cout_p)

    consts = (w1, s1, b1, w2, s2, b2, w3, s3, b3, wd, sd, bd)

    def const_spec(arr):
        nd = arr.ndim
        # TODO(synk): mark grid-invariant constants single-buffered
        # (pipeline_mode=pl.Buffered(1)) once that path is confirmed on the
        # target jax version; saves a few MB of VMEM at real ResNet widths.
        return pl.BlockSpec(arr.shape, lambda b, _nd=nd: (0,) * _nd)

    # Size the scoped VMEM limit from the actual buffers (double-buffered
    # in/out blocks + im2col scratch + constants), with generous headroom.
    in_block = H * W * Cin_p * 2                       # bf16
    out_block = H * W * Cout_p * 2                     # bf16
    scratch_bytes = (H + 2) * W * 3 * Cmid_p * 2       # bf16 im2col scratch
    const_bytes = sum(int(a.size) * a.dtype.itemsize for a in consts)
    vmem_bytes = 2 * (in_block + out_block) + scratch_bytes + 2 * const_bytes
    vmem_limit = int(min(128 << 20, max(2 * vmem_bytes + (4 << 20), 16 << 20)))

    # TODO(synk): for very small N on v7x (2 TensorCores), add an H-tile grid
    # axis with 1-row halo handling so each core gets >=2 pipelined grid steps.
    out_nhwc = pl.pallas_call(
        _bottleneck_kernel,
        out_shape=jax.ShapeDtypeStruct((N, H, W, Cout_p), jnp.bfloat16),
        grid_spec=pltpu.PrefetchScalarGridSpec(
            num_scalar_prefetch=0,
            grid=(N,),
            in_specs=[
                pl.BlockSpec((1, H, W, Cin_p), lambda b: (b, 0, 0, 0)),
                const_spec(w1), const_spec(s1), const_spec(b1),
                const_spec(w2), const_spec(s2), const_spec(b2),
                const_spec(w3), const_spec(s3), const_spec(b3),
                const_spec(wd), const_spec(sd), const_spec(bd),
            ],
            out_specs=pl.BlockSpec((1, H, W, Cout_p), lambda b: (b, 0, 0, 0)),
            scratch_shapes=[pltpu.VMEM((H + 2, W, 3 * Cmid_p), jnp.bfloat16)],
        ),
        compiler_params=pltpu.CompilerParams(
            dimension_semantics=("parallel",),
            vmem_limit_bytes=vmem_limit),
    )(x, *consts)
    return out_nhwc


def bottleneck_forward(x_nchw, params, *, stride=1, dilation=1):
    """PyTorch-convention wrapper: NCHW f32 in, NCHW f32 out."""
    Cout = params["conv3_w"].shape[0]
    out_nhwc = bottleneck_forward_nhwc(x_nchw, params, stride=stride, dilation=dilation)
    # Note: this slice + transpose is a separate mem-bound XLA op; chained NHWC
    # consumers should use bottleneck_forward_nhwc directly.
    return jnp.transpose(out_nhwc[..., :Cout].astype(jnp.float32), (0, 3, 1, 2))


def bottleneck_reference(x, p, eps=1e-5):
    """Pure-JAX reference (same eval-mode BN semantics), NCHW."""
    def conv(x, w, pad=0):
        return jax.lax.conv_general_dilated(
            x, w, window_strides=(1, 1), padding=((pad, pad), (pad, pad)),
            dimension_numbers=("NCHW", "OIHW", "NCHW"))

    def bn(x, g, b, m, v):
        s = g / jnp.sqrt(v + eps)
        return x * s[None, :, None, None] + (b - m * s)[None, :, None, None]

    relu = lambda t: jnp.maximum(t, 0.0)
    identity = bn(conv(x, p["down_w"]), p["dbn_g"], p["dbn_b"], p["dbn_m"], p["dbn_v"])
    h = relu(bn(conv(x, p["conv1_w"]), p["bn1_g"], p["bn1_b"], p["bn1_m"], p["bn1_v"]))
    h = relu(bn(conv(h, p["conv2_w"], pad=1), p["bn2_g"], p["bn2_b"], p["bn2_m"], p["bn2_v"]))
    h = bn(conv(h, p["conv3_w"]), p["bn3_g"], p["bn3_b"], p["bn3_m"], p["bn3_v"])
    return relu(h + identity)


if __name__ == "__main__":
    N, Cin, H, W = 2, 8, 16, 16
    Cout = 16
    Cmid = Cout  # module default: mid_channel = out_channel

    key = jax.random.PRNGKey(0)
    ks = jax.random.split(key, 9)

    def bn_params(k, c):
        k1, k2, k3, k4 = jax.random.split(k, 4)
        return (jax.random.uniform(k1, (c,), jnp.float32, 0.5, 1.5),   # gamma
                0.1 * jax.random.normal(k2, (c,), jnp.float32),         # beta
                0.1 * jax.random.normal(k3, (c,), jnp.float32),         # running mean
                jax.random.uniform(k4, (c,), jnp.float32, 0.5, 1.5))    # running var

    p = {
        "conv1_w": 0.1 * jax.random.normal(ks[0], (Cmid, Cin, 1, 1), jnp.float32),
        "conv2_w": 0.1 * jax.random.normal(ks[1], (Cmid, Cmid, 3, 3), jnp.float32),
        "conv3_w": 0.1 * jax.random.normal(ks[2], (Cout, Cmid, 1, 1), jnp.float32),
        "down_w":  0.1 * jax.random.normal(ks[3], (Cout, Cin, 1, 1), jnp.float32),
    }
    p["bn1_g"], p["bn1_b"], p["bn1_m"], p["bn1_v"] = bn_params(ks[4], Cmid)
    p["bn2_g"], p["bn2_b"], p["bn2_m"], p["bn2_v"] = bn_params(ks[5], Cmid)
    p["bn3_g"], p["bn3_b"], p["bn3_m"], p["bn3_v"] = bn_params(ks[6], Cout)
    p["dbn_g"], p["dbn_b"], p["dbn_m"], p["dbn_v"] = bn_params(ks[7], Cout)

    x = jax.random.normal(ks[8], (N, Cin, H, W), jnp.float32)

    out = jax.block_until_ready(bottleneck_forward(x, p))

    ref = bottleneck_reference(x, p)
    assert out.shape == ref.shape == (N, Cout, H, W)
    err = float(jnp.max(jnp.abs(out - ref)))
    # bf16 MXU inputs / bf16 output (f32 accumulation) -> looser tolerance.
    tol = 3e-2 * float(jnp.max(jnp.abs(ref))) + 1e-3
    if err > tol:
        raise AssertionError(f"mismatch vs reference: max abs err = {err} (tol {tol})")

    print("KERNEL_OK")
</pallas_src>

<mosaic_0001>
module attributes {stable_mosaic.version = 11 : i64} {
  func.func @_bottleneck_kernel(%arg0: i32, %arg1: memref<1x16x16x128xbf16, #tpu.memory_space<vmem>>, %arg2: memref<128x128xbf16, #tpu.memory_space<vmem>>, %arg3: memref<1x128xf32, #tpu.memory_space<vmem>>, %arg4: memref<1x128xf32, #tpu.memory_space<vmem>>, %arg5: memref<3x384x128xbf16, #tpu.memory_space<vmem>>, %arg6: memref<1x128xf32, #tpu.memory_space<vmem>>, %arg7: memref<1x128xf32, #tpu.memory_space<vmem>>, %arg8: memref<128x128xbf16, #tpu.memory_space<vmem>>, %arg9: memref<1x128xf32, #tpu.memory_space<vmem>>, %arg10: memref<1x128xf32, #tpu.memory_space<vmem>>, %arg11: memref<128x128xbf16, #tpu.memory_space<vmem>>, %arg12: memref<1x128xf32, #tpu.memory_space<vmem>>, %arg13: memref<1x128xf32, #tpu.memory_space<vmem>>, %arg14: memref<1x16x16x128xbf16, #tpu.memory_space<vmem>>, %arg15: memref<18x16x384xbf16, #tpu.memory_space<vmem>>) attributes {dimension_semantics = [#tpu.dimension_semantics<parallel>], iteration_bounds = array<i64: 2>, scalar_prefetch = 0 : i64, scratch_operands = 1 : i64, tpu.core_type = #tpu.core_type<tc>, window_params = [{transform_indices = @transform_0, window_bounds = array<i64: 1, 16, 16, 128>}, {pipeline_mode = #tpu.pipeline_mode<synchronous>, transform_indices = @transform_1, window_bounds = array<i64: 128, 128>}, {pipeline_mode = #tpu.pipeline_mode<synchronous>, transform_indices = @transform_2, window_bounds = array<i64: 1, 128>}, {pipeline_mode = #tpu.pipeline_mode<synchronous>, transform_indices = @transform_3, window_bounds = array<i64: 1, 128>}, {pipeline_mode = #tpu.pipeline_mode<synchronous>, transform_indices = @transform_4, window_bounds = array<i64: 3, 384, 128>}, {pipeline_mode = #tpu.pipeline_mode<synchronous>, transform_indices = @transform_5, window_bounds = array<i64: 1, 128>}, {pipeline_mode = #tpu.pipeline_mode<synchronous>, transform_indices = @transform_6, window_bounds = array<i64: 1, 128>}, {pipeline_mode = #tpu.pipeline_mode<synchronous>, transform_indices = @transform_7, window_bounds = array<i64: 128, 128>}, {pipeline_mode = #tpu.pipeline_mode<synchronous>, transform_indices = @transform_8, window_bounds = array<i64: 1, 128>}, {pipeline_mode = #tpu.pipeline_mode<synchronous>, transform_indices = @transform_9, window_bounds = array<i64: 1, 128>}, {pipeline_mode = #tpu.pipeline_mode<synchronous>, transform_indices = @transform_10, window_bounds = array<i64: 128, 128>}, {pipeline_mode = #tpu.pipeline_mode<synchronous>, transform_indices = @transform_11, window_bounds = array<i64: 1, 128>}, {pipeline_mode = #tpu.pipeline_mode<synchronous>, transform_indices = @transform_12, window_bounds = array<i64: 1, 128>}, {transform_indices = @transform_13, window_bounds = array<i64: 1, 16, 16, 128>}]} {
    %cst = arith.constant 0.000000e+00 : bf16
    %0 = vector.broadcast %cst : bf16 to vector<1x16x384xbf16>
    %c0 = arith.constant 0 : index
    %c0_0 = arith.constant 0 : index
    %c0_1 = arith.constant 0 : index
    %1 = vector.load %arg15[%c0, %c0_0, %c0_1] : memref<18x16x384xbf16, #tpu.memory_space<vmem>>, vector<1x16x384xbf16>
    tpu.vector_store %arg15[%c0, %c0_0, %c0_1], %0 {strides = array<i32>} : memref<18x16x384xbf16, #tpu.memory_space<vmem>>, vector<1x16x384xbf16>,
    %cst_2 = arith.constant 0.000000e+00 : bf16
    %2 = vector.broadcast %cst_2 : bf16 to vector<1x16x384xbf16>
    %c17 = arith.constant 17 : index
    %c0_3 = arith.constant 0 : index
    %c0_4 = arith.constant 0 : index
    %3 = vector.load %arg15[%c17, %c0_3, %c0_4] : memref<18x16x384xbf16, #tpu.memory_space<vmem>>, vector<1x16x384xbf16>
    tpu.vector_store %arg15[%c17, %c0_3, %c0_4], %2 {strides = array<i32>} : memref<18x16x384xbf16, #tpu.memory_space<vmem>>, vector<1x16x384xbf16>,
    %cst_5 = arith.constant 0.000000e+00 : bf16
    %4 = vector.broadcast %cst_5 : bf16 to vector<16x1x128xbf16>
    %c1 = arith.constant 1 : index
    %c0_6 = arith.constant 0 : index
    %c0_7 = arith.constant 0 : index
    %5 = vector.load %arg15[%c1, %c0_6, %c0_7] : memref<18x16x384xbf16, #tpu.memory_space<vmem>>, vector<16x1x128xbf16>
    tpu.vector_store %arg15[%c1, %c0_6, %c0_7], %4 {strides = array<i32>} : memref<18x16x384xbf16, #tpu.memory_space<vmem>>, vector<16x1x128xbf16>,
    %cst_8 = arith.constant 0.000000e+00 : bf16
    %6 = vector.broadcast %cst_8 : bf16 to vector<16x1x128xbf16>
    %c1_9 = arith.constant 1 : index
    %c15 = arith.constant 15 : index
    %c256 = arith.constant 256 : index
    %7 = vector.load %arg15[%c1_9, %c15, %c256] : memref<18x16x384xbf16, #tpu.memory_space<vmem>>, vector<16x1x128xbf16>
    tpu.vector_store %arg15[%c1_9, %c15, %c256], %6 {strides = array<i32>} : memref<18x16x384xbf16, #tpu.memory_space<vmem>>, vector<16x1x128xbf16>,
    %c0_10 = arith.constant 0 : index
    %c0_11 = arith.constant 0 : index
    %c0_12 = arith.constant 0 : index
    %c0_13 = arith.constant 0 : index
    %8 = vector.load %arg1[%c0_10, %c0_11, %c0_12, %c0_13] : memref<1x16x16x128xbf16, #tpu.memory_space<vmem>>, vector<1x16x16x128xbf16>
    %9 = vector.shape_cast %8 : vector<1x16x16x128xbf16> to vector<16x16x128xbf16>
    %10 = vector.shape_cast %9 : vector<16x16x128xbf16> to vector<256x128xbf16>
    %c0_14 = arith.constant 0 : index
    %c0_15 = arith.constant 0 : index
    %11 = vector.load %arg2[%c0_14, %c0_15] : memref<128x128xbf16, #tpu.memory_space<vmem>>, vector<128x128xbf16>
    %cst_16 = arith.constant dense<0.000000e+00> : vector<256x128xf32>
    %12 = tpu.matmul %10, %11, %cst_16 {dimension_numbers = #tpu.dot_dimension_numbers<[1], [0], [0], [1], [0, 0, 1, 1], [], []>} : vector<256x128xbf16>, vector<128x128xbf16>, vector<256x128xf32> -> vector<256x128xf32>
    %c0_17 = arith.constant 0 : index
    %c0_18 = arith.constant 0 : index
    %13 = vector.load %arg3[%c0_17, %c0_18] : memref<1x128xf32, #tpu.memory_space<vmem>>, vector<1x128xf32>
    %14 = vector.broadcast %13 : vector<1x128xf32> to vector<256x128xf32>
    %15 = arith.mulf %12, %14 : vector<256x128xf32>
    %c0_19 = arith.constant 0 : index
    %c0_20 = arith.constant 0 : index
    %16 = vector.load %arg4[%c0_19, %c0_20] : memref<1x128xf32, #tpu.memory_space<vmem>>, vector<1x128xf32>
    %17 = vector.broadcast %16 : vector<1x128xf32> to vector<256x128xf32>
    %18 = arith.addf %15, %17 : vector<256x128xf32>
    %cst_21 = arith.constant 0.000000e+00 : f32
    %19 = vector.broadcast %cst_21 : f32 to vector<256x128xf32>
    %20 = arith.maximumf %18, %19 : vector<256x128xf32>
    %21 = arith.truncf %20 : vector<256x128xf32> to vector<256x128xbf16>
    %22 = vector.shape_cast %21 : vector<256x128xbf16> to vector<16x16x128xbf16>
    %23 = vector.extract_strided_slice %22 {offsets = [0, 0, 0], sizes = [16, 15, 128], strides = [1, 1, 1]} : vector<16x16x128xbf16> to vector<16x15x128xbf16>
    %c1_22 = arith.constant 1 : index
    %c1_23 = arith.constant 1 : index
    %c0_24 = arith.constant 0 : index
    %24 = vector.load %arg15[%c1_22, %c1_23, %c0_24] : memref<18x16x384xbf16, #tpu.memory_space<vmem>>, vector<16x15x128xbf16>
    tpu.vector_store %arg15[%c1_22, %c1_23, %c0_24], %23 {strides = array<i32>} : memref<18x16x384xbf16, #tpu.memory_space<vmem>>, vector<16x15x128xbf16>,
    %c1_25 = arith.constant 1 : index
    %c0_26 = arith.constant 0 : index
    %c128 = arith.constant 128 : index
    %25 = vector.load %arg15[%c1_25, %c0_26, %c128] : memref<18x16x384xbf16, #tpu.memory_space<vmem>>, vector<16x16x128xbf16>
    tpu.vector_store %arg15[%c1_25, %c0_26, %c128], %22 {strides = array<i32>} : memref<18x16x384xbf16, #tpu.memory_space<vmem>>, vector<16x16x128xbf16>,
    %26 = vector.extract_strided_slice %22 {offsets = [0, 1, 0], sizes = [16, 15, 128], strides = [1, 1, 1]} : vector<16x16x128xbf16> to vector<16x15x128xbf16>
    %c1_27 = arith.constant 1 : index
    %c0_28 = arith.constant 0 : index
    %c256_29 = arith.constant 256 : index
    %27 = vector.load %arg15[%c1_27, %c0_28, %c256_29] : memref<18x16x384xbf16, #tpu.memory_space<vmem>>, vector<16x15x128xbf16>
    tpu.vector_store %arg15[%c1_27, %c0_28, %c256_29], %26 {strides = array<i32>} : memref<18x16x384xbf16, #tpu.memory_space<vmem>>, vector<16x15x128xbf16>,
    %c0_30 = arith.constant 0 : index
    %c0_31 = arith.constant 0 : index
    %c0_32 = arith.constant 0 : index
    %28 = vector.load %arg15[%c0_30, %c0_31, %c0_32] : memref<18x16x384xbf16, #tpu.memory_space<vmem>>, vector<16x16x384xbf16>
    %29 = vector.shape_cast %28 : vector<16x16x384xbf16> to vector<256x384xbf16>
    %c0_33 = arith.constant 0 : index
    %c0_34 = arith.constant 0 : index
    %c0_35 = arith.constant 0 : index
    %30 = vector.load %arg5[%c0_33, %c0_34, %c0_35] : memref<3x384x128xbf16, #tpu.memory_space<vmem>>, vector<1x384x128xbf16>
    %31 = vector.shape_cast %30 : vector<1x384x128xbf16> to vector<384x128xbf16>
    %cst_36 = arith.constant dense<0.000000e+00> : vector<256x128xf32>
    %32 = tpu.matmul %29, %31, %cst_36 {dimension_numbers = #tpu.dot_dimension_numbers<[1], [0], [0], [1], [0, 0, 1, 1], [], []>} : vector<256x384xbf16>, vector<384x128xbf16>, vector<256x128xf32> -> vector<256x128xf32>
    %c1_37 = arith.constant 1 : index
    %c0_38 = arith.constant 0 : index
    %c0_39 = arith.constant 0 : index
    %33 = vector.load %arg15[%c1_37, %c0_38, %c0_39] : memref<18x16x384xbf16, #tpu.memory_space<vmem>>, vector<16x16x384xbf16>
    %34 = vector.shape_cast %33 : vector<16x16x384xbf16> to vector<256x384xbf16>
    %c1_40 = arith.constant 1 : index
    %c0_41 = arith.constant 0 : index
    %c0_42 = arith.constant 0 : index
    %35 = vector.load %arg5[%c1_40, %c0_41, %c0_42] : memref<3x384x128xbf16, #tpu.memory_space<vmem>>, vector<1x384x128xbf16>
    %36 = vector.shape_cast %35 : vector<1x384x128xbf16> to vector<384x128xbf16>
    %cst_43 = arith.constant dense<0.000000e+00> : vector<256x128xf32>
    %37 = tpu.matmul %34, %36, %cst_43 {dimension_numbers = #tpu.dot_dimension_numbers<[1], [0], [0], [1], [0, 0, 1, 1], [], []>} : vector<256x384xbf16>, vector<384x128xbf16>, vector<256x128xf32> -> vector<256x128xf32>
    %38 = arith.addf %32, %37 : vector<256x128xf32>
    %c2 = arith.constant 2 : index
    %c0_44 = arith.constant 0 : index
    %c0_45 = arith.constant 0 : index
    %39 = vector.load %arg15[%c2, %c0_44, %c0_45] : memref<18x16x384xbf16, #tpu.memory_space<vmem>>, vector<16x16x384xbf16>
    %40 = vector.shape_cast %39 : vector<16x16x384xbf16> to vector<256x384xbf16>
    %c2_46 = arith.constant 2 : index
    %c0_47 = arith.constant 0 : index
    %c0_48 = arith.constant 0 : index
    %41 = vector.load %arg5[%c2_46, %c0_47, %c0_48] : memref<3x384x128xbf16, #tpu.memory_space<vmem>>, vector<1x384x128xbf16>
    %42 = vector.shape_cast %41 : vector<1x384x128xbf16> to vector<384x128xbf16>
    %cst_49 = arith.constant dense<0.000000e+00> : vector<256x128xf32>
    %43 = tpu.matmul %40, %42, %cst_49 {dimension_numbers = #tpu.dot_dimension_numbers<[1], [0], [0], [1], [0, 0, 1, 1], [], []>} : vector<256x384xbf16>, vector<384x128xbf16>, vector<256x128xf32> -> vector<256x128xf32>
    %44 = arith.addf %38, %43 : vector<256x128xf32>
    %c0_50 = arith.constant 0 : index
    %c0_51 = arith.constant 0 : index
    %45 = vector.load %arg6[%c0_50, %c0_51] : memref<1x128xf32, #tpu.memory_space<vmem>>, vector<1x128xf32>
    %46 = vector.broadcast %45 : vector<1x128xf32> to vector<256x128xf32>
    %47 = arith.mulf %44, %46 : vector<256x128xf32>
    %c0_52 = arith.constant 0 : index
    %c0_53 = arith.constant 0 : index
    %48 = vector.load %arg7[%c0_52, %c0_53] : memref<1x128xf32, #tpu.memory_space<vmem>>, vector<1x128xf32>
    %49 = vector.broadcast %48 : vector<1x128xf32> to vector<256x128xf32>
    %50 = arith.addf %47, %49 : vector<256x128xf32>
    %cst_54 = arith.constant 0.000000e+00 : f32
    %51 = vector.broadcast %cst_54 : f32 to vector<256x128xf32>
    %52 = arith.maximumf %50, %51 : vector<256x128xf32>
    %53 = arith.truncf %52 : vector<256x128xf32> to vector<256x128xbf16>
    %c0_55 = arith.constant 0 : index
    %c0_56 = arith.constant 0 : index
    %54 = vector.load %arg8[%c0_55, %c0_56] : memref<128x128xbf16, #tpu.memory_space<vmem>>, vector<128x128xbf16>
    %cst_57 = arith.constant dense<0.000000e+00> : vector<256x128xf32>
    %55 = tpu.matmul %53, %54, %cst_57 {dimension_numbers = #tpu.dot_dimension_numbers<[1], [0], [0], [1], [0, 0, 1, 1], [], []>} : vector<256x128xbf16>, vector<128x128xbf16>, vector<256x128xf32> -> vector<256x128xf32>
    %c0_58 = arith.constant 0 : index
    %c0_59 = arith.constant 0 : index
    %56 = vector.load %arg9[%c0_58, %c0_59] : memref<1x128xf32, #tpu.memory_space<vmem>>, vector<1x128xf32>
    %57 = vector.broadcast %56 : vector<1x128xf32> to vector<256x128xf32>
    %58 = arith.mulf %55, %57 : vector<256x128xf32>
    %c0_60 = arith.constant 0 : index
    %c0_61 = arith.constant 0 : index
    %59 = vector.load %arg10[%c0_60, %c0_61] : memref<1x128xf32, #tpu.memory_space<vmem>>, vector<1x128xf32>
    %60 = vector.broadcast %59 : vector<1x128xf32> to vector<256x128xf32>
    %61 = arith.addf %58, %60 : vector<256x128xf32>
    %c0_62 = arith.constant 0 : index
    %c0_63 = arith.constant 0 : index
    %c0_64 = arith.constant 0 : index
    %c0_65 = arith.constant 0 : index
    %62 = vector.load %arg1[%c0_62, %c0_63, %c0_64, %c0_65] : memref<1x16x16x128xbf16, #tpu.memory_space<vmem>>, vector<1x16x16x128xbf16>
    %63 = vector.shape_cast %62 : vector<1x16x16x128xbf16> to vector<16x16x128xbf16>
    %64 = vector.shape_cast %63 : vector<16x16x128xbf16> to vector<256x128xbf16>
    %c0_66 = arith.constant 0 : index
    %c0_67 = arith.constant 0 : index
    %65 = vector.load %arg11[%c0_66, %c0_67] : memref<128x128xbf16, #tpu.memory_space<vmem>>, vector<128x128xbf16>
    %cst_68 = arith.constant dense<0.000000e+00> : vector<256x128xf32>
    %66 = tpu.matmul %64, %65, %cst_68 {dimension_numbers = #tpu.dot_dimension_numbers<[1], [0], [0], [1], [0, 0, 1, 1], [], []>} : vector<256x128xbf16>, vector<128x128xbf16>, vector<256x128xf32> -> vector<256x128xf32>
    %c0_69 = arith.constant 0 : index
    %c0_70 = arith.constant 0 : index
    %67 = vector.load %arg12[%c0_69, %c0_70] : memref<1x128xf32, #tpu.memory_space<vmem>>, vector<1x128xf32>
    %68 = vector.broadcast %67 : vector<1x128xf32> to vector<256x128xf32>
    %69 = arith.mulf %66, %68 : vector<256x128xf32>
    %c0_71 = arith.constant 0 : index
    %c0_72 = arith.constant 0 : index
    %70 = vector.load %arg13[%c0_71, %c0_72] : memref<1x128xf32, #tpu.memory_space<vmem>>, vector<1x128xf32>
    %71 = vector.broadcast %70 : vector<1x128xf32> to vector<256x128xf32>
    %72 = arith.addf %69, %71 : vector<256x128xf32>
    %73 = arith.addf %61, %72 : vector<256x128xf32>
    %cst_73 = arith.constant 0.000000e+00 : f32
    %74 = vector.broadcast %cst_73 : f32 to vector<256x128xf32>
    %75 = arith.maximumf %73, %74 : vector<256x128xf32>
    %76 = vector.shape_cast %75 : vector<256x128xf32> to vector<16x16x128xf32>
    %77 = arith.truncf %76 : vector<16x16x128xf32> to vector<16x16x128xbf16>
    %c0_74 = arith.constant 0 : index
    %c0_75 = arith.constant 0 : index
    %c0_76 = arith.constant 0 : index
    %c0_77 = arith.constant 0 : index
    %78 = vector.load %arg14[%c0_74, %c0_75, %c0_76, %c0_77] : memref<1x16x16x128xbf16, #tpu.memory_space<vmem>>, vector<1x16x16x128xbf16>
    %79 = vector.shape_cast %78 : vector<1x16x16x128xbf16> to vector<16x16x128xbf16>
    %80 = vector.shape_cast %77 : vector<16x16x128xbf16> to vector<1x16x16x128xbf16>
    tpu.vector_store %arg14[%c0_74, %c0_75, %c0_76, %c0_77], %80 {strides = array<i32>} : memref<1x16x16x128xbf16, #tpu.memory_space<vmem>>, vector<1x16x16x128xbf16>,
    return
  }
  func.func @transform_0(%arg0: i32) -> (i32, i32, i32, i32) {
    %c0_i32 = arith.constant 0 : i32
    %c0_i32_0 = arith.constant 0 : i32
    %c0_i32_1 = arith.constant 0 : i32
    %c0_i32_2 = arith.constant 0 : i32
    return %arg0, %c0_i32, %c0_i32_0, %c0_i32_1 : i32, i32, i32, i32
  }
  func.func @transform_1(%arg0: i32) -> (i32, i32) {
    %c0_i32 = arith.constant 0 : i32
    %c0_i32_0 = arith.constant 0 : i32
    %c0_i32_1 = arith.constant 0 : i32
    return %c0_i32, %c0_i32_0 : i32, i32
  }
  func.func @transform_2(%arg0: i32) -> (i32, i32) {
    %c0_i32 = arith.constant 0 : i32
    %c0_i32_0 = arith.constant 0 : i32
    %c0_i32_1 = arith.constant 0 : i32
    return %c0_i32, %c0_i32_0 : i32, i32
  }
  func.func @transform_3(%arg0: i32) -> (i32, i32) {
    %c0_i32 = arith.constant 0 : i32
    %c0_i32_0 = arith.constant 0 : i32
    %c0_i32_1 = arith.constant 0 : i32
    return %c0_i32, %c0_i32_0 : i32, i32
  }
  func.func @transform_4(%arg0: i32) -> (i32, i32, i32) {
    %c0_i32 = arith.constant 0 : i32
    %c0_i32_0 = arith.constant 0 : i32
    %c0_i32_1 = arith.constant 0 : i32
    %c0_i32_2 = arith.constant 0 : i32
    return %c0_i32, %c0_i32_0, %c0_i32_1 : i32, i32, i32
  }
  func.func @transform_5(%arg0: i32) -> (i32, i32) {
    %c0_i32 = arith.constant 0 : i32
    %c0_i32_0 = arith.constant 0 : i32
    %c0_i32_1 = arith.constant 0 : i32
    return %c0_i32, %c0_i32_0 : i32, i32
  }
  func.func @transform_6(%arg0: i32) -> (i32, i32) {
    %c0_i32 = arith.constant 0 : i32
    %c0_i32_0 = arith.constant 0 : i32
    %c0_i32_1 = arith.constant 0 : i32
    return %c0_i32, %c0_i32_0 : i32, i32
  }
  func.func @transform_7(%arg0: i32) -> (i32, i32) {
    %c0_i32 = arith.constant 0 : i32
    %c0_i32_0 = arith.constant 0 : i32
    %c0_i32_1 = arith.constant 0 : i32
    return %c0_i32, %c0_i32_0 : i32, i32
  }
  func.func @transform_8(%arg0: i32) -> (i32, i32) {
    %c0_i32 = arith.constant 0 : i32
    %c0_i32_0 = arith.constant 0 : i32
    %c0_i32_1 = arith.constant 0 : i32
    return %c0_i32, %c0_i32_0 : i32, i32
  }
  func.func @transform_9(%arg0: i32) -> (i32, i32) {
    %c0_i32 = arith.constant 0 : i32
    %c0_i32_0 = arith.constant 0 : i32
    %c0_i32_1 = arith.constant 0 : i32
    return %c0_i32, %c0_i32_0 : i32, i32
  }
  func.func @transform_10(%arg0: i32) -> (i32, i32) {
    %c0_i32 = arith.constant 0 : i32
    %c0_i32_0 = arith.constant 0 : i32
    %c0_i32_1 = arith.constant 0 : i32
    return %c0_i32, %c0_i32_0 : i32, i32
  }
  func.func @transform_11(%arg0: i32) -> (i32, i32) {
    %c0_i32 = arith.constant 0 : i32
    %c0_i32_0 = arith.constant 0 : i32
    %c0_i32_1 = arith.constant 0 : i32
    return %c0_i32, %c0_i32_0 : i32, i32
  }
  func.func @transform_12(%arg0: i32) -> (i32, i32) {
    %c0_i32 = arith.constant 0 : i32
    %c0_i32_0 = arith.constant 0 : i32
    %c0_i32_1 = arith.constant 0 : i32
    return %c0_i32, %c0_i32_0 : i32, i32
  }
  func.func @transform_13(%arg0: i32) -> (i32, i32, i32, i32) {
    %c0_i32 = arith.constant 0 : i32
    %c0_i32_0 = arith.constant 0 : i32
    %c0_i32_1 = arith.constant 0 : i32
    %c0_i32_2 = arith.constant 0 : i32
    return %arg0, %c0_i32, %c0_i32_0, %c0_i32_1 : i32, i32, i32, i32
  }
}

</mosaic_0001>

<bundles_post_ra>
// kernel: tpu_custom_call.1
= control target key start
LH: loop header
LB: loop body
LE: loop exit
PB: predicated region body
PF: predicated region fallthrough
CT: control target
= control target key end

     0   :  { %s7501_s0 = inlined_call_operand.hbm [shape: bf16[2,16,16,128], index: 0, kind: input, shape index: {}]   ;;  %s7502_s1 = inlined_call_operand.hbm [shape: bf16[128,128], index: 1, kind: input, shape index: {}]   ;;  %s7503_s2 = inlined_call_operand.vmem [shape: f32[1,128], index: 2, kind: input, shape index: {}]   ;;  %s7504_s3 = inlined_call_operand.vmem [shape: f32[1,128], index: 3, kind: input, shape index: {}]   ;;  %s7505_s4 = inlined_call_operand.hbm [shape: bf16[3,384,128], index: 4, kind: input, shape index: {}]   ;;  %s7506_s5 = inlined_call_operand.vmem [shape: f32[1,128], index: 5, kind: input, shape index: {}]   ;;  %s7507_s6 = inlined_call_operand.vmem [shape: f32[1,128], index: 6, kind: input, shape index: {}]   ;;  %s7508_s7 = inlined_call_operand.hbm [shape: bf16[128,128], index: 7, kind: input, shape index: {}]   ;;  %s7509_s8 = inlined_call_operand.vmem [shape: f32[1,128], index: 8, kind: input, shape index: {}]   ;;  %s7510_s9 = inlined_call_operand.vmem [shape: f32[1,128], index: 9, kind: input, shape index: {}]   ;;  %s7511_s10 = inlined_call_operand.hbm [shape: bf16[128,128], index: 10, kind: input, shape index: {}]   ;;  %s7512_s11 = inlined_call_operand.vmem [shape: f32[1,128], index: 11, kind: input, shape index: {}]   ;;  %s7513_s12 = inlined_call_operand.vmem [shape: f32[1,128], index: 12, kind: input, shape index: {}]   ;;  %s7514_s13 = inlined_call_operand.hbm [shape: bf16[2,16,16,128], index: 13, kind: output, shape index: {}]  }
   0x1   :  { %7521 = sst [smem:[#allocation19_spill]] %s7509_s8 }
   0x2   :  { %7522 = sst [smem:[#allocation20_spill]] %s7510_s9 }
   0x3   :  { %7523 = sst [smem:[#allocation21_spill]] %s7512_s11 }
   0x4   :  { %7524 = sst [smem:[#allocation22_spill]] %s7513_s12 }
   0x5   :  { %7525 = sst [smem:[#allocation23_spill]] %s7514_s13 }
   0x6   :  { %18 = vsyncpa [#allocation4], 0 }
   0x7   :  { %20 = vsyncpa [#allocation4 + $0x1], 0 }
   0x8   :  { %21 = vsyncpa [#allocation7], 0 }
   0x9   :  { %22 = vsyncpa [#allocation10], 0 }
   0xa   :  { %23 = vsyncpa [#allocation5], 0 }
   0xb   :  { %25 = vsyncpa [#allocation5 + $0x1], 0  ;;  %s6097_s25 = smov 0   ;;  %s6099_s26 = smov 0  }
   0xc   :  { %s6101_s27 = smov 0   ;;  %s6103_s28 = smov 0  }
   0xd LB: > { %7526 = sst [smem:[#allocation17_spill]] %s6002_s25  ;;  %s6118_s29 = sadd.s32 4294967295, %s6014_s28   ;;  %s6014_s28 = sphi %s6103_s28, %s7562_s28   ;;  %s6010_s27 = sphi %s6101_s27, %s7561_s27   ;;  %s6006_s26 = sphi %s6099_s26, %s7560_s26   ;;  %s6002_s25 = sphi %s6097_s25, %s7559_s25  }
   0xe   : > { %s4330_s30 = sadd.s32 4294967294, %s6014_s28   ;;  %p51_p0 = scmp.ne.s32.totalorder %s6006_s26, %s6002_s25 }
   0xf   : > { %p7518_p1 = scmp.eq.s32.totalorder %s6118_s29, 0  ;;  %p333_p3 = scmp.eq.s32.totalorder %s4330_s30, 1 }
  0x10   : > { %p4331_p5 = scmp.ge.s32.totalorder %s6014_s28, 1  ;;  %p340_p7 = scmp.lt.s32.totalorder %s6014_s28, 3 }
  0x11   : > { %p6127_p4 = por %p7518_p1, %p51_p0  ;;  %p6132_p6 = por %p333_p3, %p51_p0 }
  0x12   : > { %p6137_p8 = pnand %p4331_p5, %p340_p7  ;;  %s6016_s17 = smov [#allocation6]  }
  0x13   : > { %s7527_s14 = scalar_select %p6127_p4, 1, 0 }
  0x14   : > { %s7528_s15 = scalar_select %p6132_p6, 1, 0 }
  0x15   : > { %s7530_s16 = scalar_select %p6137_p8, 1, 0 }
  0x16   : > { %7529 = sst [smem:[#allocation18_spill]] %s7528_s15  ;;  %s352_s18 = sshll.u32 %s6016_s17, 4  ;;  %s6141_s18 = int_to_ptr.vmem [resolvable:$true] %s352_s18 }
  0x17   : > { %p5597_p9 = pneg %p6137_p8  ;;  %s6017_s20 = smov [#allocation9]  }
  0x18   : > { %s390_s21 = sshll.u32 %s6017_s20, 4  ;;  %s6018_s22 = smov [#allocation8]   ;;  %s6152_s21 = int_to_ptr.vmem [resolvable:$true] %s390_s21 }
  0x19   : > { %p6148_p11 = pnand %p5597_p9, %p7518_p1  ;;  %s6154_s23 = sshll.u32 %s6018_s22, 4  ;;  %s372_s23 = int_to_ptr.vmem [resolvable:$true] %s6154_s23 }
  0x1a   : > { %s5798_s17 = scalar_lea.hbm %s7502_s1, 1024 }
  0x1b   : > { %p5799_p12 = scmp.ne.s32.totalorder %s7502_s1, %s5798_s17  ;;  %p6164_p13 = pneg %p6148_p11 }
  0x1c   : > { %p5805_p5 = scmp.lt.u32.totalorder %s5798_s17, %s7502_s1 }
  0x1d   : > { %p5801_p0 = pnand %p6164_p13, %p5799_p12 }
  0x1f   : > { %p5802_p3 = pneg %p5801_p0 }
  0x21   : > { %p5807_p7 = pnand %p5805_p5, %p5802_p3 }
  0x23   : > { %5810 = shalt.err (!%p5807_p7)
}
  0x24   : > { %s5811_s25 = scalar_lea.vmem %s6141_s18, 1024  ;;  %p5819_p2 = scmp.lt.s32.totalorder %s6141_s18, %s6141_s18 }
  0x25   : > { %p5812_p9 = scmp.ne.s32.totalorder %s6141_s18, %s5811_s25  ;;  %p5820_p6 = scmp.lt.s32.totalorder %s5811_s25, %s5811_s25 }
  0x27   : > { %p5814_p10 = pnand %p5812_p9, %p6164_p13  ;;  %p5821_p12 = por %p5820_p6, %p5819_p2 }
  0x29   : > { %p5815_p1 = pneg %p5814_p10 }
  0x2b   : > { %p5822_p0 = pnand %p5821_p12, %p5815_p1 }
  0x2d   : > { %5825 = shalt.err (!%p5822_p0)
}
  0x2e   : > { %s6019_s15 = smov 64   ;;  %s6020_s24 = smov 4  }
  0x2f   : > { %5600 = dma.hbm_to_vmem [thread:$0]  (!%p6148_p11), %s7502_s1, 1024, %s6141_s18, [#allocation7], %s6019_s15, %s6019_s15, %s6020_s24  }
  0x30   : > { %s5826_s25 = scalar_lea.hbm %s7508_s7, 1024 }
  0x31   : > { %p5827_p1 = scmp.ne.s32.totalorder %s7508_s7, %s5826_s25  ;;  %p5833_p10 = scmp.lt.u32.totalorder %s5826_s25, %s7508_s7 }
  0x33   : > { %p5829_p2 = pnand %p5827_p1, %p6164_p13 }
  0x35   : > { %p5830_p6 = pneg %p5829_p2 }
  0x37   : > { %p5835_p3 = pnand %p5833_p10, %p5830_p6 }
  0x39   : > { %5838 = shalt.err (!%p5835_p3)
}
  0x3a   : > { %s5839_s18 = scalar_lea.vmem %s6152_s21, 1024  ;;  %p5847_p12 = scmp.lt.s32.totalorder %s6152_s21, %s6152_s21 }
  0x3b   : > { %p5840_p5 = scmp.ne.s32.totalorder %s6152_s21, %s5839_s18  ;;  %p5848_p0 = scmp.lt.s32.totalorder %s5839_s18, %s5839_s18 }
  0x3d   : > { %p5842_p7 = pnand %p5840_p5, %p6164_p13  ;;  %p5849_p1 = por %p5848_p0, %p5847_p12 }
  0x3f   : > { %p5843_p9 = pneg %p5842_p7 }
  0x41   : > { %p5850_p2 = pnand %p5849_p1, %p5843_p9 }
  0x43   : > { %5853 = shalt.err (!%p5850_p2)
}
  0x44   : > { %5606 = dma.hbm_to_vmem [thread:$0]  (!%p6148_p11), %s7508_s7, 1024, %s6152_s21, [#allocation10], %s6019_s15, %s6019_s15, %s6020_s24  }
  0x45   : > { %s5854_s30 = scalar_lea.hbm %s7505_s4, 9216 }
  0x46   : > { %p5855_p6 = scmp.ne.s32.totalorder %s7505_s4, %s5854_s30  ;;  %p5861_p5 = scmp.lt.u32.totalorder %s5854_s30, %s7505_s4 }
  0x48   : > { %p5857_p10 = pnand %p5855_p6, %p6164_p13 }
  0x4a   : > { %p5858_p3 = pneg %p5857_p10 }
  0x4c   : > { %p5863_p7 = pnand %p5861_p5, %p5858_p3 }
  0x4e   : > { %5866 = shalt.err (!%p5863_p7)
}
  0x4f   : > { %s5867_s18 = scalar_lea.vmem %s372_s23, 9216  ;;  %p5875_p1 = scmp.lt.s32.totalorder %s372_s23, %s372_s23 }
  0x50   : > { %p5868_p9 = scmp.ne.s32.totalorder %s372_s23, %s5867_s18  ;;  %p5876_p2 = scmp.lt.s32.totalorder %s5867_s18, %s5867_s18 }
  0x52   : > { %p5870_p12 = pnand %p5868_p9, %p6164_p13  ;;  %p5877_p4 = por %p5876_p2, %p5875_p1 }
  0x54   : > { %p5871_p0 = pneg %p5870_p12 }
  0x56   : > { %p5878_p8 = pnand %p5877_p4, %p5871_p0 }
  0x58   : > { %5881 = shalt.err (!%p5878_p8)
}
  0x59   : > { %5603 = dma.hbm_to_vmem [thread:$0]  (!%p6148_p11), %s7505_s4, 9216, %s372_s23, [#allocation7], %s6019_s15, %s6019_s15, %s6020_s24  }
  0x5a   : > { %s6021_s9 = smov [#allocation11]   ;;  %s5882_s17 = scalar_lea.hbm %s7511_s10, 1024 }
  0x5b   : > { %s409_s11 = sshll.u32 %s6021_s9, 4  ;;  %p5883_p4 = scmp.ne.s32.totalorder %s7511_s10, %s5882_s17  ;;  %s410_s11 = int_to_ptr.vmem [resolvable:$true] %s409_s11 }
  0x5c   : > { %p5889_p10 = scmp.lt.u32.totalorder %s5882_s17, %s7511_s10 }
  0x5d   : > { %p5885_p8 = pnand %p5883_p4, %p6164_p13 }
  0x5f   : > { %p5886_p6 = pneg %p5885_p8 }
  0x61   : > { %p5891_p3 = pnand %p5889_p10, %p5886_p6 }
  0x63   : > { %5894 = shalt.err (!%p5891_p3)
}
  0x64   : > { %s5895_s23 = scalar_lea.vmem %s410_s11, 1024  ;;  %p5903_p12 = scmp.lt.s32.totalorder %s410_s11, %s410_s11 }
  0x65   : > { %p5896_p5 = scmp.ne.s32.totalorder %s410_s11, %s5895_s23  ;;  %p5904_p0 = scmp.lt.s32.totalorder %s5895_s23, %s5895_s23 }
  0x67   : > { %p5898_p7 = pnand %p5896_p5, %p6164_p13  ;;  %p5905_p1 = por %p5904_p0, %p5903_p12 }
  0x69   : > { %p5899_p9 = pneg %p5898_p7 }
  0x6b   : > { %p5906_p2 = pnand %p5905_p1, %p5899_p9 }
  0x6d   : > { %5909 = shalt.err (!%p5906_p2)
}
  0x6e   : > { %5609 = dma.hbm_to_vmem [thread:$0]  (!%p6148_p11), %s7511_s10, 1024, %s410_s11, [#allocation10], %s6019_s15, %s6019_s15, %s6020_s24  }
  0x6f   : > { %s6258_s13 = sadd.s32 1, %s6014_s28   ;;  %s38_s19 = sadd.s32 1, %s6010_s27 }
  0x70   : > { %s35_s9 = ssub.s32 %s6014_s28, %s6258_s13  ;;  %p45_p13 = scmp.ne.s32.totalorder %s6010_s27, %s6006_s26 }
  0x71   : > { %p36_p4 = scmp.eq.s32.totalorder %s35_s9, 0  ;;  %p46_p8 = scmp.eq.s32.totalorder %s6014_s28, 0 }
  0x72   : > { %p7533_p6 = scmp.eq.s32.totalorder %s6118_s29, 1  ;;  %p5622_p3 = scmp.lt.s32.totalorder %s6014_s28, 2 }
  0x73   : > { %s6274_s30 = scalar_select %p36_p4, %s6010_s27, %s38_s19  }
  0x74   : > { %p6268_p10 = por %p7533_p6, %p45_p13  ;;  %p47_p5 = por %p46_p8, %p45_p13 }
  0x75   : > { %s429_s17 = sand.u32 1, %s6010_s27   ;;  %s4520_s11 = sshll.u32 %s6014_s28, 11 }
  0x76   : > { %s4337_s20 = sshll.u32 %s429_s17, 7  ;;  %s6281_s18 = scalar_lea.hbm %s7501_s0, %s4520_s11 }
  0x77   : > { %s433_s23 = scalar_lea.vmem [#allocation3], %s4337_s20  ;;  %p6285_p11 = pnand %p5622_p3, %p47_p5 }
  0x78   : > { %s440_s21 = sshll.u32 %s433_s23, 4  ;;  %s6289_s19 = scalar_lea.sflag [#allocation4], %s429_s17  ;;  %s6283_s21 = int_to_ptr.vmem [resolvable:$true] %s440_s21 }
  0x79   : > { %s5910_s9 = scalar_lea.hbm %s6281_s18, 2048  ;;  %p5912_p9 = pneg %p6285_p11 }
  0x7a   : > { %p5911_p7 = scmp.ne.s32.totalorder %s6281_s18, %s5910_s9  ;;  %s5915_s22 = scalar_lea.hbm %s7501_s0, 4096 }
  0x7b   : > { %p5916_p1 = scmp.lt.u32.totalorder %s6281_s18, %s7501_s0  ;;  %p5917_p2 = scmp.lt.u32.totalorder %s5915_s22, %s5910_s9 }
  0x7c   : > { %p5913_p12 = pnand %p5912_p9, %p5911_p7  ;;  %p5919_p4 = scmp.lt.u32.totalorder %s5910_s9, %s6281_s18 }
  0x7d   : > { %p5918_p13 = por %p5917_p2, %p5916_p1 }
  0x7e   : > { %p5914_p0 = pneg %p5913_p12 }
  0x7f   : > { %p5920_p8 = por %p5919_p4, %p5918_p13 }
  0x81   : > { %p5921_p6 = pnand %p5920_p8, %p5914_p0 }
  0x83   : > { %5924 = shalt.err (!%p5921_p6)
}
  0x84   : > { %s5925_s17 = scalar_lea.vmem %s6283_s21, 2048  ;;  %s6022_s20 = smov [#allocation3]  }
  0x85   : > { %p5926_p3 = scmp.ne.s32.totalorder %s6283_s21, %s5925_s17  ;;  %s5930_s11 = sshll.u32 %s6022_s20, 4  ;;  %s5931_s11 = int_to_ptr.vmem [resolvable:$false] %s5930_s11 }
  0x86   : > { %s5932_s25 = scalar_lea.vmem %s5931_s11, 4096  ;;  %p5933_p12 = scmp.lt.s32.totalorder %s6283_s21, %s5931_s11 }
  0x87   : > { %p5928_p5 = pnand %p5926_p3, %p5912_p9  ;;  %p5934_p1 = scmp.lt.s32.totalorder %s5932_s25, %s5925_s17 }
  0x89   : > { %p5929_p7 = pneg %p5928_p5  ;;  %p5935_p2 = por %p5934_p1, %p5933_p12 }
  0x8b   : > { %p5936_p13 = pnand %p5935_p2, %p5929_p7 }
  0x8d   : > { %5939 = shalt.err (!%p5936_p13)
}
  0x8e   : > { %5613 = dma.hbm_to_vmem [thread:$0]  (!%p6285_p11), %s6281_s18, 2048, %s6283_s21, %s6289_s19, %s6019_s15, %s6019_s15, %s6020_s24  }
  0x8f   : > { %p7536_p9 = scmp.ne.s32.totalorder %s7530_s16, 0 }
  0x90   : > { %s6323_s9 = sand.u32 (!%p7536_p9), 1, %s6006_s26   ;;  %p7537_p0 = scmp.ne.s32.totalorder (!%p7536_p9), %s7527_s14, 0 }
  0x91   : > { %452 = sbr.rel (%p7536_p9) target bundleno = 1268 (0x4f4), region = 72  ;;  %s4341_s22 = sshll.u32 (!%p7536_p9), %s6323_s9, 7 }
  0x92   : > { %s455_s23 = scalar_lea.sflag (!%p7536_p9), [#allocation4], %s6323_s9  ;;  %s6329_s8 = scalar_lea.vmem (!%p7536_p9), [#allocation3], %s4341_s22 }
  0x98   : > { %5985 = dma.done.wait (%p7537_p0), %s455_s23, 2048  }
  0x99   : > { %5987 = vsyncadd (%p7537_p0), %s455_s23, 4294965248  ;;  %p7538_p11 = scmp.eq.s32.totalorder %s6118_s29, 0 }
  0x9b   : > { %5989 = dma.done.wait (%p7538_p11), [#allocation7], 10240   ;;  %p7539_p4 = pmov %p7538_p11 }
  0x9d   : > { %5991 = vsyncadd (%p7539_p4), [#allocation7], 4294957056  ;;  %p7540_p8 = pmov %p7539_p4 }
  0x9e   : > { %p7541_p6 = pmov %p7539_p4 }
  0x9f   : > { %5993 = dma.done.wait (%p7540_p8), [#allocation10], 2048  }
  0xa0   : > { %5995 = vsyncadd (%p7541_p6), [#allocation10], 4294965248  ;;  %v5669_v0 = vld [vmem:[#allocation6] sm:$0xff]   ;;  %v5670_v1 = vld [vmem:[#allocation6 + $0x8] sm:$0xff]   ;;  %vm526_vm0 = vcmask 1040384   ;;  %vm577_vm2 = vcmask 1047559  }
  0xa1   : > { %5129 = vmatprep.subr.bf16.mxu0 %v5669_v0  ;;  %v5671_v2 = vld [vmem:[#allocation6 + $0x10] sm:$0xff]   ;;  %v5672_v3 = vld [vmem:[#allocation6 + $0x18] sm:$0xff]   ;;  %v5677_v4 = vld [vmem:[%s6329_s8] sm:$0xff]   ;;  %vm527_vm1 = vsmask.f32 256  ;;  %vm1235_vm6 = vcmask 1047552  }
  0xa2   : > { %5130 = vmatpush3.bf16.msra.mxu0 %v5669_v0  ;;  %5145 = vmatprep.mubr.bf16.mxu0 %v5677_v4  ;;  %v5673_v5 = vld [vmem:[#allocation6 + $0x20] sm:$0xff]   ;;  %v5674_v6 = vld [vmem:[#allocation6 + $0x28] sm:$0xff]   ;;  %v5675_v7 = vld [vmem:[#allocation6 + $0x30] sm:$0xff]   ;;  %vm578_vm4 = vsmask.f32 7966  ;;  %s7550_s25 = sld [smem:[#allocation19_spill]] }
  0xa3   : > { %5131 = vmatprep.subr.bf16.mxu0 %v5670_v1  ;;  %v5676_v8 = vld [vmem:[#allocation6 + $0x38] sm:$0xff]   ;;  %v5693_v9 = vld [vmem:[#allocation8 + $0x140] sm:$0xff]   ;;  %v5678_v10 = vld [vmem:[%s6329_s8 + $0x8] sm:$0xff]   ;;  %vm1236_vm7 = vsmask.f32 7938  ;;  %s7551_s14 = sld [smem:[#allocation21_spill]] }
  0xa4   : > { %v5697_v11 = vld [vmem:[#allocation8 + $0x100] sm:$0xff]   ;;  %v5679_v12 = vld [vmem:[%s6329_s8 + $0x10] sm:$0xff]   ;;  %v5694_v13 = vld [vmem:[#allocation8 + $0x148] sm:$0xff]   ;;  %vm1350_vm8 = vsmask.f32 7424  ;;  %s7552_s24 = sld [smem:[#allocation20_spill]] }
  0xa5   : > { %4673 = vmatprep.subr.bf16.mxu1 %v5697_v11  ;;  %v5699_v14 = vld [vmem:[#allocation8 + $0xc0] sm:$0xff]   ;;  %v5700_v15 = vld [vmem:[#allocation8 + $0x108] sm:$0xff]   ;;  %v5695_v16 = vld [vmem:[#allocation8 + $0x150] sm:$0xff]   ;;  %s7553_s19 = sld [smem:[#allocation22_spill]]  ;;  %s7309_s17 = scalar_lea.vmem [#allocation12], %s4341_s22 }
  0xa6   : > { %5132 = vmatpush3.bf16.msra.mxu0 %v5670_v1  ;;  %4674 = vmatpush3.bf16.msra.mxu1 %v5699_v14  ;;  %v5680_v17 = vld [vmem:[%s6329_s8 + $0x18] sm:$0xff]   ;;  %v5681_v18 = vld [vmem:[%s6329_s8 + $0x20] sm:$0xff]   ;;  %v5682_v21 = vld [vmem:[%s6329_s8 + $0x28] sm:$0xff]   ;;  %s4553_s22 = sshll.u32 %s6118_s29, 11  ;;  %s4219_s20 = sshll.u32 %s7309_s17, 4  ;;  %s7455_s20 = int_to_ptr.vmem [resolvable:$true] %s4219_s20 }
  0xa7   : > { %5133 = vmatprep.subr.bf16.mxu0 %v5671_v2  ;;  %4675 = vmatprep.subr.bf16.mxu1 %v5700_v15  ;;  %v5696_v19 = vld [vmem:[#allocation8 + $0x158] sm:$0xff]   ;;  %v5698_v20 = vld [vmem:[#allocation8 + $0x160] sm:$0xff]   ;;  %v5683_v22 = vld [vmem:[%s6329_s8 + $0x30] sm:$0xff]   ;;  %s7554_s23 = sld [smem:[#allocation23_spill]]  ;;  %s4206_s29 = scalar_lea.sflag [#allocation5], %s6323_s9 }
  0xa8   : > { %v5684_v23 = vld [vmem:[%s6329_s8 + $0x38] sm:$0xff]   ;;  %v5685_v24 = vld [vmem:[%s6329_s8 + $0x40] sm:$0xff]   ;;  %v5686_v25 = vld [vmem:[%s6329_s8 + $0x48] sm:$0xff]   ;;  %s6024_s16 = smov [#allocation12]  }
  0xa9   : > { %v5687_v26 = vld [vmem:[%s6329_s8 + $0x50] sm:$0xff]   ;;  %v5688_v27 = vld [vmem:[%s6329_s8 + $0x58] sm:$0xff]   ;;  %v5689_v28 = vld [vmem:[%s6329_s8 + $0x60] sm:$0xff]   ;;  %s5944_s15 = sshll.u32 %s6024_s16, 4  ;;  %s5945_s15 = int_to_ptr.vmem [resolvable:$false] %s5944_s15 }
  0xaa   : > { %5134 = vmatpush3.bf16.msra.mxu0 %v5671_v2  ;;  %v5690_v29 = vld [vmem:[%s6329_s8 + $0x68] sm:$0xff]   ;;  %v5691_v30 = vld [vmem:[%s6329_s8 + $0x70] sm:$0xff]   ;;  %v5692_v31 = vld [vmem:[%s6329_s8 + $0x78] sm:$0xff]   ;;  %p5947_p12 = scmp.lt.s32.totalorder %s7455_s20, %s5945_s15 }
  0xab   : > { %5135 = vmatprep.subr.bf16.mxu0 %v5672_v3  ;;  %v5701_v32 = vld [vmem:[#allocation8 + $0xc8] sm:$0xff]   ;;  %v5702_v33 = vld [vmem:[#allocation8 + $0x110] sm:$0xff]   ;;  %v5705_v35 = vld [vmem:[#allocation8 + $0x118] sm:$0xff]  }
  0xac   : > { %4676 = vmatpush3.bf16.msra.mxu1 %v5701_v32  ;;  %v5704_v34 = vld [vmem:[#allocation8 + $0xd0] sm:$0xff]   ;;  %v5706_v36 = vld [vmem:[#allocation8 + $0xd8] sm:$0xff]   ;;  %v5707_v37 = vld [vmem:[#allocation8 + $0x120] sm:$0xff]  }
  0xad   : > { %4677 = vmatprep.subr.bf16.mxu1 %v5702_v33  ;;  %v5709_v38 = vld [vmem:[#allocation8 + $0xe0] sm:$0xff]   ;;  %v5710_v39 = vld [vmem:[#allocation8 + $0x128] sm:$0xff]   ;;  %vm6359_vm3 = vmand %vm526_vm0, %vm527_vm1 }
  0xae   : > { %5136 = vmatpush3.bf16.msra.mxu0 %v5672_v3  ;;  %v532_v40 = vld [vmem:[#allocation2 + $0x30] sm:$0x1]  ;;  %v583_v42 = vld [vmem:[#allocation2 + $0x40] sm:$0x80]  ;;  %v5703_v43 = vld [vmem:[#allocation8 + $0x168] sm:$0xff]  }
  0xaf   : > { %5137 = vmatprep.subr.bf16.mxu0 %v5673_v5  ;;  %v533_v44 = vsel %vm6359_vm3, 0, %v532_v40  ;;  %vm6365_vm5 = vmand %vm577_vm2, %vm578_vm4  ;;  %v529_v46 = vld [vmem:[#allocation2 + $0x18] sm:$0x1]  ;;  %v580_v47 = vld [vmem:[#allocation2 + $0x28] sm:$0x80] }
  0xb0   : > { %4678 = vmatpush3.bf16.msra.mxu1 %v5704_v34  ;;  %534 = vst [vmem:[#allocation2 + $0x30] sm:$0x1] %v533_v44  ;;  %v584_v48 = vsel %vm6365_vm5, 0, %v583_v42  ;;  %v530_v49 = vsel %vm6359_vm3, 0, %v529_v46  ;;  %v581_v50 = vsel %vm6365_vm5, 0, %v580_v47  ;;  %v5711_v51 = vld [vmem:[#allocation8 + $0xe8] sm:$0xff]   ;;  %vm6463_vm9 = vmand %vm1235_vm6, %vm1236_vm7 }
  0xb1   : > { %4679 = vmatprep.subr.bf16.mxu1 %v5705_v35  ;;  %v5712_v52 = vld [vmem:[#allocation8 + $0x130] sm:$0xff]   ;;  %585 = vst [vmem:[#allocation2 + $0x40] sm:$0x80] %v584_v48  ;;  %531 = vst [vmem:[#allocation2 + $0x18] sm:$0x1] %v530_v49  ;;  %v5715_v55 = vld [vmem:[#allocation8 + $0x138] sm:$0xff]  }
  0xb2   : > { %5138 = vmatpush3.bf16.msra.mxu0 %v5673_v5  ;;  %582 = vst [vmem:[#allocation2 + $0x28] sm:$0x80] %v581_v50  ;;  %v5708_v53 = vld [vmem:[#allocation8 + $0x170] sm:$0xff]   ;;  %v5713_v56 = vld [vmem:[#allocation8 + $0x178] sm:$0xff]   ;;  %v589_v60 = vld [vmem:[#allocation2 + $0x70] sm:$0x80] }
  0xb3   : > { %5139 = vmatprep.subr.bf16.mxu0 %v5674_v6  ;;  %v5714_v54 = vld [vmem:[#allocation8 + $0xf0] sm:$0xff]   ;;  %v5716_v57 = vld [vmem:[#allocation8 + $0xf8] sm:$0xff]   ;;  %v590_v62 = vsel %vm6365_vm5, 0, %v589_v60  ;;  %v586_v0 = vld [vmem:[#allocation2 + $0x58] sm:$0x80] }
  0xb4   : > { %4680 = vmatpush3.bf16.msra.mxu1 %v5706_v36  ;;  %v538_v58 = vld [vmem:[#allocation2 + $0x60] sm:$0x1]  ;;  %v535_v61 = vld [vmem:[#allocation2 + $0x48] sm:$0x1]  ;;  %591 = vst [vmem:[#allocation2 + $0x70] sm:$0x80] %v590_v62  ;;  %vm6470_vm10 = vmand %vm1235_vm6, %vm1350_vm8 }
  0xb5   : > { %4681 = vmatprep.subr.bf16.mxu1 %v5707_v37  ;;  %v539_v59 = vsel %vm6359_vm3, 0, %v538_v58  ;;  %v536_v63 = vsel %vm6359_vm3, 0, %v535_v61  ;;  %v587_v1 = vsel %vm6365_vm5, 0, %v586_v0  ;;  %v544_v2 = vld [vmem:[#allocation2 + $0x90] sm:$0x1] }
  0xb6   : > { %5140 = vmatpush3.bf16.msra.mxu0 %v5674_v6  ;;  %540 = vst [vmem:[#allocation2 + $0x60] sm:$0x1] %v539_v59  ;;  %537 = vst [vmem:[#allocation2 + $0x48] sm:$0x1] %v536_v63  ;;  %v595_v3 = vld [vmem:[#allocation2 + $0xa0] sm:$0x80] }
  0xb7   : > { %5141 = vmatprep.subr.bf16.mxu0 %v5675_v7  ;;  %588 = vst [vmem:[#allocation2 + $0x58] sm:$0x80] %v587_v1  ;;  %v545_v4 = vsel %vm6359_vm3, 0, %v544_v2  ;;  %v596_v5 = vsel %vm6365_vm5, 0, %v595_v3  ;;  %v541_v6 = vld [vmem:[#allocation2 + $0x78] sm:$0x1] }
  0xb8   : > { %4682 = vmatpush3.bf16.msra.mxu1 %v5709_v38  ;;  %546 = vst [vmem:[#allocation2 + $0x90] sm:$0x1] %v545_v4  ;;  %597 = vst [vmem:[#allocation2 + $0xa0] sm:$0x80] %v596_v5  ;;  %v601_v11 = vld [vmem:[#allocation2 + $0xd0] sm:$0x80] }
  0xb9   : > { %4683 = vmatprep.subr.bf16.mxu1 %v5710_v39  ;;  %v547_v14 = vld [vmem:[#allocation2 + $0xa8] sm:$0x1]  ;;  %v610_v33 = vld [vmem:[#allocation2 + $0x118] sm:$0x80]  ;;  %v568_v35 = vld [vmem:[#allocation2 + $0x150] sm:$0x1] }
  0xba   : > { %5142 = vmatpush3.bf16.msra.mxu0 %v5675_v7  ;;  %v592_v7 = vld [vmem:[#allocation2 + $0x88] sm:$0x80]  ;;  %v548_v15 = vsel %vm6359_vm3, 0, %v547_v14  ;;  %v611_v34 = vsel %vm6365_vm5, 0, %v610_v33  ;;  %v619_v36 = vld [vmem:[#allocation2 + $0x160] sm:$0x80] }
  0xbb   : > { %5143 = vmatprep.subr.bf16.mxu0 %v5676_v8  ;;  %549 = vst [vmem:[#allocation2 + $0xa8] sm:$0x1] %v548_v15  ;;  %612 = vst [vmem:[#allocation2 + $0x118] sm:$0x80] %v611_v34  ;;  %v569_v37 = vsel %vm6359_vm3, 0, %v568_v35  ;;  %v620_v38 = vsel %vm6365_vm5, 0, %v619_v36 }
  0xbc   : > { %4684 = vmatpush3.bf16.msra.mxu1 %v5711_v51  ;;  %v565_v39 = vld [vmem:[#allocation2 + $0x138] sm:$0x1]  ;;  %570 = vst [vmem:[#allocation2 + $0x150] sm:$0x1] %v569_v37  ;;  %621 = vst [vmem:[#allocation2 + $0x160] sm:$0x80] %v620_v38 }
  0xbd   : > { %4685 = vmatprep.subr.bf16.mxu1 %v5712_v52  ;;  %v566_v40 = vsel %vm6359_vm3, 0, %v565_v39  ;;  %v616_v42 = vld [vmem:[#allocation2 + $0x148] sm:$0x80]  ;;  %v574_v44 = vld [vmem:[#allocation2 + $0x180] sm:$0x1]  ;;  %v1238_v35 = vld [vmem:[#allocation2 + $0x18] sm:$0xff] }
  0xbe   : > { %5144 = vmatpush3.bf16.msra.mxu0 %v5676_v8  ;;  %v542_v8 = vsel %vm6359_vm3, 0, %v541_v6  ;;  %567 = vst [vmem:[#allocation2 + $0x138] sm:$0x1] %v566_v40  ;;  %v625_v46 = vld [vmem:[#allocation2 + $0x190] sm:$0x80]  ;;  %v575_v47 = vsel %vm6359_vm3, 0, %v574_v44 }
  0xbf   : > { %5177 = vmatprep.subr.bf16.mxu0 %v5693_v9  ;;  %543 = vst [vmem:[#allocation2 + $0x78] sm:$0x1] %v542_v8  ;;  %v626_v48 = vsel %vm6365_vm5, 0, %v625_v46  ;;  %v571_v49 = vld [vmem:[#allocation2 + $0x168] sm:$0x1] }
  0xc0   : > { %4686 = vmatpush3.bf16.msra.mxu1 %v5714_v54  ;;  %576 = vst [vmem:[#allocation2 + $0x180] sm:$0x1] %v575_v47  ;;  %627 = vst [vmem:[#allocation2 + $0x190] sm:$0x80] %v626_v48  ;;  %v572_v50 = vsel %vm6359_vm3, 0, %v571_v49  ;;  %v6023_v54 = vmov 0  }
  0xc1   : > { %5146 = vmatmul.mubr.bf16.vlgmr.msra.gmra.mrb[0].mxu0 %v5678_v10  ;;  %4687 = vmatprep.subr.bf16.mxu1 %v5715_v55  ;;  %v550_v10 = vld [vmem:[#allocation2 + $0xc0] sm:$0x1]  ;;  %v622_v51 = vld [vmem:[#allocation2 + $0x178] sm:$0x80]  ;;  %573 = vst [vmem:[#allocation2 + $0x168] sm:$0x1] %v572_v50 }
  0xc2   : > { %5149 = vmatprep.mubr.bf16.mxu0 %v5679_v12  ;;  %5178 = vmatpush3.bf16.msra.mxu0 %v5693_v9  ;;  %v593_v9 = vsel %vm6365_vm5, 0, %v592_v7  ;;  %v551_v12 = vsel %vm6359_vm3, 0, %v550_v10  ;;  %v623_v52 = vsel %vm6365_vm5, 0, %v622_v51  ;;  %519 = vst [vmem:[#allocation2 + $0x8] sm:$0xff] %v6023_v54  ;;  %v6435_v55 = vld [vmem:[%s7503_s2] ss:$0 sm:$0xff] }
  0xc3   : > { %5179 = vmatprep.subr.bf16.mxu0 %v5694_v13  ;;  %594 = vst [vmem:[#allocation2 + $0x88] sm:$0x80] %v593_v9  ;;  %552 = vst [vmem:[#allocation2 + $0xc0] sm:$0x1] %v551_v12  ;;  %v6440_v41 = vld [vmem:[%s7504_s3] ss:$0 sm:$0xff] }
  0xc4   : > { %4688 = vmatpush3.bf16.msra.mxu1 %v5716_v57  ;;  %624 = vst [vmem:[#allocation2 + $0x178] sm:$0x80] %v623_v52  ;;  %v1352_v36 = vld [vmem:[#allocation2 + $0x28] sm:$0xff]  ;;  %v5718_v51 = vld [vmem:[#allocation8] sm:$0xff]  }
  0xc5   : > { %v5734_v52 = vld [vmem:[#allocation8 + $0x180] sm:$0xff]  }
  0xc6   : > { %5180 = vmatpush3.bf16.msra.mxu0 %v5694_v13  ;;  %v602_v13 = vsel %vm6365_vm5, 0, %v601_v11 }
  0xc7   : > { %5181 = vmatprep.subr.bf16.mxu0 %v5695_v16  ;;  %603 = vst [vmem:[#allocation2 + $0xd0] sm:$0x80] %v602_v13 }
  0xc9   : > { %5150 = vmatmul.mubr.bf16.gmra.mrb[4].mxu0 %v5680_v17 }
  0xca   : > { %5153 = vmatprep.mubr.bf16.mxu0 %v5681_v18  ;;  %5182 = vmatpush3.bf16.msra.mxu0 %v5695_v16  ;;  %v598_v16 = vld [vmem:[#allocation2 + $0xb8] sm:$0x80]  ;;  %v556_v18 = vld [vmem:[#allocation2 + $0xf0] sm:$0x1] }
  0xcb   : > { %5183 = vmatprep.subr.bf16.mxu0 %v5696_v19  ;;  %v599_v17 = vsel %vm6365_vm5, 0, %v598_v16 }
  0xcc   : > { %600 = vst [vmem:[#allocation2 + $0xb8] sm:$0x80] %v599_v17 }
  0xce   : > { %5184 = vmatpush3.bf16.msra.mxu0 %v5696_v19  ;;  %v607_v19 = vld [vmem:[#allocation2 + $0x100] sm:$0x80] }
  0xcf   : > { %5185 = vmatprep.subr.bf16.mxu0 %v5698_v20 }
  0xd1   : > { %5154 = vmatmul.mubr.bf16.gmra.mrb[8].mxu0 %v5682_v21  ;;  %v608_v21 = vsel %vm6365_vm5, 0, %v607_v19 }
  0xd2   : > { %5157 = vmatprep.mubr.bf16.mxu0 %v5683_v22  ;;  %5186 = vmatpush3.bf16.msra.mxu0 %v5698_v20  ;;  %v557_v20 = vsel %vm6359_vm3, 0, %v556_v18  ;;  %v553_v22 = vld [vmem:[#allocation2 + $0xd8] sm:$0x1]  ;;  %609 = vst [vmem:[#allocation2 + $0x100] sm:$0x80] %v608_v21 }
  0xd3   : > { %5187 = vmatprep.subr.bf16.mxu0 %v5703_v43  ;;  %558 = vst [vmem:[#allocation2 + $0xf0] sm:$0x1] %v557_v20 }
  0xd6   : > { %5188 = vmatpush3.bf16.msra.mxu0 %v5703_v43  ;;  %v617_v43 = vsel %vm6365_vm5, 0, %v616_v42 }
  0xd7   : > { %5189 = vmatprep.subr.bf16.mxu0 %v5708_v53  ;;  %618 = vst [vmem:[#allocation2 + $0x148] sm:$0x80] %v617_v43 }
  0xd9   : > { %5158 = vmatmul.mubr.bf16.gmra.mrb[12].mxu0 %v5684_v23  ;;  %v554_v23 = vsel %vm6359_vm3, 0, %v553_v22 }
  0xda   : > { %5161 = vmatprep.mubr.bf16.mxu0 %v5685_v24  ;;  %5190 = vmatpush3.bf16.msra.mxu0 %v5708_v53  ;;  %v604_v24 = vld [vmem:[#allocation2 + $0xe8] sm:$0x80]  ;;  %555 = vst [vmem:[#allocation2 + $0xd8] sm:$0x1] %v554_v23  ;;  %v5733_v53 = vld [vmem:[#allocation8 + $0x1c0] sm:$0xff]  }
  0xdb   : > { %5191 = vmatprep.subr.bf16.mxu0 %v5713_v56  ;;  %4945 = vmatprep.subr.bf16.mxu1 %v5733_v53 }
  0xde   : > { %5192 = vmatpush3.bf16.msra.mxu0 %v5713_v56 }
  0xe1   : > { %5162 = vmatmul.mubr.bf16.gmra.mrb[16].mxu0 %v5686_v25  ;;  %v605_v25 = vsel %vm6365_vm5, 0, %v604_v24  ;;  %v5738_v24 = vld [vmem:[#allocation8 + $0x88] sm:$0xff]  }
  0xe2   : > { %5165 = vmatprep.mubr.bf16.mxu0 %v5687_v26  ;;  %v5717_v26 = vld [vmem:[#allocation8 + $0x40] sm:$0xff]   ;;  %606 = vst [vmem:[#allocation2 + $0xe8] sm:$0x80] %v605_v25 }
  0xe3   : > { %4809 = vmatprep.subr.bf16.mxu0 %v5717_v26 }
  0xe9   : > { %5166 = vmatmul.mubr.bf16.gmra.mrb[20].mxu0 %v5688_v27  ;;  %v562_v27 = vld [vmem:[#allocation2 + $0x120] sm:$0x1] }
  0xea   : > { %5169 = vmatprep.mubr.bf16.mxu0 %v5689_v28  ;;  %v613_v28 = vld [vmem:[#allocation2 + $0x130] sm:$0x80] }
  0xf1   : > { %5170 = vmatmul.mubr.bf16.gmra.mrb[24].mxu0 %v5690_v29  ;;  %v563_v29 = vsel %vm6359_vm3, 0, %v562_v27  ;;  %v1241_v27 = vld [vmem:[#allocation2 + $0x30] sm:$0xff] }
  0xf2   : > { %5173 = vmatprep.mubr.bf16.mxu0 %v5691_v30  ;;  %v614_v30 = vsel %vm6365_vm5, 0, %v613_v28  ;;  %564 = vst [vmem:[#allocation2 + $0x120] sm:$0x1] %v563_v29  ;;  %v1355_v29 = vld [vmem:[#allocation2 + $0x40] sm:$0xff] }
  0xf3   : > { %615 = vst [vmem:[#allocation2 + $0x130] sm:$0x80] %v614_v30 }
  0xf9   : > { %5174 = vmatmul.mubr.bf16.gmra.mrb[28].mxu0 %v5692_v31  ;;  %v559_v31 = vld [vmem:[#allocation2 + $0x108] sm:$0x1] }
  0xfa   : > { %v560_v32 = vsel %vm6359_vm3, 0, %v559_v31 }
  0xfb   : > { %561 = vst [vmem:[#allocation2 + $0x108] sm:$0x1] %v560_v32 }
 0x194   : > { %v5147_v56 = vpop.f32.mrb[0].mxu0 }
 0x195   : > { %v990_v45 = vmul.f32 %v5147_v56, %v6435_v55  ;;  %v854_v57 = vpop.f32.mrb[1].mxu0 }
 0x196   : > { %v988_v58 = vmul.f32 %v6435_v55, %v854_v57  ;;  %v5148_v59 = vpop.f32.mrb[2].mxu0 }
 0x197   : > { %v1029_v60 = vadd.f32 %v6440_v41, %v990_v45  ;;  %v991_v61 = vmul.f32 %v5148_v59, %v6435_v55  ;;  %v857_v62 = vpop.f32.mrb[3].mxu0  ;;  %v5719_v59 = vld [vmem:[#allocation8 + $0x48] sm:$0xff]  }
 0x198   : > { %v1027_v63 = vadd.f32 %v6440_v41, %v988_v58  ;;  %v989_v0 = vmul.f32 %v6435_v55, %v857_v62 }
 0x199   : > { %v1030_v1 = vadd.f32 %v6440_v41, %v991_v61  ;;  %v1061_v3 = vmax.f32 %v1029_v60, 0.0  ;;  %v5736_v60 = vld [vmem:[#allocation8 + $0x1c8] sm:$0xff]  }
 0x19a   : > { %v1028_v2 = vadd.f32 %v6440_v41, %v989_v0  ;;  %v1059_v5 = vmax.f32 %v1027_v63, 0.0 }
 0x19b   : > { %v1062_v4 = vmax.f32 %v1030_v1, 0.0 }
 0x19c   : > { %v1060_v6 = vmax.f32 %v1028_v2, 0.0  ;;  %v5151_v7 = vpop.f32.mrb[4].mxu0 }
 0x19d   : > { %v6450_v8 = vpack.c.bf16 %v1062_v4, %v1061_v3  ;;  %v994_v9 = vmul.f32 %v5151_v7, %v6435_v55  ;;  %v870_v10 = vpop.f32.mrb[5].mxu0 }
 0x19e   : > { %v1091_v11 = vpack.c.bf16 %v1060_v6, %v1059_v5  ;;  %v992_v12 = vmul.f32 %v6435_v55, %v870_v10  ;;  %v5152_v13 = vpop.f32.mrb[6].mxu0  ;;  %v5720_v10 = vld [vmem:[#allocation8 + $0x8] sm:$0xff]  }
 0x19f   : > { %v1115_v14 = vshrl.u32 %v6450_v8, 16  ;;  %v1118_v15 = vshll.u32 %v6450_v8, 16  ;;  %1287 = vst [vmem:[#allocation2 + $0x38] sm:$0xff] %v6450_v8  ;;  %v1033_v16 = vadd.f32 %v6440_v41, %v994_v9  ;;  %v995_v17 = vmul.f32 %v5152_v13, %v6435_v55  ;;  %v873_v18 = vpop.f32.mrb[7].mxu0 }
 0x1a0   : > { %v1108_v19 = vshrl.u32 %v1091_v11, 16  ;;  %v1111_v20 = vshll.u32 %v1091_v11, 16  ;;  %1286 = vst [vmem:[#allocation2 + $0x20] sm:$0xff] %v1091_v11  ;;  %v1031_v21 = vadd.f32 %v6440_v41, %v992_v12  ;;  %v993_v22 = vmul.f32 %v6435_v55, %v873_v18  ;;  %1769 = vmatprep.mubr.bf16.mxu1 %v1091_v11  ;;  %v1247_v11 = vld [vmem:[#allocation2 + $0x60] sm:$0xff]  ;;  %v1361_v12 = vld [vmem:[#allocation2 + $0x70] sm:$0xff] }
 0x1a1   : > { %v1117_v23 = vrot.slane %v1115_v14, 7  ;;  %v1304_v25 = vrot.slane %v1118_v15, 1  ;;  %v1034_v26 = vadd.f32 %v6440_v41, %v995_v17  ;;  %v1065_v37 = vmax.f32 %v1033_v16, 0.0  ;;  %v5721_v16 = vld [vmem:[#allocation8 + $0x50] sm:$0xff]  }
 0x1a2   : > { %v1110_v30 = vrot.slane %v1108_v19, 7  ;;  %v1302_v31 = vrot.slane %v1111_v20, 1  ;;  %v1032_v32 = vadd.f32 %v6440_v41, %v993_v22  ;;  %v1063_v42 = vmax.f32 %v1031_v21, 0.0 }
 0x1a3   : > { %v1120_v33 = vor.u32 %v1118_v15, %v1117_v23  ;;  %v1305_v34 = vor.u32 %v1304_v25, %v1115_v14  ;;  %v1066_v38 = vmax.f32 %v1034_v26, 0.0 }
 0x1a4   : > { %v1113_v39 = vor.u32 %v1111_v20, %v1110_v30  ;;  %v1303_v40 = vor.u32 %v1302_v31, %v1108_v19  ;;  %v1064_v43 = vmax.f32 %v1032_v32, 0.0  ;;  %v5155_v44 = vpop.f32.mrb[8].mxu0  ;;  %v1358_v19 = vld [vmem:[#allocation2 + $0x58] sm:$0xff] }
 0x1a5   : > { %v6477_v46 = vsel %vm6463_vm9, %v1120_v33, %v1241_v27  ;;  %v1356_v47 = vsel %vm6470_vm10, %v1305_v34, %v1355_v29  ;;  %v6481_v48 = vpack.c.bf16 %v1066_v38, %v1065_v37  ;;  %v998_v49 = vmul.f32 %v5155_v44, %v6435_v55  ;;  %v886_v50 = vpop.f32.mrb[9].mxu0  ;;  %v5722_v34 = vld [vmem:[#allocation8 + $0x10] sm:$0xff]  }
 0x1a6   : > { %1243 = vst [vmem:[#allocation2 + $0x30] sm:$0xff] %v6477_v46  ;;  %1357 = vst [vmem:[#allocation2 + $0x40] sm:$0xff] %v1356_v47  ;;  %v1239_v53 = vsel %vm6463_vm9, %v1113_v39, %v1238_v35  ;;  %v1353_v56 = vsel %vm6470_vm10, %v1303_v40, %v1352_v36  ;;  %v6489_v45 = vpack.c.bf16 %v1064_v43, %v1063_v42  ;;  %v5156_v58 = vpop.f32.mrb[10].mxu0  ;;  %v5737_v35 = vld [vmem:[#allocation8 + $0x188] sm:$0xff]   ;;  %v5723_v42 = vld [vmem:[#allocation8 + $0x58] sm:$0xff]  }
 0x1a7   : > { %v996_v57 = vmul.f32 %v6435_v55, %v886_v50  ;;  %1240 = vst [vmem:[#allocation2 + $0x18] sm:$0xff] %v1239_v53  ;;  %1354 = vst [vmem:[#allocation2 + $0x28] sm:$0xff] %v1353_v56  ;;  %v1129_v61 = vshrl.u32 %v6481_v48, 16  ;;  %v1132_v62 = vshll.u32 %v6481_v48, 16  ;;  %v1037_v63 = vadd.f32 %v6440_v41, %v998_v49  ;;  %v889_v1 = vpop.f32.mrb[11].mxu0  ;;  %1770 = vmatmul.mubr.bf16.vlgmr.msra.gmra.mrb[0].mxu1 %v1239_v53  ;;  %v5739_v43 = vld [vmem:[#allocation8 + $0x1d0] sm:$0xff]  }
 0x1a8   : > { %1289 = vst [vmem:[#allocation2 + $0x68] sm:$0xff] %v6481_v48  ;;  %v999_v0 = vmul.f32 %v5156_v58, %v6435_v55  ;;  %5193 = vmatprep.mubr.bf16.mxu0 %v1353_v56  ;;  %v1122_v2 = vshrl.u32 %v6489_v45, 16  ;;  %v1125_v3 = vshll.u32 %v6489_v45, 16  ;;  %1288 = vst [vmem:[#allocation2 + $0x50] sm:$0xff] %v6489_v45  ;;  %v997_v5 = vmul.f32 %v6435_v55, %v889_v1  ;;  %v1404_v28 = vld [vmem:[#allocation2 + $0x20] sm:$0xff] }
 0x1a9   : > { %v1035_v4 = vadd.f32 %v6440_v41, %v996_v57  ;;  %1777 = vmatprep.mubr.bf16.mxu1 %v6450_v8  ;;  %5194 = vmatmul.mubr.bf16.vlgmr.msra.gmra.mrb[32].mxu0 %v1356_v47  ;;  %v1131_v6 = vrot.slane %v1129_v61, 7  ;;  %v1308_v7 = vrot.slane %v1132_v62, 1  ;;  %v1244_v8 = vld [vmem:[#allocation2 + $0x48] sm:$0xff]  ;;  %v1069_v20 = vmax.f32 %v1037_v63, 0.0 }
 0x1aa   : > { %v1038_v9 = vadd.f32 %v6440_v41, %v999_v0  ;;  %4810 = vmatpush3.bf16.msra.mxu0 %v5718_v51  ;;  %4946 = vmatpush3.bf16.msra.mxu1 %v5734_v52  ;;  %v1124_v13 = vrot.slane %v1122_v2, 7  ;;  %v1306_v14 = vrot.slane %v1125_v3, 1  ;;  %v1036_v15 = vadd.f32 %v6440_v41, %v997_v5  ;;  %v1364_v5 = vld [vmem:[#allocation2 + $0x88] sm:$0xff] }
 0x1ab   : > { %4811 = vmatprep.subr.bf16.mxu0 %v5719_v59  ;;  %4947 = vmatprep.subr.bf16.mxu1 %v5736_v60  ;;  %v1134_v17 = vor.u32 %v1132_v62, %v1131_v6  ;;  %v1309_v18 = vor.u32 %v1308_v7, %v1129_v61  ;;  %v1067_v25 = vmax.f32 %v1035_v4, 0.0  ;;  %v1253_v61 = vld [vmem:[#allocation2 + $0x90] sm:$0xff]  ;;  %v1367_v62 = vld [vmem:[#allocation2 + $0xa0] sm:$0xff] }
 0x1ac   : > { %v1070_v21 = vmax.f32 %v1038_v9, 0.0  ;;  %v1127_v22 = vor.u32 %v1125_v3, %v1124_v13  ;;  %v1307_v23 = vor.u32 %v1306_v14, %v1122_v2  ;;  %v1068_v26 = vmax.f32 %v1036_v15, 0.0  ;;  %v5159_v27 = vpop.f32.mrb[12].mxu0  ;;  %v5725_v2 = vld [vmem:[#allocation8 + $0x60] sm:$0xff]  }
 0x1ad   : > { %v6507_v29 = vsel %vm6463_vm9, %v1134_v17, %v1247_v11  ;;  %v1362_v30 = vsel %vm6470_vm10, %v1309_v18, %v1361_v12  ;;  %v1002_v32 = vmul.f32 %v5159_v27, %v6435_v55  ;;  %v902_v33 = vpop.f32.mrb[13].mxu0  ;;  %v5742_v27 = vld [vmem:[#allocation8 + $0x1d8] sm:$0xff]  }
 0x1ae   : > { %v6511_v31 = vpack.c.bf16 %v1070_v21, %v1069_v20  ;;  %4812 = vmatpush3.bf16.msra.mxu0 %v5720_v10  ;;  %1249 = vst [vmem:[#allocation2 + $0x60] sm:$0xff] %v6507_v29  ;;  %1363 = vst [vmem:[#allocation2 + $0x70] sm:$0xff] %v1362_v30  ;;  %v6517_v36 = vsel %vm6463_vm9, %v1127_v22, %v1244_v8  ;;  %v1359_v37 = vsel %vm6470_vm10, %v1307_v23, %v1358_v19  ;;  %v5160_v40 = vpop.f32.mrb[14].mxu0  ;;  %v5726_v8 = vld [vmem:[#allocation8 + $0x20] sm:$0xff]   ;;  %v5740_v19 = vld [vmem:[#allocation8 + $0x190] sm:$0xff]  }
 0x1af   : > { %v6521_v38 = vpack.c.bf16 %v1068_v26, %v1067_v25  ;;  %v1000_v39 = vmul.f32 %v6435_v55, %v902_v33  ;;  %4813 = vmatprep.subr.bf16.mxu0 %v5721_v16  ;;  %1246 = vst [vmem:[#allocation2 + $0x48] sm:$0xff] %v6517_v36  ;;  %1360 = vst [vmem:[#allocation2 + $0x58] sm:$0xff] %v1359_v37  ;;  %v1041_v49 = vadd.f32 %v6440_v41, %v1002_v32  ;;  %v905_v51 = vpop.f32.mrb[15].mxu0  ;;  %v5727_v26 = vld [vmem:[#allocation8 + $0x68] sm:$0xff]  }
 0x1b0   : > { %v1143_v44 = vshrl.u32 %v6511_v31, 16  ;;  %v1146_v47 = vshll.u32 %v6511_v31, 16  ;;  %1291 = vst [vmem:[#allocation2 + $0x98] sm:$0xff] %v6511_v31  ;;  %v1003_v50 = vmul.f32 %v5160_v40, %v6435_v55  ;;  %1778 = vmatmul.mubr.bf16.gmra.mrb[4].mxu1 %v6477_v46  ;;  %5197 = vmatprep.mubr.bf16.mxu0 %v1359_v37  ;;  %v1001_v57 = vmul.f32 %v6435_v55, %v905_v51  ;;  %v5724_v46 = vld [vmem:[#allocation8 + $0x18] sm:$0xff]  }
 0x1b1   : > { %v1136_v52 = vshrl.u32 %v6521_v38, 16  ;;  %v1139_v53 = vshll.u32 %v6521_v38, 16  ;;  %1290 = vst [vmem:[#allocation2 + $0x80] sm:$0xff] %v6521_v38  ;;  %v1039_v56 = vadd.f32 %v6440_v41, %v1000_v39  ;;  %1785 = vmatprep.mubr.bf16.mxu1 %v6489_v45  ;;  %5198 = vmatmul.mubr.bf16.gmra.mrb[36].mxu0 %v1362_v30  ;;  %v1250_v45 = vld [vmem:[#allocation2 + $0x78] sm:$0xff]  ;;  %v1073_v6 = vmax.f32 %v1041_v49, 0.0  ;;  %v1259_v49 = vld [vmem:[#allocation2 + $0xc0] sm:$0xff] }
 0x1b2   : > { %v1145_v58 = vrot.slane %v1143_v44, 7  ;;  %v1312_v59 = vrot.slane %v1146_v47, 1  ;;  %v1042_v60 = vadd.f32 %v6440_v41, %v1003_v50  ;;  %4814 = vmatpush3.bf16.msra.mxu0 %v5722_v34  ;;  %4948 = vmatpush3.bf16.msra.mxu1 %v5737_v35  ;;  %v1040_v1 = vadd.f32 %v6440_v41, %v1001_v57  ;;  %v1373_v50 = vld [vmem:[#allocation2 + $0xd0] sm:$0xff] }
 0x1b3   : > { %v1138_v63 = vrot.slane %v1136_v52, 7  ;;  %v1310_v0 = vrot.slane %v1139_v53, 1  ;;  %4815 = vmatprep.subr.bf16.mxu0 %v5723_v42  ;;  %4949 = vmatprep.subr.bf16.mxu1 %v5739_v43  ;;  %v1071_v11 = vmax.f32 %v1039_v56, 0.0  ;;  %v5729_v56 = vld [vmem:[#allocation8 + $0x70] sm:$0xff]  }
 0x1b4   : > { %v1148_v3 = vor.u32 %v1146_v47, %v1145_v58  ;;  %v1313_v4 = vor.u32 %v1312_v59, %v1143_v44  ;;  %v1074_v7 = vmax.f32 %v1042_v60, 0.0  ;;  %v1072_v12 = vmax.f32 %v1040_v1, 0.0  ;;  %v5163_v13 = vpop.f32.mrb[16].mxu0  ;;  %v1370_v59 = vld [vmem:[#allocation2 + $0xb8] sm:$0xff] }
 0x1b5   : > { %v1141_v9 = vor.u32 %v1139_v53, %v1138_v63  ;;  %v1311_v10 = vor.u32 %v1310_v0, %v1136_v52  ;;  %v1006_v17 = vmul.f32 %v5163_v13, %v6435_v55  ;;  %v918_v18 = vpop.f32.mrb[17].mxu0 }
 0x1b6   : > { %v6541_v14 = vsel %vm6463_vm9, %v1148_v3, %v1253_v61  ;;  %v1368_v15 = vsel %vm6470_vm10, %v1313_v4, %v1367_v62  ;;  %v6545_v16 = vpack.c.bf16 %v1074_v7, %v1073_v6  ;;  %4816 = vmatpush3.bf16.msra.mxu0 %v5724_v46  ;;  %v6555_v22 = vpack.c.bf16 %v1072_v12, %v1071_v11  ;;  %v5164_v25 = vpop.f32.mrb[18].mxu0  ;;  %v5730_v6 = vld [vmem:[#allocation8 + $0x30] sm:$0xff]   ;;  %v5743_v7 = vld [vmem:[#allocation8 + $0x198] sm:$0xff]  }
 0x1b7   : > { %1255 = vst [vmem:[#allocation2 + $0x90] sm:$0xff] %v6541_v14  ;;  %1369 = vst [vmem:[#allocation2 + $0xa0] sm:$0xff] %v1368_v15  ;;  %v6551_v20 = vsel %vm6463_vm9, %v1141_v9, %v1250_v45  ;;  %v1365_v21 = vsel %vm6470_vm10, %v1311_v10, %v1364_v5  ;;  %v1004_v23 = vmul.f32 %v6435_v55, %v918_v18  ;;  %4817 = vmatprep.subr.bf16.mxu0 %v5725_v2  ;;  %v921_v35 = vpop.f32.mrb[19].mxu0 }
 0x1b8   : > { %1252 = vst [vmem:[#allocation2 + $0x78] sm:$0xff] %v6551_v20  ;;  %1366 = vst [vmem:[#allocation2 + $0x88] sm:$0xff] %v1365_v21  ;;  %v1157_v30 = vshrl.u32 %v6545_v16, 16  ;;  %v1160_v32 = vshll.u32 %v6545_v16, 16  ;;  %v1045_v33 = vadd.f32 %v6440_v41, %v1006_v17  ;;  %v1007_v34 = vmul.f32 %v5164_v25, %v6435_v55  ;;  %1786 = vmatmul.mubr.bf16.gmra.mrb[8].mxu1 %v6517_v36  ;;  %v5728_v36 = vld [vmem:[#allocation8 + $0x28] sm:$0xff]   ;;  %v5745_v17 = vld [vmem:[#allocation8 + $0x1e0] sm:$0xff]  }
 0x1b9   : > { %1293 = vst [vmem:[#allocation2 + $0xc8] sm:$0xff] %v6545_v16  ;;  %5201 = vmatprep.mubr.bf16.mxu0 %v1365_v21  ;;  %v1150_v37 = vshrl.u32 %v6555_v22, 16  ;;  %v1153_v39 = vshll.u32 %v6555_v22, 16  ;;  %1292 = vst [vmem:[#allocation2 + $0xb0] sm:$0xff] %v6555_v22  ;;  %v1043_v40 = vadd.f32 %v6440_v41, %v1004_v23  ;;  %v1005_v42 = vmul.f32 %v6435_v55, %v921_v35  ;;  %v1265_v35 = vld [vmem:[#allocation2 + $0xf0] sm:$0xff] }
 0x1ba   : > { %1793 = vmatprep.mubr.bf16.mxu1 %v6481_v48  ;;  %5202 = vmatmul.mubr.bf16.gmra.mrb[40].mxu0 %v1368_v15  ;;  %v1159_v43 = vrot.slane %v1157_v30, 7  ;;  %v1316_v44 = vrot.slane %v1160_v32, 1  ;;  %v1046_v47 = vadd.f32 %v6440_v41, %v1007_v34  ;;  %v1256_v48 = vld [vmem:[#allocation2 + $0xa8] sm:$0xff]  ;;  %v1077_v60 = vmax.f32 %v1045_v33, 0.0 }
 0x1bb   : > { %4818 = vmatpush3.bf16.msra.mxu0 %v5726_v8  ;;  %4950 = vmatpush3.bf16.msra.mxu1 %v5740_v19  ;;  %v1152_v51 = vrot.slane %v1150_v37, 7  ;;  %v1314_v52 = vrot.slane %v1153_v39, 1  ;;  %v1044_v53 = vadd.f32 %v6440_v41, %v1005_v42  ;;  %v1075_v63 = vmax.f32 %v1043_v40, 0.0  ;;  %v5731_v15 = vld [vmem:[#allocation8 + $0x78] sm:$0xff]  }
 0x1bc   : > { %4819 = vmatprep.subr.bf16.mxu0 %v5727_v26  ;;  %4951 = vmatprep.subr.bf16.mxu1 %v5742_v27  ;;  %v1162_v57 = vor.u32 %v1160_v32, %v1159_v43  ;;  %v1317_v58 = vor.u32 %v1316_v44, %v1157_v30  ;;  %v1078_v46 = vmax.f32 %v1046_v47, 0.0  ;;  %v5167_v1 = vpop.f32.mrb[20].mxu0  ;;  %v6607_v43 = vld [vmem:[#allocation8 + $0x80] sm:$0xff]   ;;  %v1262_v47 = vld [vmem:[#allocation2 + $0xd8] sm:$0xff] }
 0x1bd   : > { %v1155_v61 = vor.u32 %v1153_v39, %v1152_v51  ;;  %v1315_v62 = vor.u32 %v1314_v52, %v1150_v37  ;;  %v1076_v0 = vmax.f32 %v1044_v53, 0.0  ;;  %v1010_v45 = vmul.f32 %v5167_v1, %v6435_v55  ;;  %v934_v5 = vpop.f32.mrb[21].mxu0  ;;  %v1379_v37 = vld [vmem:[#allocation2 + $0x100] sm:$0xff] }
 0x1be   : > { %v6575_v2 = vsel %vm6463_vm9, %v1162_v57, %v1259_v49  ;;  %v1374_v3 = vsel %vm6470_vm10, %v1317_v58, %v1373_v50  ;;  %v6579_v4 = vpack.c.bf16 %v1078_v46, %v1077_v60  ;;  %v1008_v12 = vmul.f32 %v6435_v55, %v934_v5  ;;  %v5168_v13 = vpop.f32.mrb[22].mxu0 }
 0x1bf   : > { %4820 = vmatpush3.bf16.msra.mxu0 %v5728_v36  ;;  %1261 = vst [vmem:[#allocation2 + $0xc0] sm:$0xff] %v6575_v2  ;;  %1375 = vst [vmem:[#allocation2 + $0xd0] sm:$0xff] %v1374_v3  ;;  %v6585_v9 = vsel %vm6463_vm9, %v1155_v61, %v1256_v48  ;;  %v1371_v10 = vsel %vm6470_vm10, %v1315_v62, %v1370_v59  ;;  %v6589_v11 = vpack.c.bf16 %v1076_v0, %v1075_v63  ;;  %v937_v23 = vpop.f32.mrb[23].mxu0  ;;  %v1376_v36 = vld [vmem:[#allocation2 + $0xe8] sm:$0xff]  ;;  %v5746_v61 = vld [vmem:[#allocation8 + $0x1a0] sm:$0xff]  }
 0x1c0   : > { %4821 = vmatprep.subr.bf16.mxu0 %v5729_v56  ;;  %1258 = vst [vmem:[#allocation2 + $0xa8] sm:$0xff] %v6585_v9  ;;  %1372 = vst [vmem:[#allocation2 + $0xb8] sm:$0xff] %v1371_v10  ;;  %v1171_v18 = vshrl.u32 %v6579_v4, 16  ;;  %v1174_v8 = vshll.u32 %v6579_v4, 16  ;;  %v1049_v19 = vadd.f32 %v6440_v41, %v1010_v45  ;;  %v1011_v21 = vmul.f32 %v5168_v13, %v6435_v55  ;;  %v5747_v45 = vld [vmem:[#allocation8 + $0x1e8] sm:$0xff]  }
 0x1c1   : > { %1295 = vst [vmem:[#allocation2 + $0xf8] sm:$0xff] %v6579_v4  ;;  %1794 = vmatmul.mubr.bf16.gmra.mrb[12].mxu1 %v6507_v29  ;;  %5205 = vmatprep.mubr.bf16.mxu0 %v1371_v10  ;;  %v1164_v25 = vshrl.u32 %v6589_v11, 16  ;;  %v1167_v26 = vshll.u32 %v6589_v11, 16  ;;  %1294 = vst [vmem:[#allocation2 + $0xe0] sm:$0xff] %v6589_v11  ;;  %v1047_v27 = vadd.f32 %v6440_v41, %v1008_v12  ;;  %v5732_v29 = vld [vmem:[#allocation8 + $0x38] sm:$0xff]  }
 0x1c2   : > { %v1009_v30 = vmul.f32 %v6435_v55, %v937_v23  ;;  %1801 = vmatprep.mubr.bf16.mxu1 %v6521_v38  ;;  %5206 = vmatmul.mubr.bf16.gmra.mrb[44].mxu0 %v1374_v3  ;;  %v1173_v32 = vrot.slane %v1171_v18, 7  ;;  %v1320_v33 = vrot.slane %v1174_v8, 1  ;;  %v1050_v34 = vadd.f32 %v6440_v41, %v1011_v21  ;;  %v5748_v23 = vld [vmem:[#allocation8 + $0x1a8] sm:$0xff]  }
 0x1c3   : > { %4822 = vmatpush3.bf16.msra.mxu0 %v5730_v6  ;;  %4952 = vmatpush3.bf16.msra.mxu1 %v5743_v7  ;;  %v1166_v39 = vrot.slane %v1164_v25, 7  ;;  %v1318_v40 = vrot.slane %v1167_v26, 1  ;;  %v1081_v49 = vmax.f32 %v1049_v19, 0.0  ;;  %v1079_v53 = vmax.f32 %v1047_v27, 0.0 }
 0x1c4   : > { %v1048_v42 = vadd.f32 %v6440_v41, %v1009_v30  ;;  %4823 = vmatprep.subr.bf16.mxu0 %v5731_v15  ;;  %4953 = vmatprep.subr.bf16.mxu1 %v5745_v17  ;;  %v1176_v44 = vor.u32 %v1174_v8, %v1173_v32  ;;  %v1321_v38 = vor.u32 %v1320_v33, %v1171_v18  ;;  %v1082_v50 = vmax.f32 %v1050_v34, 0.0  ;;  %v5171_v57 = vpop.f32.mrb[24].mxu0  ;;  %v5749_v32 = vld [vmem:[#allocation8 + $0x1f0] sm:$0xff]  }
 0x1c5   : > { %v1169_v51 = vor.u32 %v1167_v26, %v1166_v39  ;;  %v1319_v52 = vor.u32 %v1318_v40, %v1164_v25  ;;  %v1014_v60 = vmul.f32 %v5171_v57, %v6435_v55  ;;  %v950_v46 = vpop.f32.mrb[25].mxu0  ;;  %v1271_v25 = vld [vmem:[#allocation2 + $0x120] sm:$0xff] }
 0x1c6   : > { %v1080_v56 = vmax.f32 %v1048_v42, 0.0  ;;  %v6611_v58 = vsel %vm6463_vm9, %v1176_v44, %v1265_v35  ;;  %v1380_v48 = vsel %vm6470_vm10, %v1321_v38, %v1379_v37  ;;  %v6615_v59 = vpack.c.bf16 %v1082_v50, %v1081_v49  ;;  %v5172_v3 = vpop.f32.mrb[26].mxu0  ;;  %v1382_v35 = vld [vmem:[#allocation2 + $0x118] sm:$0xff] }
 0x1c7   : > { %4824 = vmatpush3.bf16.msra.mxu0 %v5732_v29  ;;  %1267 = vst [vmem:[#allocation2 + $0xf0] sm:$0xff] %v6611_v58  ;;  %1381 = vst [vmem:[#allocation2 + $0x100] sm:$0xff] %v1380_v48  ;;  %v6621_v62 = vsel %vm6463_vm9, %v1169_v51, %v1262_v47  ;;  %v1377_v63 = vsel %vm6470_vm10, %v1319_v52, %v1376_v36  ;;  %v1012_v1 = vmul.f32 %v6435_v55, %v950_v46  ;;  %v953_v12 = vpop.f32.mrb[27].mxu0  ;;  %v1268_v29 = vld [vmem:[#allocation2 + $0x108] sm:$0xff]  ;;  %v5750_v52 = vld [vmem:[#allocation8 + $0x1b0] sm:$0xff]  }
 0x1c8   : > { %v6625_v0 = vpack.c.bf16 %v1080_v56, %v1079_v53  ;;  %5225 = vmatprep.subr.bf16.mxu0 %v6607_v43  ;;  %1264 = vst [vmem:[#allocation2 + $0xd8] sm:$0xff] %v6621_v62  ;;  %1378 = vst [vmem:[#allocation2 + $0xe8] sm:$0xff] %v1377_v63  ;;  %v1185_v5 = vshrl.u32 %v6615_v59, 16  ;;  %v1188_v6 = vshll.u32 %v6615_v59, 16  ;;  %v1053_v7 = vadd.f32 %v6440_v41, %v1014_v60  ;;  %v5751_v46 = vld [vmem:[#allocation8 + $0x1f8] sm:$0xff]  }
 0x1c9   : > { %v1015_v10 = vmul.f32 %v5172_v3, %v6435_v55  ;;  %1802 = vmatmul.mubr.bf16.gmra.mrb[16].mxu1 %v6551_v20  ;;  %5209 = vmatprep.mubr.bf16.mxu0 %v1377_v63  ;;  %v1051_v17 = vadd.f32 %v6440_v41, %v1012_v1  ;;  %v1013_v18 = vmul.f32 %v6435_v55, %v953_v12  ;;  %v1385_v20 = vld [vmem:[#allocation2 + $0x130] sm:$0xff] }
 0x1ca   : > { %v1178_v13 = vshrl.u32 %v6625_v0, 16  ;;  %v1181_v15 = vshll.u32 %v6625_v0, 16  ;;  %1809 = vmatprep.mubr.bf16.mxu1 %v6511_v31  ;;  %5210 = vmatmul.mubr.bf16.gmra.mrb[48].mxu0 %v1380_v48  ;;  %v1187_v8 = vrot.slane %v1185_v5, 7  ;;  %v1324_v19 = vrot.slane %v1188_v6, 1 }
 0x1cb   : > { %v1054_v21 = vadd.f32 %v6440_v41, %v1015_v10  ;;  %4954 = vmatpush3.bf16.msra.mxu1 %v5746_v61  ;;  %v1052_v30 = vadd.f32 %v6440_v41, %v1013_v18  ;;  %v1085_v31 = vmax.f32 %v1053_v7, 0.0  ;;  %v1083_v42 = vmax.f32 %v1051_v17, 0.0  ;;  %v5752_v17 = vld [vmem:[#allocation8 + $0x1b8] sm:$0xff]   ;;  %v1277_v18 = vld [vmem:[#allocation2 + $0x150] sm:$0xff] }
 0x1cc   : > { %v1180_v26 = vrot.slane %v1178_v13, 7  ;;  %v1322_v27 = vrot.slane %v1181_v15, 1  ;;  %4955 = vmatprep.subr.bf16.mxu1 %v5747_v45  ;;  %v1190_v33 = vor.u32 %v1188_v6, %v1187_v8  ;;  %v1325_v34 = vor.u32 %v1324_v19, %v1185_v5  ;;  %v5175_v38 = vpop.f32.mrb[28].mxu0 }
 0x1cd   : > { %v1086_v37 = vmax.f32 %v1054_v21, 0.0  ;;  %v1084_v44 = vmax.f32 %v1052_v30, 0.0  ;;  %v1018_v50 = vmul.f32 %v5175_v38, %v6435_v55  ;;  %v966_v51 = vpop.f32.mrb[29].mxu0 }
 0x1ce   : > { %v1183_v39 = vor.u32 %v1181_v15, %v1180_v26  ;;  %v1323_v40 = vor.u32 %v1322_v27, %v1178_v13  ;;  %v6644_v47 = vsel %vm6463_vm9, %v1190_v33, %v1271_v25  ;;  %v1386_v36 = vsel %vm6470_vm10, %v1325_v34, %v1385_v20  ;;  %v5176_v60 = vpop.f32.mrb[30].mxu0  ;;  %v1274_v20 = vld [vmem:[#allocation2 + $0x138] sm:$0xff] }
 0x1cf   : > { %v6648_v49 = vpack.c.bf16 %v1086_v37, %v1085_v31  ;;  %4956 = vmatpush3.bf16.msra.mxu1 %v5748_v23  ;;  %1273 = vst [vmem:[#allocation2 + $0x120] sm:$0xff] %v6644_v47  ;;  %1387 = vst [vmem:[#allocation2 + $0x130] sm:$0xff] %v1386_v36  ;;  %v6658_v57 = vpack.c.bf16 %v1084_v44, %v1083_v42  ;;  %v1016_v48 = vmul.f32 %v6435_v55, %v966_v51  ;;  %v969_v45 = vpop.f32.mrb[31].mxu0  ;;  %v1283_v51 = vld [vmem:[#allocation2 + $0x180] sm:$0xff] }
 0x1d0   : > { %v6654_v53 = vsel %vm6463_vm9, %v1183_v39, %v1268_v29  ;;  %v1383_v56 = vsel %vm6470_vm10, %v1323_v40, %v1382_v35  ;;  %4957 = vmatprep.subr.bf16.mxu1 %v5749_v32  ;;  %v1057_v1 = vadd.f32 %v6440_v41, %v1018_v50  ;;  %v1019_v3 = vmul.f32 %v5176_v60, %v6435_v55 }
 0x1d1   : > { %1270 = vst [vmem:[#allocation2 + $0x108] sm:$0xff] %v6654_v53  ;;  %1384 = vst [vmem:[#allocation2 + $0x118] sm:$0xff] %v1383_v56  ;;  %v1199_v61 = vshrl.u32 %v6648_v49, 16  ;;  %v1202_v63 = vshll.u32 %v6648_v49, 16  ;;  %1810 = vmatmul.mubr.bf16.gmra.mrb[20].mxu1 %v6541_v14  ;;  %5213 = vmatprep.mubr.bf16.mxu0 %v1383_v56  ;;  %v1192_v5 = vshrl.u32 %v6658_v57, 16  ;;  %v1195_v6 = vshll.u32 %v6658_v57, 16 }
 0x1d2   : > { %v1055_v7 = vadd.f32 %v6440_v41, %v1016_v48  ;;  %v1017_v10 = vmul.f32 %v6435_v55, %v969_v45  ;;  %1817 = vmatprep.mubr.bf16.mxu1 %v6555_v22  ;;  %5214 = vmatmul.mubr.bf16.gmra.mrb[52].mxu0 %v1386_v36  ;;  %v1058_v15 = vadd.f32 %v6440_v41, %v1019_v3  ;;  %v1391_v14 = vld [vmem:[#allocation2 + $0x160] sm:$0xff]  ;;  %v1388_v55 = vld [vmem:[#allocation2 + $0x148] sm:$0xff]  ;;  %v1089_v26 = vmax.f32 %v1057_v1, 0.0 }
 0x1d3   : > { %v1201_v12 = vrot.slane %v1199_v61, 7  ;;  %v1328_v13 = vrot.slane %v1202_v63, 1  ;;  %4958 = vmatpush3.bf16.msra.mxu1 %v5750_v52  ;;  %v1194_v8 = vrot.slane %v1192_v5, 7  ;;  %v1326_v19 = vrot.slane %v1195_v6, 1  ;;  %v1397_v52 = vld [vmem:[#allocation2 + $0x190] sm:$0xff] }
 0x1d4   : > { %v1056_v21 = vadd.f32 %v6440_v41, %v1017_v10  ;;  %4959 = vmatprep.subr.bf16.mxu1 %v5751_v46  ;;  %v1090_v27 = vmax.f32 %v1058_v15, 0.0  ;;  %v1087_v33 = vmax.f32 %v1055_v7, 0.0  ;;  %v5744_v7 = vld [vmem:[#allocation8 + $0x98] sm:$0xff]   ;;  %v1403_v10 = vld [vmem:[#allocation2 + $0x18] sm:$0xff]  ;;  %v1410_v15 = vld [vmem:[#allocation2 + $0x50] sm:$0xff] }
 0x1d5   : > { %v1204_v23 = vor.u32 %v1202_v63, %v1201_v12  ;;  %v1329_v25 = vor.u32 %v1328_v13, %v1199_v61  ;;  %v1197_v30 = vor.u32 %v1195_v6, %v1194_v8  ;;  %v1327_v32 = vor.u32 %v1326_v19, %v1192_v5  ;;  %v1280_v61 = vld [vmem:[#allocation2 + $0x168] sm:$0xff]  ;;  %v1394_v63 = vld [vmem:[#allocation2 + $0x178] sm:$0xff]  ;;  %v1406_v13 = vld [vmem:[#allocation2 + $0x30] sm:$0xff] }
 0x1d6   : > { %v1088_v34 = vmax.f32 %v1056_v21, 0.0  ;;  %v6680_v31 = vpack.c.bf16 %v1090_v27, %v1089_v26  ;;  %v1407_v12 = vld [vmem:[#allocation2 + $0x38] sm:$0xff]  ;;  %v1413_v8 = vld [vmem:[#allocation2 + $0x68] sm:$0xff]  ;;  %v6733_v19 = vld [vmem:[#allocation8 + $0x200] sm:$0xff]  }
 0x1d7   : > { %v6676_v29 = vsel %vm6463_vm9, %v1204_v23, %v1277_v18  ;;  %v1392_v35 = vsel %vm6470_vm10, %v1329_v25, %v1391_v14  ;;  %4960 = vmatpush3.bf16.msra.mxu1 %v5752_v17  ;;  %v6685_v41 = vsel %vm6463_vm9, %v1197_v30, %v1274_v20  ;;  %v6689_v37 = vsel %vm6470_vm10, %v1327_v32, %v1388_v55  ;;  %v5755_v17 = vld [vmem:[#allocation8 + $0xb0] sm:$0xff]   ;;  %v5756_v18 = vld [vmem:[#allocation8 + $0xb8] sm:$0xff]   ;;  %v1415_v25 = vld [vmem:[#allocation2 + $0x78] sm:$0xff] }
 0x1d8   : > { %1279 = vst [vmem:[#allocation2 + $0x150] sm:$0xff] %v6676_v29  ;;  %1393 = vst [vmem:[#allocation2 + $0x160] sm:$0xff] %v1392_v35  ;;  %v6691_v39 = vpack.c.bf16 %v1088_v34, %v1087_v33  ;;  %v1213_v40 = vshrl.u32 %v6680_v31, 16  ;;  %v1216_v42 = vshll.u32 %v6680_v31, 16  ;;  %5217 = vmatprep.mubr.bf16.mxu0 %v6689_v37  ;;  %v1409_v14 = vld [vmem:[#allocation2 + $0x48] sm:$0xff]  ;;  %v1412_v21 = vld [vmem:[#allocation2 + $0x60] sm:$0xff] }
 0x1d9   : > { %1276 = vst [vmem:[#allocation2 + $0x138] sm:$0xff] %v6685_v41  ;;  %1390 = vst [vmem:[#allocation2 + $0x148] sm:$0xff] %v6689_v37  ;;  %1818 = vmatmul.mubr.bf16.gmra.mrb[24].mxu1 %v6585_v9  ;;  %v1416_v23 = vld [vmem:[#allocation2 + $0x80] sm:$0xff]  ;;  %v1419_v20 = vld [vmem:[#allocation2 + $0x98] sm:$0xff] }
 0x1da   : > { %v1206_v44 = vshrl.u32 %v6691_v39, 16  ;;  %v1209_v38 = vshll.u32 %v6691_v39, 16  ;;  %1825 = vmatprep.mubr.bf16.mxu1 %v6545_v16  ;;  %5218 = vmatmul.mubr.bf16.gmra.mrb[56].mxu0 %v1392_v35  ;;  %v1215_v36 = vrot.slane %v1213_v40, 7  ;;  %v1332_v50 = vrot.slane %v1216_v42, 1  ;;  %v1418_v55 = vld [vmem:[#allocation2 + $0x90] sm:$0xff]  ;;  %v1425_v26 = vld [vmem:[#allocation2 + $0xc8] sm:$0xff] }
 0x1db   : > { %v1424_v27 = vld [vmem:[#allocation2 + $0xc0] sm:$0xff]  ;;  %v2550_v30 = vld [vmem:[#allocation2 + $0xf0] sm:$0xff]  ;;  %v5758_v32 = vld [vmem:[#allocation8 + $0x208] sm:$0xff]  }
 0x1dc   : > { %v1208_v56 = vrot.slane %v1206_v44, 7  ;;  %v1330_v48 = vrot.slane %v1209_v38, 1  ;;  %v1218_v60 = vor.u32 %v1216_v42, %v1215_v36  ;;  %v1333_v46 = vor.u32 %v1332_v50, %v1213_v40  ;;  %v1405_v33 = vld [vmem:[#allocation2 + $0x28] sm:$0xff]  ;;  %v6763_v34 = vld [vmem:[#allocation2 + $0x40] sm:$0xff]  ;;  %v6768_v42 = vld [vmem:[#allocation2 + $0x58] sm:$0xff] }
 0x1dd   : > { %v5759_v35 = vld [vmem:[#allocation8 + $0x210] sm:$0xff]   ;;  %v5760_v40 = vld [vmem:[#allocation8 + $0x218] sm:$0xff]  }
 0x1de   : > { %v1211_v1 = vor.u32 %v1209_v38, %v1208_v56  ;;  %v1331_v3 = vor.u32 %v1330_v48, %v1206_v44  ;;  %v6704_v45 = vsel %vm6463_vm9, %v1218_v60, %v1283_v51  ;;  %v1398_v16 = vsel %vm6470_vm10, %v1333_v46, %v1397_v52  ;;  %v5761_v44 = vld [vmem:[#allocation8 + $0x220] sm:$0xff]   ;;  %v5762_v38 = vld [vmem:[#allocation8 + $0x228] sm:$0xff]   ;;  %v6776_v36 = vld [vmem:[#allocation2 + $0x88] sm:$0xff] }
 0x1df   : > { %1285 = vst [vmem:[#allocation2 + $0x180] sm:$0xff] %v6704_v45  ;;  %1399 = vst [vmem:[#allocation2 + $0x190] sm:$0xff] %v1398_v16  ;;  %v5763_v50 = vld [vmem:[#allocation8 + $0x230] sm:$0xff]   ;;  %v5764_v60 = vld [vmem:[#allocation8 + $0x238] sm:$0xff]  }
 0x1e0   : > { %v6711_v5 = vsel %vm6463_vm9, %v1211_v1, %v1280_v61  ;;  %v6715_v6 = vsel %vm6470_vm10, %v1331_v3, %v1394_v63  ;;  %v6792_v46 = vld [vmem:[#allocation2 + $0xd0] sm:$0xff] }
 0x1e1   : > { %1282 = vst [vmem:[#allocation2 + $0x168] sm:$0xff] %v6711_v5  ;;  %1396 = vst [vmem:[#allocation2 + $0x178] sm:$0xff] %v6715_v6  ;;  %1826 = vmatmul.mubr.bf16.gmra.mrb[28].mxu1 %v6575_v2  ;;  %5221 = vmatprep.mubr.bf16.mxu0 %v6715_v6  ;;  %v5741_v2 = vld [vmem:[#allocation8 + $0x90] sm:$0xff]  }
 0x1e2   : > { %1833 = vmatprep.mubr.bf16.mxu1 %v6589_v11  ;;  %5222 = vmatmul.mubr.bf16.gmra.mrb[60].mxu0 %v1398_v16 }
 0x1e3   : > { %2235 = vmatprep.mubr.bf16.mxu0 %v6023_v54 }
 0x1e9   : > { %1834 = vmatmul.mubr.bf16.gmra.mrb[32].mxu1 %v6621_v62 }
 0x1ea   : > { %1841 = vmatprep.mubr.bf16.mxu1 %v6579_v4  ;;  %2236 = vmatmul.mubr.bf16.vlgmr.msra.gmra.mrb[64].mxu0 %v6023_v54  ;;  %v5753_v54 = vld [vmem:[#allocation8 + $0xa0] sm:$0xff]  }
 0x1eb   : > { %5226 = vmatpush3.bf16.msra.mxu0 %v6607_v43  ;;  %2243 = vmatprep.mubr.bf16.mxu0 %v1404_v28  ;;  %v5754_v43 = vld [vmem:[#allocation8 + $0xa8] sm:$0xff]   ;;  %v5765_v28 = vld [vmem:[#allocation9] sm:$0xff]  }
 0x1ec   : > { %5227 = vmatprep.subr.bf16.mxu0 %v5738_v24  ;;  %5321 = vmatprep.subr.bf16.mxu1 %v5765_v28 }
 0x1ef   : > { %5228 = vmatpush3.bf16.msra.mxu0 %v5738_v24  ;;  %v6800_v24 = vld [vmem:[#allocation2 + $0xe8] sm:$0xff] }
 0x1f0   : > { %5229 = vmatprep.subr.bf16.mxu0 %v5741_v2 }
 0x1f1   : > { %1842 = vmatmul.mubr.bf16.gmra.mrb[36].mxu1 %v6611_v58 }
 0x1f2   : > { %1849 = vmatprep.mubr.bf16.mxu1 %v6625_v0  ;;  %2244 = vmatmul.mubr.bf16.gmra.mrb[68].mxu0 %v1403_v10 }
 0x1f3   : > { %2251 = vmatprep.mubr.bf16.mxu0 %v1407_v12  ;;  %5230 = vmatpush3.bf16.msra.mxu0 %v5741_v2 }
 0x1f4   : > { %5231 = vmatprep.subr.bf16.mxu0 %v5744_v7 }
 0x1f7   : > { %5232 = vmatpush3.bf16.msra.mxu0 %v5744_v7 }
 0x1f8   : > { %5233 = vmatprep.subr.bf16.mxu0 %v5753_v54 }
 0x1f9   : > { %1850 = vmatmul.mubr.bf16.gmra.mrb[40].mxu1 %v6654_v53 }
 0x1fa   : > { %1857 = vmatprep.mubr.bf16.mxu1 %v6615_v59  ;;  %2252 = vmatmul.mubr.bf16.gmra.mrb[72].mxu0 %v1406_v13 }
 0x1fb   : > { %2259 = vmatprep.mubr.bf16.mxu0 %v1410_v15  ;;  %5234 = vmatpush3.bf16.msra.mxu0 %v5753_v54 }
 0x1fc   : > { %5235 = vmatprep.subr.bf16.mxu0 %v5754_v43 }
 0x1ff   : > { %5236 = vmatpush3.bf16.msra.mxu0 %v5754_v43  ;;  %v6812_v43 = vld [vmem:[#allocation2 + $0x118] sm:$0xff] }
 0x200   : > { %5237 = vmatprep.subr.bf16.mxu0 %v5755_v17 }
 0x201   : > { %1858 = vmatmul.mubr.bf16.gmra.mrb[44].mxu1 %v6644_v47 }
 0x202   : > { %1865 = vmatprep.mubr.bf16.mxu1 %v6658_v57  ;;  %2260 = vmatmul.mubr.bf16.gmra.mrb[76].mxu0 %v1409_v14 }
 0x203   : > { %2267 = vmatprep.mubr.bf16.mxu0 %v1413_v8  ;;  %5238 = vmatpush3.bf16.msra.mxu0 %v5755_v17 }
 0x204   : > { %5239 = vmatprep.subr.bf16.mxu0 %v5756_v18 }
 0x207   : > { %5240 = vmatpush3.bf16.msra.mxu0 %v5756_v18 }
 0x208   : > { %5273 = vmatprep.subr.bf16.mxu0 %v6733_v19 }
 0x209   : > { %1866 = vmatmul.mubr.bf16.gmra.mrb[48].mxu1 %v6685_v41 }
 0x20a   : > { %1873 = vmatprep.mubr.bf16.mxu1 %v6648_v49  ;;  %2268 = vmatmul.mubr.bf16.gmra.mrb[80].mxu0 %v1412_v21 }
 0x20b   : > { %2275 = vmatprep.mubr.bf16.mxu0 %v1416_v23 }
 0x211   : > { %1874 = vmatmul.mubr.bf16.gmra.mrb[52].mxu1 %v6676_v29 }
 0x212   : > { %1881 = vmatprep.mubr.bf16.mxu1 %v6691_v39  ;;  %2276 = vmatmul.mubr.bf16.gmra.mrb[84].mxu0 %v1415_v25 }
 0x213   : > { %2283 = vmatprep.mubr.bf16.mxu0 %v1419_v20 }
 0x219   : > { %1882 = vmatmul.mubr.bf16.gmra.mrb[56].mxu1 %v6711_v5 }
 0x21a   : > { %1889 = vmatprep.mubr.bf16.mxu1 %v6680_v31  ;;  %2284 = vmatmul.mubr.bf16.gmra.mrb[88].mxu0 %v1418_v55 }
 0x21b   : > { %2291 = vmatprep.mubr.bf16.mxu0 %v6555_v22  ;;  %v2542_v22 = vld [vmem:[#allocation2 + $0xb0] sm:$0xff] }
 0x221   : > { %1890 = vmatmul.mubr.bf16.gmra.mrb[60].mxu1 %v6704_v45 }
 0x222   : > { %2292 = vmatmul.mubr.bf16.gmra.mrb[92].mxu0 %v6585_v9  ;;  %2799 = vmatprep.mubr.bf16.mxu1 %v1407_v12  ;;  %v2548_v9 = vld [vmem:[#allocation2 + $0xe0] sm:$0xff] }
 0x223   : > { %2299 = vmatprep.mubr.bf16.mxu0 %v1425_v26 }
 0x229   : > { %2800 = vmatmul.mubr.bf16.vlgmr.msra.gmra.mrb[64].mxu1 %v1406_v13 }
 0x22a   : > { %2300 = vmatmul.mubr.bf16.gmra.mrb[96].mxu0 %v1424_v27  ;;  %2807 = vmatprep.mubr.bf16.mxu1 %v1410_v15 }
 0x22b   : > { %2307 = vmatprep.mubr.bf16.mxu0 %v6589_v11  ;;  %v2547_v11 = vld [vmem:[#allocation2 + $0xd8] sm:$0xff]  ;;  %5322 = vmatpush3.bf16.msra.mxu1 %v5765_v28 }
 0x231   : > { %2808 = vmatmul.mubr.bf16.gmra.mrb[68].mxu1 %v1409_v14 }
 0x232   : > { %2308 = vmatmul.mubr.bf16.gmra.mrb[100].mxu0 %v6621_v62  ;;  %2815 = vmatprep.mubr.bf16.mxu1 %v1413_v8  ;;  %v6759_v62 = vld [vmem:[#allocation2 + $0x8] sm:$0xff] }
 0x233   : > { %2315 = vmatprep.mubr.bf16.mxu0 %v6579_v4  ;;  %v2541_v4 = vld [vmem:[#allocation2 + $0xa8] sm:$0xff] }
 0x239   : > { %2816 = vmatmul.mubr.bf16.gmra.mrb[72].mxu1 %v1412_v21 }
 0x23a   : > { %2316 = vmatmul.mubr.bf16.gmra.mrb[104].mxu0 %v6611_v58  ;;  %2823 = vmatprep.mubr.bf16.mxu1 %v1416_v23  ;;  %v2551_v58 = vld [vmem:[#allocation2 + $0xf8] sm:$0xff] }
 0x23b   : > { %2323 = vmatprep.mubr.bf16.mxu0 %v6625_v0 }
 0x241   : > { %2824 = vmatmul.mubr.bf16.gmra.mrb[76].mxu1 %v1415_v25 }
 0x242   : > { %2324 = vmatmul.mubr.bf16.gmra.mrb[108].mxu0 %v6654_v53  ;;  %2831 = vmatprep.mubr.bf16.mxu1 %v1419_v20 }
 0x243   : > { %2331 = vmatprep.mubr.bf16.mxu0 %v6615_v59 }
 0x249   : > { %2832 = vmatmul.mubr.bf16.gmra.mrb[80].mxu1 %v1418_v55 }
 0x24a   : > { %2332 = vmatmul.mubr.bf16.gmra.mrb[112].mxu0 %v6644_v47  ;;  %2839 = vmatprep.mubr.bf16.mxu1 %v2542_v22 }
 0x24b   : > { %2339 = vmatprep.mubr.bf16.mxu0 %v6658_v57 }
 0x251   : > { %2840 = vmatmul.mubr.bf16.gmra.mrb[84].mxu1 %v2541_v4 }
 0x252   : > { %2340 = vmatmul.mubr.bf16.gmra.mrb[116].mxu0 %v6685_v41  ;;  %2847 = vmatprep.mubr.bf16.mxu1 %v1425_v26 }
 0x253   : > { %2347 = vmatprep.mubr.bf16.mxu0 %v6648_v49 }
 0x259   : > { %2848 = vmatmul.mubr.bf16.gmra.mrb[88].mxu1 %v1424_v27 }
 0x25a   : > { %2348 = vmatmul.mubr.bf16.gmra.mrb[120].mxu0 %v6676_v29  ;;  %2855 = vmatprep.mubr.bf16.mxu1 %v2548_v9  ;;  %v5767_v9 = vld [vmem:[#allocation9 + $0x10] sm:$0xff]  }
 0x25b   : > { %2355 = vmatprep.mubr.bf16.mxu0 %v6691_v39 }
 0x261   : > { %2856 = vmatmul.mubr.bf16.gmra.mrb[92].mxu1 %v2547_v11 }
 0x262   : > { %2356 = vmatmul.mubr.bf16.gmra.mrb[124].mxu0 %v6711_v5  ;;  %2863 = vmatprep.mubr.bf16.mxu1 %v2551_v58 }
 0x263   : > { %5241 = vmatprep.mubr.bf16.mxu0 %v6759_v62 }
 0x269   : > { %2864 = vmatmul.mubr.bf16.gmra.mrb[96].mxu1 %v2550_v30 }
 0x26a   : > { %5242 = vmatmul.mubr.bf16.vlgmr.msra.gmra.mrb[32].mxu0 %v1405_v33  ;;  %2871 = vmatprep.mubr.bf16.mxu1 %v6625_v0  ;;  %v6772_v0 = vld [vmem:[#allocation2 + $0x70] sm:$0xff] }
 0x26b   : > { %5274 = vmatpush3.bf16.msra.mxu0 %v6733_v19  ;;  %5245 = vmatprep.mubr.bf16.mxu0 %v6763_v34 }
 0x26c   : > { %5275 = vmatprep.subr.bf16.mxu0 %v5758_v32 }
 0x26f   : > { %5276 = vmatpush3.bf16.msra.mxu0 %v5758_v32 }
 0x270   : > { %5277 = vmatprep.subr.bf16.mxu0 %v5759_v35 }
 0x271   : > { %2872 = vmatmul.mubr.bf16.gmra.mrb[100].mxu1 %v6654_v53  ;;  %v6780_v53 = vld [vmem:[#allocation2 + $0xa0] sm:$0xff] }
 0x272   : > { %5246 = vmatmul.mubr.bf16.gmra.mrb[36].mxu0 %v6768_v42  ;;  %2879 = vmatprep.mubr.bf16.mxu1 %v6615_v59 }
 0x273   : > { %5249 = vmatprep.mubr.bf16.mxu0 %v6772_v0  ;;  %5278 = vmatpush3.bf16.msra.mxu0 %v5759_v35 }
 0x274   : > { %5279 = vmatprep.subr.bf16.mxu0 %v5760_v40 }
 0x277   : > { %5280 = vmatpush3.bf16.msra.mxu0 %v5760_v40 }
 0x278   : > { %5281 = vmatprep.subr.bf16.mxu0 %v5761_v44 }
 0x279   : > { %2880 = vmatmul.mubr.bf16.gmra.mrb[104].mxu1 %v6644_v47 }
 0x27a   : > { %5250 = vmatmul.mubr.bf16.gmra.mrb[40].mxu0 %v6776_v36  ;;  %2887 = vmatprep.mubr.bf16.mxu1 %v6658_v57  ;;  %v4689_v59 = vpop.f32.mrb[0].mxu1  ;;  %v6788_v57 = vld [vmem:[#allocation2 + $0xb8] sm:$0xff] }
 0x27b   : > { %5253 = vmatprep.mubr.bf16.mxu0 %v6780_v53  ;;  %5282 = vmatpush3.bf16.msra.mxu0 %v5761_v44  ;;  %v4690_v51 = vpop.f32.mrb[1].mxu1 }
 0x27c   : > { %5283 = vmatprep.subr.bf16.mxu0 %v5762_v38  ;;  %v6783_v52 = vadd.f32 %v4690_v51, %v4689_v59  ;;  %v4692_v56 = vpop.f32.mrb[2].mxu1 }
 0x27d   : > { %v4693_v48 = vpop.f32.mrb[3].mxu1 }
 0x27e   : > { %v6785_v47 = vadd.f32 %v4693_v48, %v4692_v56 }
 0x27f   : > { %5284 = vmatpush3.bf16.msra.mxu0 %v5762_v38  ;;  %v5768_v38 = vld [vmem:[#allocation9 + $0x18] sm:$0xff]  }
 0x280   : > { %5285 = vmatprep.subr.bf16.mxu0 %v5763_v50 }
 0x281   : > { %2888 = vmatmul.mubr.bf16.gmra.mrb[108].mxu1 %v6685_v41 }
 0x282   : > { %5254 = vmatmul.mubr.bf16.gmra.mrb[44].mxu0 %v6788_v57  ;;  %2895 = vmatprep.mubr.bf16.mxu1 %v6648_v49  ;;  %v6804_v49 = vld [vmem:[#allocation2 + $0x100] sm:$0xff] }
 0x283   : > { %5257 = vmatprep.mubr.bf16.mxu0 %v6792_v46  ;;  %5286 = vmatpush3.bf16.msra.mxu0 %v5763_v50  ;;  %v4695_v61 = vpop.f32.mrb[4].mxu1 }
 0x284   : > { %5287 = vmatprep.subr.bf16.mxu0 %v5764_v60  ;;  %v4696_v63 = vpop.f32.mrb[5].mxu1 }
 0x285   : > { %v6795_v1 = vadd.f32 %v4696_v63, %v4695_v61  ;;  %v4698_v3 = vpop.f32.mrb[6].mxu1 }
 0x286   : > { %v4699_v16 = vpop.f32.mrb[7].mxu1 }
 0x287   : > { %5288 = vmatpush3.bf16.msra.mxu0 %v5764_v60  ;;  %v6797_v41 = vadd.f32 %v4699_v16, %v4698_v3 }
 0x289   : > { %2896 = vmatmul.mubr.bf16.gmra.mrb[112].mxu1 %v6676_v29 }
 0x28a   : > { %5258 = vmatmul.mubr.bf16.gmra.mrb[48].mxu0 %v6800_v24  ;;  %2903 = vmatprep.mubr.bf16.mxu1 %v6691_v39  ;;  %v6816_v39 = vld [vmem:[#allocation2 + $0x130] sm:$0xff] }
 0x28b   : > { %5261 = vmatprep.mubr.bf16.mxu0 %v6804_v49  ;;  %v4701_v2 = vpop.f32.mrb[8].mxu1 }
 0x28c   : > { %v4702_v7 = vpop.f32.mrb[9].mxu1 }
 0x28d   : > { %v6807_v10 = vadd.f32 %v4702_v7, %v4701_v2  ;;  %v4704_v12 = vpop.f32.mrb[10].mxu1 }
 0x28e   : > { %v4705_v54 = vpop.f32.mrb[11].mxu1 }
 0x28f   : > { %v6809_v29 = vadd.f32 %v4705_v54, %v4704_v12 }
 0x291   : > { %2904 = vmatmul.mubr.bf16.gmra.mrb[116].mxu1 %v6711_v5  ;;  %v6825_v5 = vld [vmem:[#allocation2 + $0x160] sm:$0xff] }
 0x292   : > { %5262 = vmatmul.mubr.bf16.gmra.mrb[52].mxu0 %v6812_v43  ;;  %2911 = vmatprep.mubr.bf16.mxu1 %v6680_v31  ;;  %v5766_v31 = vld [vmem:[#allocation9 + $0x8] sm:$0xff]  }
 0x293   : > { %5265 = vmatprep.mubr.bf16.mxu0 %v6816_v39  ;;  %5323 = vmatprep.subr.bf16.mxu1 %v5766_v31 }
 0x294   : > { %v4707_v13 = vpop.f32.mrb[12].mxu1  ;;  %5324 = vmatpush3.bf16.msra.mxu1 %v5766_v31 }
 0x295   : > { %v4708_v15 = vpop.f32.mrb[13].mxu1  ;;  %5325 = vmatprep.subr.bf16.mxu1 %v5767_v9 }
 0x296   : > { %v6819_v17 = vadd.f32 %v4708_v15, %v4707_v13  ;;  %v4710_v18 = vpop.f32.mrb[14].mxu1 }
 0x297   : > { %v4711_v14 = vpop.f32.mrb[15].mxu1 }
 0x298   : > { %v6821_v8 = vadd.f32 %v4711_v14, %v4710_v18  ;;  %5326 = vmatpush3.bf16.msra.mxu1 %v5767_v9 }
 0x299   : > { %2912 = vmatmul.mubr.bf16.gmra.mrb[120].mxu1 %v6704_v45  ;;  %5327 = vmatprep.subr.bf16.mxu1 %v5768_v38 }
 0x29a   : > { %5266 = vmatmul.mubr.bf16.gmra.mrb[56].mxu0 %v6689_v37  ;;  %2919 = vmatprep.mubr.bf16.mxu1 %v6759_v62 }
 0x29b   : > { %5269 = vmatprep.mubr.bf16.mxu0 %v6825_v5 }
 0x29c   : > { %v4713_v19 = vpop.f32.mrb[16].mxu1  ;;  %5328 = vmatpush3.bf16.msra.mxu1 %v5768_v38 }
 0x29d   : > { %v4714_v21 = vpop.f32.mrb[17].mxu1 }
 0x29e   : > { %v6829_v23 = vadd.f32 %v4714_v21, %v4713_v19  ;;  %v4716_v25 = vpop.f32.mrb[18].mxu1  ;;  %v5769_v19 = vld [vmem:[#allocation9 + $0x20] sm:$0xff]  }
 0x29f   : > { %v4717_v20 = vpop.f32.mrb[19].mxu1  ;;  %5329 = vmatprep.subr.bf16.mxu1 %v5769_v19 }
 0x2a0   : > { %v6831_v55 = vadd.f32 %v4717_v20, %v4716_v25  ;;  %5330 = vmatpush3.bf16.msra.mxu1 %v5769_v19 }
 0x2a1   : > { %2920 = vmatmul.mubr.bf16.gmra.mrb[124].mxu1 %v6759_v62 }
 0x2a2   : > { %5270 = vmatmul.mubr.bf16.gmra.mrb[60].mxu0 %v6715_v6 }
 0x2a3   : > { %5289 = vmatprep.mubr.bf16.mxu0 %v6763_v34 }
 0x2a4   : > { %v4719_v37 = vpop.f32.mrb[20].mxu1 }
 0x2a5   : > { %v4720_v45 = vpop.f32.mrb[21].mxu1 }
 0x2a6   : > { %v6836_v26 = vadd.f32 %v4720_v45, %v4719_v37  ;;  %v4722_v27 = vpop.f32.mrb[22].mxu1 }
 0x2a7   : > { %v4723_v22 = vpop.f32.mrb[23].mxu1 }
 0x2a8   : > { %v6838_v4 = vadd.f32 %v4723_v22, %v4722_v27 }
 0x2aa   : > { %5290 = vmatmul.mubr.bf16.vlgmr.msra.gmra.mrb[32].mxu0 %v6768_v42 }
 0x2ab   : > { %5293 = vmatprep.mubr.bf16.mxu0 %v6772_v0 }
 0x2ac   : > { %v4725_v11 = vpop.f32.mrb[24].mxu1 }
 0x2ad   : > { %v4726_v58 = vpop.f32.mrb[25].mxu1 }
 0x2ae   : > { %v6842_v30 = vadd.f32 %v4726_v58, %v4725_v11  ;;  %v4728_v6 = vpop.f32.mrb[26].mxu1 }
 0x2af   : > { %v4729_v32 = vpop.f32.mrb[27].mxu1 }
 0x2b0   : > { %v6844_v33 = vadd.f32 %v4729_v32, %v4728_v6  ;;  %v2561_v6 = vld [vmem:[#allocation2 + $0x148] sm:$0xff] }
 0x2b2   : > { %5294 = vmatmul.mubr.bf16.gmra.mrb[36].mxu0 %v6776_v36 }
 0x2b3   : > { %5297 = vmatprep.mubr.bf16.mxu0 %v6780_v53 }
 0x2b4   : > { %v4731_v34 = vpop.f32.mrb[28].mxu1 }
 0x2b5   : > { %v4732_v35 = vpop.f32.mrb[29].mxu1 }
 0x2b6   : > { %v6848_v40 = vadd.f32 %v4732_v35, %v4731_v34  ;;  %v4734_v42 = vpop.f32.mrb[30].mxu1 }
 0x2b7   : > { %v4735_v0 = vpop.f32.mrb[31].mxu1 }
 0x2b8   : > { %v6850_v44 = vadd.f32 %v4735_v0, %v4734_v42 }
 0x2ba   : > { %5298 = vmatmul.mubr.bf16.gmra.mrb[40].mxu0 %v6788_v57 }
 0x2bb   : > { %5301 = vmatprep.mubr.bf16.mxu0 %v6792_v46 }
 0x2bc   : > { %v4737_v59 = vpop.f32.mrb[32].mxu1 }
 0x2bd   : > { %v4738_v50 = vpop.f32.mrb[33].mxu1  ;;  %v4825_v51 = vpop.f32.mrb[64].mxu0 }
 0x2be   : > { %v6854_v36 = vadd.f32 %v4738_v50, %v4737_v59  ;;  %v4740_v53 = vpop.f32.mrb[34].mxu1  ;;  %v4826_v56 = vpop.f32.mrb[65].mxu0 }
 0x2bf   : > { %v4827_v48 = vadd.f32 %v4826_v56, %v4825_v51  ;;  %v4741_v60 = vpop.f32.mrb[35].mxu1  ;;  %v4828_v61 = vpop.f32.mrb[66].mxu0  ;;  %v5770_v56 = vld [vmem:[#allocation9 + $0x28] sm:$0xff]  }
 0x2c0   : > { %v6856_v63 = vadd.f32 %v4741_v60, %v4740_v53  ;;  %v4829_v3 = vpop.f32.mrb[67].mxu0  ;;  %v2567_v60 = vld [vmem:[#allocation2 + $0x178] sm:$0xff]  ;;  %5331 = vmatprep.subr.bf16.mxu1 %v5770_v56 }
 0x2c1   : > { %v6859_v57 = vadd.f32 %v4827_v48, %v6783_v52  ;;  %v4830_v46 = vadd.f32 %v4829_v3, %v4828_v61  ;;  %5332 = vmatpush3.bf16.msra.mxu1 %v5770_v56 }
 0x2c2   : > { %5302 = vmatmul.mubr.bf16.gmra.mrb[44].mxu0 %v6800_v24 }
 0x2c3   : > { %v6863_v16 = vadd.f32 %v4830_v46, %v6785_v47  ;;  %5305 = vmatprep.mubr.bf16.mxu0 %v6804_v49 }
 0x2c4   : > { %v4743_v28 = vpop.f32.mrb[36].mxu1 }
 0x2c5   : > { %v4744_v2 = vpop.f32.mrb[37].mxu1  ;;  %v4831_v7 = vpop.f32.mrb[68].mxu0 }
 0x2c6   : > { %v6866_v12 = vadd.f32 %v4744_v2, %v4743_v28  ;;  %v4746_v54 = vpop.f32.mrb[38].mxu1  ;;  %v4832_v13 = vpop.f32.mrb[69].mxu0 }
 0x2c7   : > { %v4833_v15 = vadd.f32 %v4832_v13, %v4831_v7  ;;  %v4747_v18 = vpop.f32.mrb[39].mxu1  ;;  %v4834_v14 = vpop.f32.mrb[70].mxu0 }
 0x2c8   : > { %v6868_v52 = vadd.f32 %v4747_v18, %v4746_v54  ;;  %v4835_v31 = vpop.f32.mrb[71].mxu0 }
 0x2c9   : > { %v6871_v24 = vadd.f32 %v4833_v15, %v6795_v1  ;;  %v4836_v47 = vadd.f32 %v4835_v31, %v4834_v14 }
 0x2ca   : > { %5306 = vmatmul.mubr.bf16.gmra.mrb[48].mxu0 %v6812_v43 }
 0x2cb   : > { %v6875_v49 = vadd.f32 %v4836_v47, %v6797_v41  ;;  %5309 = vmatprep.mubr.bf16.mxu0 %v6816_v39 }
 0x2cc   : > { %v4749_v21 = vpop.f32.mrb[40].mxu1 }
 0x2cd   : > { %v4750_v25 = vpop.f32.mrb[41].mxu1  ;;  %v4837_v20 = vpop.f32.mrb[72].mxu0 }
 0x2ce   : > { %v6878_v37 = vadd.f32 %v4750_v25, %v4749_v21  ;;  %v4752_v45 = vpop.f32.mrb[42].mxu1  ;;  %v4838_v27 = vpop.f32.mrb[73].mxu0 }
 0x2cf   : > { %v4839_v22 = vadd.f32 %v4838_v27, %v4837_v20  ;;  %v4753_v1 = vpop.f32.mrb[43].mxu1  ;;  %v4840_v9 = vpop.f32.mrb[74].mxu0 }
 0x2d0   : > { %v6880_v11 = vadd.f32 %v4753_v1, %v4752_v45  ;;  %v4841_v43 = vpop.f32.mrb[75].mxu0 }
 0x2d1   : > { %v6883_v58 = vadd.f32 %v4839_v22, %v6807_v10  ;;  %v4842_v41 = vadd.f32 %v4841_v43, %v4840_v9 }
 0x2d2   : > { %5310 = vmatmul.mubr.bf16.gmra.mrb[52].mxu0 %v2561_v6 }
 0x2d3   : > { %v6886_v39 = vadd.f32 %v4842_v41, %v6809_v29  ;;  %5313 = vmatprep.mubr.bf16.mxu0 %v6825_v5  ;;  %v2570_v5 = vld [vmem:[#allocation2 + $0x190] sm:$0xff]  ;;  %v5771_v41 = vld [vmem:[#allocation9 + $0x30] sm:$0xff]  }
 0x2d4   : > { %v4755_v32 = vpop.f32.mrb[44].mxu1  ;;  %5333 = vmatprep.subr.bf16.mxu1 %v5771_v41 }
 0x2d5   : > { %v4756_v34 = vpop.f32.mrb[45].mxu1  ;;  %v4843_v35 = vpop.f32.mrb[76].mxu0  ;;  %5334 = vmatpush3.bf16.msra.mxu1 %v5771_v41 }
 0x2d6   : > { %v6889_v42 = vadd.f32 %v4756_v34, %v4755_v32  ;;  %v4758_v0 = vpop.f32.mrb[46].mxu1  ;;  %v4844_v38 = vpop.f32.mrb[77].mxu0 }
 0x2d7   : > { %v4845_v59 = vadd.f32 %v4844_v38, %v4843_v35  ;;  %v4759_v50 = vpop.f32.mrb[47].mxu1  ;;  %v4846_v51 = vpop.f32.mrb[78].mxu0 }
 0x2d8   : > { %v6891_v10 = vadd.f32 %v4759_v50, %v4758_v0  ;;  %v4847_v53 = vpop.f32.mrb[79].mxu0 }
 0x2d9   : > { %v6894_v48 = vadd.f32 %v4845_v59, %v6819_v17  ;;  %v4848_v29 = vadd.f32 %v4847_v53, %v4846_v51 }
 0x2da   : > { %5314 = vmatmul.mubr.bf16.gmra.mrb[56].mxu0 %v2567_v60 }
 0x2db   : > { %v6897_v61 = vadd.f32 %v4848_v29, %v6821_v8  ;;  %5317 = vmatprep.mubr.bf16.mxu0 %v2570_v5 }
 0x2dc   : > { %v4761_v3 = vpop.f32.mrb[48].mxu1 }
 0x2dd   : > { %v4762_v46 = vpop.f32.mrb[49].mxu1  ;;  %v4849_v28 = vpop.f32.mrb[80].mxu0 }
 0x2de   : > { %v6899_v2 = vadd.f32 %v4762_v46, %v4761_v3  ;;  %v4764_v7 = vpop.f32.mrb[50].mxu1  ;;  %v4850_v54 = vpop.f32.mrb[81].mxu0 }
 0x2df   : > { %v4851_v13 = vadd.f32 %v4850_v54, %v4849_v28  ;;  %v4765_v17 = vpop.f32.mrb[51].mxu1  ;;  %v4852_v15 = vpop.f32.mrb[82].mxu0 }
 0x2e0   : > { %v6901_v18 = vadd.f32 %v4765_v17, %v4764_v7  ;;  %v4853_v14 = vpop.f32.mrb[83].mxu0 }
 0x2e1   : > { %v6904_v31 = vadd.f32 %v4851_v13, %v6829_v23  ;;  %v4854_v8 = vadd.f32 %v4853_v14, %v4852_v15 }
 0x2e2   : > { %5318 = vmatmul.mubr.bf16.gmra.mrb[60].mxu0 %v6759_v62 }
 0x2e3   : > { %v6908_v19 = vadd.f32 %v4854_v8, %v6831_v55 }
 0x2e4   : > { %v4767_v47 = vpop.f32.mrb[52].mxu1 }
 0x2e5   : > { %v4768_v21 = vpop.f32.mrb[53].mxu1  ;;  %v4855_v25 = vpop.f32.mrb[84].mxu0 }
 0x2e6   : > { %v6910_v20 = vadd.f32 %v4768_v21, %v4767_v47  ;;  %v4770_v45 = vpop.f32.mrb[54].mxu1  ;;  %v4856_v27 = vpop.f32.mrb[85].mxu0  ;;  %v5772_v47 = vld [vmem:[#allocation9 + $0x38] sm:$0xff]  }
 0x2e7   : > { %v4857_v22 = vadd.f32 %v4856_v27, %v4855_v25  ;;  %v4771_v1 = vpop.f32.mrb[55].mxu1  ;;  %v4858_v9 = vpop.f32.mrb[86].mxu0  ;;  %5335 = vmatprep.subr.bf16.mxu1 %v5772_v47 }
 0x2e8   : > { %v6912_v43 = vadd.f32 %v4771_v1, %v4770_v45  ;;  %v4859_v23 = vpop.f32.mrb[87].mxu0  ;;  %5336 = vmatpush3.bf16.msra.mxu1 %v5772_v47 }
 0x2e9   : > { %v6915_v6 = vadd.f32 %v4857_v22, %v6836_v26  ;;  %v4860_v62 = vadd.f32 %v4859_v23, %v4858_v9 }
 0x2eb   : > { %v6918_v55 = vadd.f32 %v4860_v62, %v6838_v4 }
 0x2ec   : > { %v4773_v32 = vpop.f32.mrb[56].mxu1 }
 0x2ed   : > { %v4774_v34 = vpop.f32.mrb[57].mxu1  ;;  %v4861_v35 = vpop.f32.mrb[88].mxu0 }
 0x2ee   : > { %v6920_v0 = vadd.f32 %v4774_v34, %v4773_v32  ;;  %v4776_v38 = vpop.f32.mrb[58].mxu1  ;;  %v4862_v59 = vpop.f32.mrb[89].mxu0 }
 0x2ef   : > { %v4863_v50 = vadd.f32 %v4862_v59, %v4861_v35  ;;  %v4777_v51 = vpop.f32.mrb[59].mxu1  ;;  %v4864_v53 = vpop.f32.mrb[90].mxu0 }
 0x2f0   : > { %v6922_v56 = vadd.f32 %v4777_v51, %v4776_v38  ;;  %v4865_v26 = vpop.f32.mrb[91].mxu0 }
 0x2f1   : > { %v6925_v29 = vadd.f32 %v4863_v50, %v6842_v30  ;;  %v4866_v60 = vadd.f32 %v4865_v26, %v4864_v53 }
 0x2f3   : > { %v6928_v4 = vadd.f32 %v4866_v60, %v6844_v33 }
 0x2f4   : > { %v4779_v5 = vpop.f32.mrb[60].mxu1 }
 0x2f5   : > { %v4780_v3 = vpop.f32.mrb[61].mxu1  ;;  %v4867_v46 = vpop.f32.mrb[92].mxu0 }
 0x2f6   : > { %v6930_v28 = vadd.f32 %v4780_v3, %v4779_v5  ;;  %v4782_v7 = vpop.f32.mrb[62].mxu1  ;;  %v4868_v54 = vpop.f32.mrb[93].mxu0 }
 0x2f7   : > { %v4869_v13 = vadd.f32 %v4868_v54, %v4867_v46  ;;  %v4783_v17 = vpop.f32.mrb[63].mxu1  ;;  %v4870_v15 = vpop.f32.mrb[94].mxu0 }
 0x2f8   : > { %v6932_v14 = vadd.f32 %v4783_v17, %v4782_v7  ;;  %v4871_v8 = vpop.f32.mrb[95].mxu0 }
 0x2f9   : > { %v6935_v30 = vadd.f32 %v4869_v13, %v6848_v40  ;;  %v4872_v21 = vadd.f32 %v4871_v8, %v4870_v15 }
 0x2fb   : > { %v6938_v33 = vadd.f32 %v4872_v21, %v6850_v44 }
 0x2fc   : > { %v4961_v25 = vpop.f32.mrb[64].mxu1 }
 0x2fd   : > { %v4873_v45 = vpop.f32.mrb[96].mxu0  ;;  %v4962_v27 = vpop.f32.mrb[65].mxu1 }
 0x2fe   : > { %v4963_v22 = vadd.f32 %v4962_v27, %v4961_v25  ;;  %v4874_v1 = vpop.f32.mrb[97].mxu0  ;;  %v4964_v9 = vpop.f32.mrb[66].mxu1 }
 0x2ff   : > { %v4875_v23 = vadd.f32 %v4874_v1, %v4873_v45  ;;  %v4876_v41 = vpop.f32.mrb[98].mxu0  ;;  %v4965_v62 = vpop.f32.mrb[67].mxu1  ;;  %v6964_v1 = vld [vmem:[#allocation11] sm:$0xff]  }
 0x300   : > { %v4966_v32 = vadd.f32 %v4965_v62, %v4964_v9  ;;  %v4877_v34 = vpop.f32.mrb[99].mxu0  ;;  %v6941_v40 = vadd.f32 %v6859_v57, %v4963_v22  ;;  %5369 = vmatprep.subr.bf16.mxu1 %v6964_v1 }
 0x301   : > { %v6944_v35 = vadd.f32 %v4875_v23, %v6854_v36  ;;  %v4878_v44 = vadd.f32 %v4877_v34, %v4876_v41 }
 0x302   : > { %v6947_v38 = vadd.f32 %v6863_v16, %v4966_v32 }
 0x303   : > { %v6950_v59 = vadd.f32 %v4878_v44, %v6856_v63 }
 0x304   : > { %v4967_v50 = vpop.f32.mrb[68].mxu1 }
 0x305   : > { %v4879_v51 = vpop.f32.mrb[100].mxu0  ;;  %v4968_v53 = vpop.f32.mrb[69].mxu1 }
 0x306   : > { %v4969_v26 = vadd.f32 %v4968_v53, %v4967_v50  ;;  %v4880_v60 = vpop.f32.mrb[101].mxu0  ;;  %v4970_v5 = vpop.f32.mrb[70].mxu1 }
 0x307   : > { %v4881_v3 = vadd.f32 %v4880_v60, %v4879_v51  ;;  %v4882_v46 = vpop.f32.mrb[102].mxu0  ;;  %v4971_v57 = vpop.f32.mrb[71].mxu1 }
 0x308   : > { %v4972_v7 = vadd.f32 %v4971_v57, %v4970_v5  ;;  %v4883_v54 = vpop.f32.mrb[103].mxu0  ;;  %v6953_v36 = vadd.f32 %v6871_v24, %v4969_v26 }
 0x309   : > { %v6956_v16 = vadd.f32 %v4881_v3, %v6866_v12  ;;  %v4884_v13 = vadd.f32 %v4883_v54, %v4882_v46 }
 0x30a   : > { %v6959_v63 = vadd.f32 %v6875_v49, %v4972_v7 }
 0x30b   : > { %v6962_v17 = vadd.f32 %v4884_v13, %v6868_v52 }
 0x30c   : > { %v4973_v15 = vpop.f32.mrb[72].mxu1 }
 0x30d   : > { %v4885_v8 = vpop.f32.mrb[104].mxu0  ;;  %v4974_v47 = vpop.f32.mrb[73].mxu1 }
 0x30e   : > { %v4975_v21 = vadd.f32 %v4974_v47, %v4973_v15  ;;  %v4886_v25 = vpop.f32.mrb[105].mxu0  ;;  %v4976_v45 = vpop.f32.mrb[74].mxu1 }
 0x30f   : > { %v4887_v27 = vadd.f32 %v4886_v25, %v4885_v8  ;;  %v4888_v22 = vpop.f32.mrb[106].mxu0  ;;  %v4977_v24 = vpop.f32.mrb[75].mxu1 }
 0x310   : > { %v4978_v12 = vadd.f32 %v4977_v24, %v4976_v45  ;;  %v4889_v9 = vpop.f32.mrb[107].mxu0  ;;  %v6967_v23 = vadd.f32 %v6883_v58, %v4975_v21 }
 0x311   : > { %v6970_v49 = vadd.f32 %v4887_v27, %v6878_v37  ;;  %v4890_v52 = vadd.f32 %v4889_v9, %v4888_v22 }
 0x312   : > { %v6974_v41 = vadd.f32 %v6886_v39, %v4978_v12 }
 0x313   : > { %v6977_v62 = vadd.f32 %v4890_v52, %v6880_v11 }
 0x314   : > { %v4979_v32 = vpop.f32.mrb[76].mxu1 }
 0x315   : > { %v4891_v34 = vpop.f32.mrb[108].mxu0  ;;  %v4980_v44 = vpop.f32.mrb[77].mxu1 }
 0x316   : > { %v4981_v50 = vadd.f32 %v4980_v44, %v4979_v32  ;;  %v4892_v51 = vpop.f32.mrb[109].mxu0  ;;  %v4982_v53 = vpop.f32.mrb[78].mxu1 }
 0x317   : > { %v4893_v58 = vadd.f32 %v4892_v51, %v4891_v34  ;;  %v4894_v26 = vpop.f32.mrb[110].mxu0  ;;  %v4983_v60 = vpop.f32.mrb[79].mxu1 }
 0x318   : > { %v4984_v37 = vadd.f32 %v4983_v60, %v4982_v53  ;;  %v4895_v5 = vpop.f32.mrb[111].mxu0  ;;  %v6980_v3 = vadd.f32 %v6894_v48, %v4981_v50 }
 0x319   : > { %v6983_v39 = vadd.f32 %v4893_v58, %v6889_v42  ;;  %v4896_v46 = vadd.f32 %v4895_v5, %v4894_v26 }
 0x31a   : > { %v6986_v11 = vadd.f32 %v6897_v61, %v4984_v37 }
 0x31b   : > { %v6989_v57 = vadd.f32 %v4896_v46, %v6891_v10 }
 0x31c   : > { %v4985_v7 = vpop.f32.mrb[80].mxu1 }
 0x31d   : > { %v4897_v54 = vpop.f32.mrb[112].mxu0  ;;  %v4986_v13 = vpop.f32.mrb[81].mxu1 }
 0x31e   : > { %v4987_v15 = vadd.f32 %v4986_v13, %v4985_v7  ;;  %v4898_v8 = vpop.f32.mrb[113].mxu0  ;;  %v4988_v47 = vpop.f32.mrb[82].mxu1 }
 0x31f   : > { %v4899_v21 = vadd.f32 %v4898_v8, %v4897_v54  ;;  %v4900_v25 = vpop.f32.mrb[114].mxu0  ;;  %v4989_v48 = vpop.f32.mrb[83].mxu1 }
 0x320   : > { %v4990_v45 = vadd.f32 %v4989_v48, %v4988_v47  ;;  %v4901_v27 = vpop.f32.mrb[115].mxu0  ;;  %v6992_v42 = vadd.f32 %v6904_v31, %v4987_v15 }
 0x321   : > { %v6995_v61 = vadd.f32 %v4899_v21, %v6899_v2  ;;  %v4902_v22 = vadd.f32 %v4901_v27, %v4900_v25 }
 0x322   : > { %v6998_v10 = vadd.f32 %v6908_v19, %v4990_v45 }
 0x323   : > { %v7001_v24 = vadd.f32 %v4902_v22, %v6901_v18 }
 0x324   : > { %v4991_v12 = vpop.f32.mrb[84].mxu1 }
 0x325   : > { %v4903_v9 = vpop.f32.mrb[116].mxu0  ;;  %v4992_v52 = vpop.f32.mrb[85].mxu1 }
 0x326   : > { %v4993_v32 = vadd.f32 %v4992_v52, %v4991_v12  ;;  %v4904_v34 = vpop.f32.mrb[117].mxu0  ;;  %v4994_v44 = vpop.f32.mrb[86].mxu1 }
 0x327   : > { %v4905_v50 = vadd.f32 %v4904_v34, %v4903_v9  ;;  %v4906_v51 = vpop.f32.mrb[118].mxu0  ;;  %v4995_v31 = vpop.f32.mrb[87].mxu1 }
 0x328   : > { %v4996_v53 = vadd.f32 %v4995_v31, %v4994_v44  ;;  %v4907_v58 = vpop.f32.mrb[119].mxu0  ;;  %v7004_v2 = vadd.f32 %v6915_v6, %v4993_v32 }
 0x329   : > { %v7007_v19 = vadd.f32 %v4905_v50, %v6910_v20  ;;  %v4908_v26 = vadd.f32 %v4907_v58, %v4906_v51 }
 0x32a   : > { %v7010_v18 = vadd.f32 %v6918_v55, %v4996_v53 }
 0x32b   : > { %v7013_v60 = vadd.f32 %v4908_v26, %v6912_v43 }
 0x32c   : > { %v4997_v37 = vpop.f32.mrb[88].mxu1 }
 0x32d   : > { %v4909_v5 = vpop.f32.mrb[120].mxu0  ;;  %v4998_v46 = vpop.f32.mrb[89].mxu1 }
 0x32e   : > { %v4999_v7 = vadd.f32 %v4998_v46, %v4997_v37  ;;  %v4910_v54 = vpop.f32.mrb[121].mxu0  ;;  %v5000_v13 = vpop.f32.mrb[90].mxu1 }
 0x32f   : > { %v4911_v15 = vadd.f32 %v4910_v54, %v4909_v5  ;;  %v4912_v8 = vpop.f32.mrb[122].mxu0  ;;  %v5001_v6 = vpop.f32.mrb[91].mxu1 }
 0x330   : > { %v5002_v47 = vadd.f32 %v5001_v6, %v5000_v13  ;;  %v4913_v21 = vpop.f32.mrb[123].mxu0  ;;  %v7016_v20 = vadd.f32 %v6925_v29, %v4999_v7 }
 0x331   : > { %v7019_v55 = vadd.f32 %v4911_v15, %v6920_v0  ;;  %v4914_v25 = vadd.f32 %v4913_v21, %v4912_v8 }
 0x332   : > { %v7022_v43 = vadd.f32 %v6928_v4, %v5002_v47 }
 0x333   : > { %v7025_v48 = vadd.f32 %v4914_v25, %v6922_v56 }
 0x334   : > { %v5003_v45 = vpop.f32.mrb[92].mxu1 }
 0x335   : > { %v4915_v27 = vpop.f32.mrb[124].mxu0  ;;  %v5004_v22 = vpop.f32.mrb[93].mxu1 }
 0x336   : > { %v5005_v12 = vadd.f32 %v5004_v22, %v5003_v45  ;;  %v4916_v9 = vpop.f32.mrb[125].mxu0  ;;  %v5006_v52 = vpop.f32.mrb[94].mxu1 }
 0x337   : > { %v4917_v32 = vadd.f32 %v4916_v9, %v4915_v27  ;;  %v4918_v34 = vpop.f32.mrb[126].mxu0  ;;  %v5007_v29 = vpop.f32.mrb[95].mxu1 }
 0x338   : > { %v5008_v44 = vadd.f32 %v5007_v29, %v5006_v52  ;;  %v4919_v50 = vpop.f32.mrb[127].mxu0  ;;  %v7028_v0 = vadd.f32 %v6935_v30, %v5005_v12 }
 0x339   : > { %v7031_v4 = vadd.f32 %v4917_v32, %v6930_v28  ;;  %v4920_v51 = vadd.f32 %v4919_v50, %v4918_v34 }
 0x33a   : > { %v7034_v56 = vadd.f32 %v6938_v33, %v5008_v44 }
 0x33b   : > { %v7037_v31 = vadd.f32 %v4920_v51, %v6932_v14 }
 0x33c   : > { %v5009_v53 = vpop.f32.mrb[96].mxu1 }
 0x33d   : > { %v5010_v58 = vpop.f32.mrb[97].mxu1 }
 0x33e   : > { %v5011_v26 = vadd.f32 %v5010_v58, %v5009_v53  ;;  %v5012_v37 = vpop.f32.mrb[98].mxu1 }
 0x33f   : > { %v5013_v5 = vpop.f32.mrb[99].mxu1 }
 0x340   : > { %v5014_v46 = vadd.f32 %v5013_v5, %v5012_v37  ;;  %v7040_v7 = vadd.f32 %v6944_v35, %v5011_v26 }
 0x342   : > { %v7043_v30 = vadd.f32 %v6950_v59, %v5014_v46 }
 0x344   : > { %v5015_v28 = vpop.f32.mrb[100].mxu1 }
 0x345   : > { %v5016_v54 = vpop.f32.mrb[101].mxu1 }
 0x346   : > { %v5017_v13 = vadd.f32 %v5016_v54, %v5015_v28  ;;  %v5018_v33 = vpop.f32.mrb[102].mxu1 }
 0x347   : > { %v5019_v15 = vpop.f32.mrb[103].mxu1 }
 0x348   : > { %v5020_v8 = vadd.f32 %v5019_v15, %v5018_v33  ;;  %v7046_v14 = vadd.f32 %v6956_v16, %v5017_v13 }
 0x34a   : > { %v7049_v6 = vadd.f32 %v6962_v17, %v5020_v8 }
 0x34c   : > { %v5021_v47 = vpop.f32.mrb[104].mxu1 }
 0x34d   : > { %v5022_v21 = vpop.f32.mrb[105].mxu1 }
 0x34e   : > { %v5023_v25 = vadd.f32 %v5022_v21, %v5021_v47  ;;  %v5024_v35 = vpop.f32.mrb[106].mxu1 }
 0x34f   : > { %v5025_v45 = vpop.f32.mrb[107].mxu1 }
 0x350   : > { %v5026_v27 = vadd.f32 %v5025_v45, %v5024_v35  ;;  %v7052_v59 = vadd.f32 %v6970_v49, %v5023_v25 }
 0x352   : > { %v7055_v22 = vadd.f32 %v6977_v62, %v5026_v27 }
 0x354   : > { %v5027_v12 = vpop.f32.mrb[108].mxu1 }
 0x355   : > { %v5028_v9 = vpop.f32.mrb[109].mxu1 }
 0x356   : > { %v5029_v52 = vadd.f32 %v5028_v9, %v5027_v12  ;;  %v5030_v16 = vpop.f32.mrb[110].mxu1 }
 0x357   : > { %v5031_v32 = vpop.f32.mrb[111].mxu1 }
 0x358   : > { %v5032_v34 = vadd.f32 %v5031_v32, %v5030_v16  ;;  %v7058_v17 = vadd.f32 %v6983_v39, %v5029_v52 }
 0x35a   : > { %v7061_v29 = vadd.f32 %v6989_v57, %v5032_v34  ;;  %v7096_v34 = vld [vmem:[%s7507_s6] ss:$0 sm:$0xff] }
 0x35c   : > { %v5033_v44 = vpop.f32.mrb[112].mxu1 }
 0x35d   : > { %v5034_v50 = vpop.f32.mrb[113].mxu1 }
 0x35e   : > { %v5035_v51 = vadd.f32 %v5034_v50, %v5033_v44  ;;  %v5036_v49 = vpop.f32.mrb[114].mxu1 }
 0x35f   : > { %v5037_v53 = vpop.f32.mrb[115].mxu1 }
 0x360   : > { %v5038_v58 = vadd.f32 %v5037_v53, %v5036_v49  ;;  %v7064_v62 = vadd.f32 %v6995_v61, %v5035_v51 }
 0x362   : > { %v7067_v26 = vadd.f32 %v7001_v24, %v5038_v58 }
 0x364   : > { %v5039_v37 = vpop.f32.mrb[116].mxu1 }
 0x365   : > { %v5040_v5 = vpop.f32.mrb[117].mxu1 }
 0x366   : > { %v5041_v46 = vadd.f32 %v5040_v5, %v5039_v37  ;;  %v5042_v39 = vpop.f32.mrb[118].mxu1 }
 0x367   : > { %v5043_v28 = vpop.f32.mrb[119].mxu1 }
 0x368   : > { %v5044_v54 = vadd.f32 %v5043_v28, %v5042_v39  ;;  %v7070_v57 = vadd.f32 %v7007_v19, %v5041_v46 }
 0x36a   : > { %v7073_v13 = vadd.f32 %v7013_v60, %v5044_v54 }
 0x36c   : > { %v5045_v33 = vpop.f32.mrb[120].mxu1 }
 0x36d   : > { %v5046_v15 = vpop.f32.mrb[121].mxu1 }
 0x36e   : > { %v5047_v8 = vadd.f32 %v5046_v15, %v5045_v33  ;;  %v5048_v61 = vpop.f32.mrb[122].mxu1 }
 0x36f   : > { %v5049_v47 = vpop.f32.mrb[123].mxu1 }
 0x370   : > { %v5050_v21 = vadd.f32 %v5049_v47, %v5048_v61  ;;  %v7076_v24 = vadd.f32 %v7019_v55, %v5047_v8  ;;  %v7090_v55 = vld [vmem:[%s7506_s5] ss:$0 sm:$0xff] }
 0x372   : > { %v7079_v25 = vadd.f32 %v7025_v48, %v5050_v21 }
 0x374   : > { %v5051_v35 = vpop.f32.mrb[124].mxu1 }
 0x375   : > { %v5052_v45 = vpop.f32.mrb[125].mxu1 }
 0x376   : > { %v5053_v27 = vadd.f32 %v5052_v45, %v5051_v35  ;;  %v5054_v19 = vpop.f32.mrb[126].mxu1 }
 0x377   : > { %v5055_v12 = vpop.f32.mrb[127].mxu1 }
 0x378   : > { %v5056_v9 = vadd.f32 %v5055_v12, %v5054_v19  ;;  %v7082_v60 = vadd.f32 %v7031_v4, %v5053_v27 }
 0x37a   : > { %v7085_v52 = vadd.f32 %v7037_v31, %v5056_v9 }
 0x37d   : > { %v5291_v16 = vpop.f32.mrb[32].mxu0 }
 0x37e   : > { %v5419_v48 = vadd.f32 %v6953_v36, %v5291_v16  ;;  %v2962_v32 = vpop.f32.mrb[33].mxu0  ;;  %v5774_v16 = vld [vmem:[#allocation11 + $0x8] sm:$0xff]  }
 0x37f   : > { %v5422_v4 = vadd.f32 %v6941_v40, %v2962_v32  ;;  %v5292_v44 = vpop.f32.mrb[34].mxu0 }
 0x380   : > { %v3130_v31 = vmul.f32 %v5419_v48, %v7090_v55  ;;  %v5425_v50 = vadd.f32 %v6959_v63, %v5292_v44  ;;  %v2965_v51 = vpop.f32.mrb[35].mxu0 }
 0x381   : > { %v3128_v49 = vmul.f32 %v5422_v4, %v7090_v55  ;;  %v5428_v53 = vadd.f32 %v6947_v38, %v2965_v51  ;;  %v5775_v51 = vld [vmem:[#allocation11 + $0x10] sm:$0xff]  }
 0x382   : > { %v3169_v36 = vadd.f32 %v7096_v34, %v3130_v31  ;;  %v3131_v58 = vmul.f32 %v5425_v50, %v7090_v55 }
 0x383   : > { %v3167_v37 = vadd.f32 %v7096_v34, %v3128_v49  ;;  %v3129_v5 = vmul.f32 %v5428_v53, %v7090_v55 }
 0x384   : > { %v3170_v40 = vadd.f32 %v7096_v34, %v3131_v58  ;;  %v3201_v28 = vmax.f32 %v3169_v36, 0.0 }
 0x385   : > { %v3168_v46 = vadd.f32 %v7096_v34, %v3129_v5  ;;  %v5295_v39 = vpop.f32.mrb[36].mxu0  ;;  %v3199_v15 = vmax.f32 %v3167_v37, 0.0 }
 0x386   : > { %v3202_v63 = vmax.f32 %v3170_v40, 0.0  ;;  %v5431_v54 = vadd.f32 %v6980_v3, %v5295_v39  ;;  %v2978_v33 = vpop.f32.mrb[37].mxu0 }
 0x387   : > { %v3200_v38 = vmax.f32 %v3168_v46, 0.0  ;;  %v5434_v8 = vadd.f32 %v6967_v23, %v2978_v33  ;;  %v5296_v61 = vpop.f32.mrb[38].mxu0 }
 0x388   : > { %v3232_v47 = vpack.c.bf16 %v3202_v63, %v3201_v28  ;;  %v3134_v21 = vmul.f32 %v5431_v54, %v7090_v55  ;;  %v5437_v35 = vadd.f32 %v6986_v11, %v5296_v61  ;;  %v2981_v45 = vpop.f32.mrb[39].mxu0  ;;  %v5776_v54 = vld [vmem:[#allocation11 + $0x18] sm:$0xff]  }
 0x389   : > { %v3132_v27 = vmul.f32 %v5434_v8, %v7090_v55  ;;  %v5440_v19 = vadd.f32 %v6974_v41, %v2981_v45  ;;  %v3231_v12 = vpack.c.bf16 %v3200_v38, %v3199_v15 }
 0x38a   : > { %v3173_v9 = vadd.f32 %v7096_v34, %v3134_v21  ;;  %v3135_v3 = vmul.f32 %v5437_v35, %v7090_v55  ;;  %v5777_v21 = vld [vmem:[#allocation11 + $0x20] sm:$0xff]  }
 0x38b   : > { %v3171_v48 = vadd.f32 %v7096_v34, %v3132_v27  ;;  %v3133_v23 = vmul.f32 %v5440_v19, %v7090_v55  ;;  %5337 = vmatprep.mubr.bf16.mxu1 %v3231_v12 }
 0x38c   : > { %v3174_v32 = vadd.f32 %v7096_v34, %v3135_v3  ;;  %5338 = vmatmul.mubr.bf16.vlgmr.msra.gmra.mrb[128].mxu1 %v3232_v47  ;;  %v3205_v41 = vmax.f32 %v3173_v9, 0.0 }
 0x38d   : > { %v3172_v11 = vadd.f32 %v7096_v34, %v3133_v23  ;;  %5370 = vmatpush3.bf16.msra.mxu1 %v6964_v1  ;;  %v5299_v4 = vpop.f32.mrb[40].mxu0  ;;  %v3203_v49 = vmax.f32 %v3171_v48, 0.0 }
 0x38e   : > { %v3206_v44 = vmax.f32 %v3174_v32, 0.0  ;;  %v5443_v31 = vadd.f32 %v7004_v2, %v5299_v4  ;;  %v2994_v50 = vpop.f32.mrb[41].mxu0  ;;  %5371 = vmatprep.subr.bf16.mxu1 %v5774_v16  ;;  %v5778_v4 = vld [vmem:[#allocation11 + $0x28] sm:$0xff]  }
 0x38f   : > { %v3204_v53 = vmax.f32 %v3172_v11, 0.0  ;;  %v5446_v36 = vadd.f32 %v6992_v42, %v2994_v50  ;;  %v5300_v58 = vpop.f32.mrb[42].mxu0 }
 0x390   : > { %v3138_v37 = vmul.f32 %v5443_v31, %v7090_v55  ;;  %v5449_v5 = vadd.f32 %v7010_v18, %v5300_v58  ;;  %v2997_v40 = vpop.f32.mrb[43].mxu0  ;;  %v3234_v46 = vpack.c.bf16 %v3206_v44, %v3205_v41 }
 0x391   : > { %v3136_v1 = vmul.f32 %v5446_v36, %v7090_v55  ;;  %v5452_v39 = vadd.f32 %v6998_v10, %v2997_v40  ;;  %v3233_v28 = vpack.c.bf16 %v3204_v53, %v3203_v49  ;;  %5372 = vmatpush3.bf16.msra.mxu1 %v5774_v16  ;;  %v5779_v53 = vld [vmem:[#allocation11 + $0x30] sm:$0xff]  }
 0x392   : > { %v3177_v2 = vadd.f32 %v7096_v34, %v3138_v37  ;;  %v3139_v63 = vmul.f32 %v5449_v5, %v7090_v55  ;;  %5373 = vmatprep.subr.bf16.mxu1 %v5775_v51 }
 0x393   : > { %v3175_v42 = vadd.f32 %v7096_v34, %v3136_v1  ;;  %v3137_v33 = vmul.f32 %v5452_v39, %v7090_v55  ;;  %5341 = vmatprep.mubr.bf16.mxu1 %v3233_v28 }
 0x394   : > { %v3178_v18 = vadd.f32 %v7096_v34, %v3139_v63  ;;  %5342 = vmatmul.mubr.bf16.gmra.mrb[132].mxu1 %v3234_v46  ;;  %v3209_v10 = vmax.f32 %v3177_v2, 0.0 }
 0x395   : > { %v3176_v15 = vadd.f32 %v7096_v34, %v3137_v33  ;;  %v5303_v38 = vpop.f32.mrb[44].mxu0  ;;  %5374 = vmatpush3.bf16.msra.mxu1 %v5775_v51  ;;  %v3207_v35 = vmax.f32 %v3175_v42, 0.0  ;;  %v5780_v42 = vld [vmem:[#allocation11 + $0x38] sm:$0xff]  }
 0x396   : > { %v3210_v8 = vmax.f32 %v3178_v18, 0.0  ;;  %v5455_v61 = vadd.f32 %v7028_v0, %v5303_v38  ;;  %v3010_v47 = vpop.f32.mrb[45].mxu0  ;;  %5375 = vmatprep.subr.bf16.mxu1 %v5776_v54 }
 0x397   : > { %v3208_v45 = vmax.f32 %v3176_v15, 0.0  ;;  %v5458_v27 = vadd.f32 %v7016_v20, %v3010_v47  ;;  %v5304_v19 = vpop.f32.mrb[46].mxu0 }
 0x398   : > { %v3142_v12 = vmul.f32 %v5455_v61, %v7090_v55  ;;  %v5461_v9 = vadd.f32 %v7034_v56, %v5304_v19  ;;  %v3013_v3 = vpop.f32.mrb[47].mxu0  ;;  %v3236_v16 = vpack.c.bf16 %v3210_v8, %v3209_v10 }
 0x399   : > { %v3140_v48 = vmul.f32 %v5458_v27, %v7090_v55  ;;  %v5464_v23 = vadd.f32 %v7022_v43, %v3013_v3  ;;  %v3235_v32 = vpack.c.bf16 %v3208_v45, %v3207_v35  ;;  %5376 = vmatpush3.bf16.msra.mxu1 %v5776_v54 }
 0x39a   : > { %v3181_v0 = vadd.f32 %v7096_v34, %v3142_v12  ;;  %v3143_v11 = vmul.f32 %v5461_v9, %v7090_v55  ;;  %5377 = vmatprep.subr.bf16.mxu1 %v5777_v21 }
 0x39b   : > { %v3179_v20 = vadd.f32 %v7096_v34, %v3140_v48  ;;  %v3141_v41 = vmul.f32 %v5464_v23, %v7090_v55  ;;  %5345 = vmatprep.mubr.bf16.mxu1 %v3235_v32 }
 0x39c   : > { %v3182_v56 = vadd.f32 %v7096_v34, %v3143_v11  ;;  %5346 = vmatmul.mubr.bf16.gmra.mrb[136].mxu1 %v3236_v16  ;;  %v3213_v43 = vmax.f32 %v3181_v0, 0.0 }
 0x39d   : > { %v3180_v44 = vadd.f32 %v7096_v34, %v3141_v41  ;;  %v5307_v31 = vpop.f32.mrb[48].mxu0  ;;  %5378 = vmatpush3.bf16.msra.mxu1 %v5777_v21  ;;  %v3211_v36 = vmax.f32 %v3179_v20, 0.0 }
 0x39e   : > { %v3214_v50 = vmax.f32 %v3182_v56, 0.0  ;;  %v5467_v51 = vadd.f32 %v7046_v14, %v5307_v31  ;;  %v3026_v49 = vpop.f32.mrb[49].mxu0  ;;  %5379 = vmatprep.subr.bf16.mxu1 %v5778_v4 }
 0x39f   : > { %v3212_v58 = vmax.f32 %v3180_v44, 0.0  ;;  %v5470_v37 = vadd.f32 %v7040_v7, %v3026_v49  ;;  %v5308_v5 = vpop.f32.mrb[50].mxu0 }
 0x3a0   : > { %v3146_v40 = vmul.f32 %v5467_v51, %v7090_v55  ;;  %v5473_v46 = vadd.f32 %v7049_v6, %v5308_v5  ;;  %v3029_v1 = vpop.f32.mrb[51].mxu0  ;;  %v3238_v39 = vpack.c.bf16 %v3214_v50, %v3213_v43 }
 0x3a1   : > { %v3144_v28 = vmul.f32 %v5470_v37, %v7090_v55  ;;  %v5476_v2 = vadd.f32 %v7043_v30, %v3029_v1  ;;  %v3237_v63 = vpack.c.bf16 %v3212_v58, %v3211_v36  ;;  %5380 = vmatpush3.bf16.msra.mxu1 %v5778_v4 }
 0x3a2   : > { %v3185_v14 = vadd.f32 %v7096_v34, %v3146_v40  ;;  %v3147_v54 = vmul.f32 %v5473_v46, %v7090_v55  ;;  %5381 = vmatprep.subr.bf16.mxu1 %v5779_v53 }
 0x3a3   : > { %v3183_v7 = vadd.f32 %v7096_v34, %v3144_v28  ;;  %v3145_v33 = vmul.f32 %v5476_v2, %v7090_v55  ;;  %5349 = vmatprep.mubr.bf16.mxu1 %v3237_v63 }
 0x3a4   : > { %v3186_v6 = vadd.f32 %v7096_v34, %v3147_v54  ;;  %5350 = vmatmul.mubr.bf16.gmra.mrb[140].mxu1 %v3238_v39  ;;  %v3217_v30 = vmax.f32 %v3185_v14, 0.0 }
 0x3a5   : > { %v3184_v18 = vadd.f32 %v7096_v34, %v3145_v33  ;;  %v5311_v15 = vpop.f32.mrb[52].mxu0  ;;  %5382 = vmatpush3.bf16.msra.mxu1 %v5779_v53  ;;  %v3215_v61 = vmax.f32 %v3183_v7, 0.0 }
 0x3a6   : > { %v3218_v38 = vmax.f32 %v3186_v6, 0.0  ;;  %v5479_v10 = vadd.f32 %v7058_v17, %v5311_v15  ;;  %v3042_v8 = vpop.f32.mrb[53].mxu0  ;;  %5383 = vmatprep.subr.bf16.mxu1 %v5780_v42 }
 0x3a7   : > { %v3216_v47 = vmax.f32 %v3184_v18, 0.0  ;;  %v5482_v21 = vadd.f32 %v7052_v59, %v3042_v8  ;;  %v5312_v35 = vpop.f32.mrb[54].mxu0 }
 0x3a8   : > { %v3150_v45 = vmul.f32 %v5479_v10, %v7090_v55  ;;  %v5485_v27 = vadd.f32 %v7061_v29, %v5312_v35  ;;  %v3045_v19 = vpop.f32.mrb[55].mxu0  ;;  %v3240_v12 = vpack.c.bf16 %v3218_v38, %v3217_v30 }
 0x3a9   : > { %v3148_v9 = vmul.f32 %v5482_v21, %v7090_v55  ;;  %v5488_v3 = vadd.f32 %v7055_v22, %v3045_v19  ;;  %v3239_v16 = vpack.c.bf16 %v3216_v47, %v3215_v61  ;;  %5384 = vmatpush3.bf16.msra.mxu1 %v5780_v42  ;;  %v5783_v19 = vld [vmem:[%s6329_s8 + $0x10] sm:$0xff]  }
 0x3aa   : > { %v3189_v17 = vadd.f32 %v7096_v34, %v3150_v45  ;;  %v3151_v48 = vmul.f32 %v5485_v27, %v7090_v55  ;;  %v5781_v27 = vld [vmem:[%s6329_s8] sm:$0xff]  }
 0x3ab   : > { %v3187_v23 = vadd.f32 %v7096_v34, %v3148_v9  ;;  %v3149_v59 = vmul.f32 %v5488_v3, %v7090_v55  ;;  %5353 = vmatprep.mubr.bf16.mxu1 %v3239_v16  ;;  %v5786_v9 = vld [vmem:[%s6329_s8 + $0x28] sm:$0xff]   ;;  %v5787_v3 = vld [vmem:[%s6329_s8 + $0x30] sm:$0xff]   ;;  %v5788_v16 = vld [vmem:[%s6329_s8 + $0x38] sm:$0xff]  }
 0x3ac   : > { %v3190_v32 = vadd.f32 %v7096_v34, %v3151_v48  ;;  %5354 = vmatmul.mubr.bf16.gmra.mrb[144].mxu1 %v3240_v12  ;;  %v3221_v11 = vmax.f32 %v3189_v17, 0.0  ;;  %v5785_v12 = vld [vmem:[%s6329_s8 + $0x20] sm:$0xff]   ;;  %v5790_v48 = vld [vmem:[%s6329_s8 + $0x48] sm:$0xff]  }
 0x3ad   : > { %v3188_v29 = vadd.f32 %v7096_v34, %v3149_v59  ;;  %v5315_v0 = vpop.f32.mrb[56].mxu0  ;;  %v3219_v41 = vmax.f32 %v3187_v23, 0.0  ;;  %v5789_v17 = vld [vmem:[%s6329_s8 + $0x40] sm:$0xff]   ;;  %v5791_v23 = vld [vmem:[%s6329_s8 + $0x50] sm:$0xff]   ;;  %v5792_v59 = vld [vmem:[%s6329_s8 + $0x58] sm:$0xff]  }
 0x3ae   : > { %v3222_v4 = vmax.f32 %v3190_v32, 0.0  ;;  %v5491_v22 = vadd.f32 %v7070_v57, %v5315_v0  ;;  %v3058_v20 = vpop.f32.mrb[57].mxu0  ;;  %v5793_v32 = vld [vmem:[%s6329_s8 + $0x60] sm:$0xff]   ;;  %v5795_v0 = vld [vmem:[%s6329_s8 + $0x70] sm:$0xff]  }
 0x3af   : > { %v3220_v56 = vmax.f32 %v3188_v29, 0.0  ;;  %v5494_v44 = vadd.f32 %v7064_v62, %v3058_v20  ;;  %v5316_v31 = vpop.f32.mrb[58].mxu0  ;;  %v5794_v29 = vld [vmem:[%s6329_s8 + $0x68] sm:$0xff]  }
 0x3b0   : > { %v3154_v43 = vmul.f32 %v5491_v22, %v7090_v55  ;;  %v5497_v50 = vadd.f32 %v7073_v13, %v5316_v31  ;;  %v3061_v51 = vpop.f32.mrb[59].mxu0  ;;  %v3242_v49 = vpack.c.bf16 %v3222_v4, %v3221_v11  ;;  %v5796_v11 = vld [vmem:[%s6329_s8 + $0x78] sm:$0xff]  }
 0x3b1   : > { %v3152_v53 = vmul.f32 %v5494_v44, %v7090_v55  ;;  %v5500_v36 = vadd.f32 %v7067_v26, %v3061_v51  ;;  %v3241_v58 = vpack.c.bf16 %v3220_v56, %v3219_v41 }
 0x3b2   : > { %v3193_v37 = vadd.f32 %v7096_v34, %v3154_v43  ;;  %v3155_v57 = vmul.f32 %v5497_v50, %v7090_v55 }
 0x3b3   : > { %v3191_v5 = vadd.f32 %v7096_v34, %v3152_v53  ;;  %v3153_v62 = vmul.f32 %v5500_v36, %v7090_v55  ;;  %5357 = vmatprep.mubr.bf16.mxu1 %v3241_v58 }
 0x3b4   : > { %v3194_v40 = vadd.f32 %v7096_v34, %v3155_v57  ;;  %5358 = vmatmul.mubr.bf16.gmra.mrb[148].mxu1 %v3242_v49  ;;  %v3225_v1 = vmax.f32 %v3193_v37, 0.0 }
 0x3b5   : > { %v3192_v13 = vadd.f32 %v7096_v34, %v3153_v62  ;;  %v5319_v46 = vpop.f32.mrb[60].mxu0  ;;  %v3223_v2 = vmax.f32 %v3191_v5, 0.0 }
 0x3b6   : > { %v3226_v39 = vmax.f32 %v3194_v40, 0.0  ;;  %v5503_v26 = vadd.f32 %v7082_v60, %v5319_v46  ;;  %v3074_v28 = vpop.f32.mrb[61].mxu0 }
 0x3b7   : > { %v3224_v63 = vmax.f32 %v3192_v13, 0.0  ;;  %v5506_v14 = vadd.f32 %v7076_v24, %v3074_v28  ;;  %v5320_v54 = vpop.f32.mrb[62].mxu0 }
 0x3b8   : > { %v3158_v42 = vmul.f32 %v5503_v26, %v7090_v55  ;;  %v5509_v7 = vadd.f32 %v7085_v52, %v5320_v54  ;;  %v3077_v33 = vpop.f32.mrb[63].mxu0  ;;  %v3244_v6 = vpack.c.bf16 %v3226_v39, %v3225_v1 }
 0x3b9   : > { %v3156_v18 = vmul.f32 %v5506_v14, %v7090_v55  ;;  %v5512_v15 = vadd.f32 %v7079_v25, %v3077_v33  ;;  %v3243_v30 = vpack.c.bf16 %v3224_v63, %v3223_v2 }
 0x3ba   : > { %v3197_v60 = vadd.f32 %v7096_v34, %v3158_v42  ;;  %v3159_v38 = vmul.f32 %v5509_v7, %v7090_v55 }
 0x3bb   : > { %v3195_v10 = vadd.f32 %v7096_v34, %v3156_v18  ;;  %v3157_v24 = vmul.f32 %v5512_v15, %v7090_v55  ;;  %5361 = vmatprep.mubr.bf16.mxu1 %v3243_v30  ;;  %v5782_v55 = vld [vmem:[%s6329_s8 + $0x8] sm:$0xff]   ;;  %v7266_v18 = vld [vmem:[%s7551_s14] ss:$0 sm:$0xff]  ;;  %s5940_s14 = scalar_lea.vmem %s7455_s20, 2048 }
 0x3bc   : > { %v3198_v52 = vadd.f32 %v7096_v34, %v3159_v38  ;;  %5362 = vmatmul.mubr.bf16.gmra.mrb[152].mxu1 %v3244_v6  ;;  %v3229_v25 = vmax.f32 %v3197_v60, 0.0  ;;  %v7261_v6 = vld [vmem:[%s7550_s25] ss:$0 sm:$0xff]  ;;  %p5941_p3 = scmp.ne.s32.totalorder %s7455_s20, %s5940_s14 }
 0x3bd   : > { %v3196_v8 = vadd.f32 %v7096_v34, %v3157_v24  ;;  %v3227_v47 = vmax.f32 %v3195_v10, 0.0  ;;  %v5784_v34 = vld [vmem:[%s6329_s8 + $0x18] sm:$0xff]   ;;  %v7272_v30 = vld [vmem:[%s7552_s24] ss:$0 sm:$0xff]  ;;  %s7453_s8 = scalar_lea.hbm %s7554_s23, %s4553_s22  ;;  %s5946_s24 = scalar_lea.vmem %s5945_s15, 4096 }
 0x3be   : > { %v3230_v61 = vmax.f32 %v3198_v52, 0.0  ;;  %v7278_v10 = vld [vmem:[%s7553_s19] ss:$0 sm:$0xff]  ;;  %p5942_p5 = pnand %p5941_p3, %p6268_p10  ;;  %p5948_p1 = scmp.lt.s32.totalorder %s5946_s24, %s5940_s14 }
 0x3bf   : > { %v3228_v21 = vmax.f32 %v3196_v8, 0.0 }
 0x3c0   : > { %v3246_v35 = vpack.c.bf16 %v3230_v61, %v3229_v25  ;;  %p5943_p7 = pneg %p5942_p5  ;;  %p5949_p2 = por %p5948_p1, %p5947_p12 }
 0x3c1   : > { %v3245_v45 = vpack.c.bf16 %v3228_v21, %v3227_v47 }
 0x3c2   : > { %p5950_p13 = pnand %p5949_p2, %p5943_p7 }
 0x3c3   : > { %5365 = vmatprep.mubr.bf16.mxu1 %v3245_v45 }
 0x3c4   : > { %5366 = vmatmul.mubr.bf16.gmra.mrb[156].mxu1 %v3246_v35 }
 0x3c5   : > { %5385 = vmatprep.mubr.bf16.mxu1 %v5781_v27 }
 0x3cc   : > { %5386 = vmatmul.mubr.bf16.vlgmr.msra.gmra.mrb[160].mxu1 %v5782_v55 }
 0x3cd   : > { %5389 = vmatprep.mubr.bf16.mxu1 %v5783_v19 }
 0x3d4   : > { %5390 = vmatmul.mubr.bf16.gmra.mrb[164].mxu1 %v5784_v34 }
 0x3d5   : > { %5393 = vmatprep.mubr.bf16.mxu1 %v5785_v12 }
 0x3dc   : > { %5394 = vmatmul.mubr.bf16.gmra.mrb[168].mxu1 %v5786_v9 }
 0x3dd   : > { %5397 = vmatprep.mubr.bf16.mxu1 %v5787_v3 }
 0x3e4   : > { %5398 = vmatmul.mubr.bf16.gmra.mrb[172].mxu1 %v5788_v16 }
 0x3e5   : > { %5401 = vmatprep.mubr.bf16.mxu1 %v5789_v17 }
 0x3ec   : > { %5402 = vmatmul.mubr.bf16.gmra.mrb[176].mxu1 %v5790_v48 }
 0x3ed   : > { %5405 = vmatprep.mubr.bf16.mxu1 %v5791_v23 }
 0x3f4   : > { %5406 = vmatmul.mubr.bf16.gmra.mrb[180].mxu1 %v5792_v59 }
 0x3f5   : > { %5409 = vmatprep.mubr.bf16.mxu1 %v5793_v32 }
 0x3fc   : > { %5410 = vmatmul.mubr.bf16.gmra.mrb[184].mxu1 %v5794_v29 }
 0x3fd   : > { %5413 = vmatprep.mubr.bf16.mxu1 %v5795_v0 }
 0x404   : > { %5414 = vmatmul.mubr.bf16.gmra.mrb[188].mxu1 %v5796_v11 }
 0x45f   : > { %v5339_v4 = vpop.f32.mrb[128].mxu1 }
 0x460   : > { %v3345_v22 = vpop.f32.mrb[129].mxu1  ;;  %v3481_v15 = vmul.f32 %v5339_v4, %v7261_v6 }
 0x461   : > { %v5340_v20 = vpop.f32.mrb[130].mxu1  ;;  %v3479_v60 = vmul.f32 %v7261_v6, %v3345_v22 }
 0x462   : > { %v3348_v41 = vpop.f32.mrb[131].mxu1  ;;  %v3482_v24 = vmul.f32 %v5340_v20, %v7261_v6  ;;  %v3520_v21 = vadd.f32 %v7272_v30, %v3481_v15 }
 0x463   : > { %v3480_v25 = vmul.f32 %v7261_v6, %v3348_v41  ;;  %v3518_v55 = vadd.f32 %v7272_v30, %v3479_v60 }
 0x464   : > { %v3521_v12 = vadd.f32 %v7272_v30, %v3482_v24 }
 0x465   : > { %v3519_v16 = vadd.f32 %v7272_v30, %v3480_v25 }
 0x467   : > { %v5343_v56 = vpop.f32.mrb[132].mxu1 }
 0x468   : > { %v3361_v44 = vpop.f32.mrb[133].mxu1  ;;  %v3485_v23 = vmul.f32 %v5343_v56, %v7261_v6 }
 0x469   : > { %v5344_v31 = vpop.f32.mrb[134].mxu1  ;;  %v3483_v32 = vmul.f32 %v7261_v6, %v3361_v44 }
 0x46a   : > { %v3364_v43 = vpop.f32.mrb[135].mxu1  ;;  %v3486_v11 = vmul.f32 %v5344_v31, %v7261_v6 }
 0x46b   : > { %v3484_v15 = vmul.f32 %v7261_v6, %v3364_v43 }
 0x46f   : > { %v7210_v50 = vpop.f32.mrb[136].mxu1 }
 0x470   : > { %v7212_v51 = vpop.f32.mrb[137].mxu1 }
 0x471   : > { %v7214_v49 = vpop.f32.mrb[138].mxu1 }
 0x472   : > { %v7216_v53 = vpop.f32.mrb[139].mxu1 }
 0x477   : > { %v7218_v36 = vpop.f32.mrb[140].mxu1 }
 0x478   : > { %v7220_v58 = vpop.f32.mrb[141].mxu1 }
 0x479   : > { %v7222_v37 = vpop.f32.mrb[142].mxu1 }
 0x47a   : > { %v7224_v57 = vpop.f32.mrb[143].mxu1 }
 0x47f   : > { %v7226_v5 = vpop.f32.mrb[144].mxu1 }
 0x480   : > { %v7228_v62 = vpop.f32.mrb[145].mxu1 }
 0x481   : > { %v7230_v40 = vpop.f32.mrb[146].mxu1 }
 0x482   : > { %v7232_v13 = vpop.f32.mrb[147].mxu1 }
 0x487   : > { %v7234_v46 = vpop.f32.mrb[148].mxu1 }
 0x488   : > { %v7236_v1 = vpop.f32.mrb[149].mxu1 }
 0x489   : > { %v7238_v39 = vpop.f32.mrb[150].mxu1 }
 0x48a   : > { %v7240_v26 = vpop.f32.mrb[151].mxu1 }
 0x48f   : > { %v7242_v28 = vpop.f32.mrb[152].mxu1 }
 0x490   : > { %v7244_v2 = vpop.f32.mrb[153].mxu1 }
 0x491   : > { %v7246_v63 = vpop.f32.mrb[154].mxu1 }
 0x492   : > { %v7248_v14 = vpop.f32.mrb[155].mxu1 }
 0x497   : > { %v7250_v54 = vpop.f32.mrb[156].mxu1 }
 0x498   : > { %v7252_v42 = vpop.f32.mrb[157].mxu1 }
 0x499   : > { %v7254_v7 = vpop.f32.mrb[158].mxu1 }
 0x49a   : > { %v7256_v33 = vpop.f32.mrb[159].mxu1 }
 0x49f   : > { %v5387_v38 = vpop.f32.mrb[160].mxu1 }
 0x4a0   : > { %v3912_v52 = vmul.f32 %v5387_v38, %v7266_v18  ;;  %v3776_v8 = vpop.f32.mrb[161].mxu1 }
 0x4a1   : > { %v3910_v61 = vmul.f32 %v7266_v18, %v3776_v8  ;;  %v5388_v47 = vpop.f32.mrb[162].mxu1 }
 0x4a2   : > { %v3951_v35 = vadd.f32 %v7278_v10, %v3912_v52  ;;  %v3913_v45 = vmul.f32 %v5388_v47, %v7266_v18  ;;  %v3779_v27 = vpop.f32.mrb[163].mxu1  ;;  %v3524_v52 = vadd.f32 %v7272_v30, %v3485_v23 }
 0x4a3   : > { %v3949_v19 = vadd.f32 %v7278_v10, %v3910_v61  ;;  %v3911_v34 = vmul.f32 %v7266_v18, %v3779_v27  ;;  %v3522_v61 = vadd.f32 %v7272_v30, %v3483_v32 }
 0x4a4   : > { %v3983_v9 = vadd.f32 %v3951_v35, %v3520_v21  ;;  %v3952_v3 = vadd.f32 %v7278_v10, %v3913_v45  ;;  %v3525_v35 = vadd.f32 %v7272_v30, %v3486_v11 }
 0x4a5   : > { %v3981_v17 = vadd.f32 %v3949_v19, %v3518_v55  ;;  %v3950_v48 = vadd.f32 %v7278_v10, %v3911_v34  ;;  %v3523_v55 = vadd.f32 %v7272_v30, %v3484_v15 }
 0x4a6   : > { %v3984_v59 = vadd.f32 %v3952_v3, %v3521_v12  ;;  %v4015_v4 = vmax.f32 %v3983_v9, 0.0  ;;  %v3489_v12 = vmul.f32 %v7210_v50, %v7261_v6  ;;  %v3487_v3 = vmul.f32 %v7261_v6, %v7212_v51 }
 0x4a7   : > { %v3982_v29 = vadd.f32 %v3950_v48, %v3519_v16  ;;  %v5391_v0 = vpop.f32.mrb[164].mxu1  ;;  %v4013_v60 = vmax.f32 %v3981_v17, 0.0  ;;  %v3490_v48 = vmul.f32 %v7214_v49, %v7261_v6 }
 0x4a8   : > { %v4016_v22 = vmax.f32 %v3984_v59, 0.0  ;;  %v3916_v20 = vmul.f32 %v5391_v0, %v7266_v18  ;;  %v3792_v41 = vpop.f32.mrb[165].mxu1  ;;  %v3488_v0 = vmul.f32 %v7261_v6, %v7216_v53 }
 0x4a9   : > { %v4014_v38 = vmax.f32 %v3982_v29, 0.0  ;;  %v3914_v24 = vmul.f32 %v7266_v18, %v3792_v41  ;;  %v5392_v56 = vpop.f32.mrb[166].mxu1 }
 0x4aa   : > { %v4562_v44 = vpack.c.bf16 %v4016_v22, %v4015_v4  ;;  %v3955_v8 = vadd.f32 %v7278_v10, %v3916_v20  ;;  %v3917_v31 = vmul.f32 %v5392_v56, %v7266_v18  ;;  %v3795_v25 = vpop.f32.mrb[167].mxu1  ;;  %v3528_v22 = vadd.f32 %v7272_v30, %v3489_v12 }
 0x4ab   : > { %v4557_v47 = vpack.c.bf16 %v4014_v38, %v4013_v60  ;;  %v3953_v21 = vadd.f32 %v7278_v10, %v3914_v24  ;;  %v3915_v43 = vmul.f32 %v7266_v18, %v3795_v25  ;;  %v3526_v60 = vadd.f32 %v7272_v30, %v3487_v3 }
 0x4ac   : > { %4634 = vst [vmem:[%s7309_s17 + $0x8] sm:$0xff] %v4562_v44   ;;  %v3987_v45 = vadd.f32 %v3955_v8, %v3524_v52  ;;  %v3956_v27 = vadd.f32 %v7278_v10, %v3917_v31  ;;  %v3529_v56 = vadd.f32 %v7272_v30, %v3490_v48  ;;  %v3527_v8 = vadd.f32 %v7272_v30, %v3488_v0 }
 0x4ad   : > { %4558 = vst [vmem:[%s7309_s17] sm:$0xff] %v4557_v47   ;;  %v3985_v19 = vadd.f32 %v3953_v21, %v3522_v61  ;;  %v3954_v34 = vadd.f32 %v7278_v10, %v3915_v43  ;;  %v3493_v61 = vmul.f32 %v7218_v36, %v7261_v6  ;;  %v3491_v21 = vmul.f32 %v7261_v6, %v7220_v58 }
 0x4ae   : > { %v3988_v9 = vadd.f32 %v3956_v27, %v3525_v35  ;;  %v4019_v23 = vmax.f32 %v3987_v45, 0.0  ;;  %v3494_v45 = vmul.f32 %v7222_v37, %v7261_v6  ;;  %v3492_v12 = vmul.f32 %v7261_v6, %v7224_v57 }
 0x4af   : > { %v3986_v16 = vadd.f32 %v3954_v34, %v3523_v55  ;;  %v5395_v17 = vpop.f32.mrb[168].mxu1  ;;  %v4017_v11 = vmax.f32 %v3985_v19, 0.0 }
 0x4b0   : > { %v4020_v59 = vmax.f32 %v3988_v9, 0.0  ;;  %v3920_v32 = vmul.f32 %v5395_v17, %v7266_v18  ;;  %v3808_v29 = vpop.f32.mrb[169].mxu1  ;;  %v3533_v0 = vadd.f32 %v7272_v30, %v3494_v45 }
 0x4b1   : > { %v4018_v50 = vmax.f32 %v3986_v16, 0.0  ;;  %v3918_v4 = vmul.f32 %v7266_v18, %v3808_v29  ;;  %v5396_v51 = vpop.f32.mrb[170].mxu1  ;;  %v3532_v16 = vadd.f32 %v7272_v30, %v3493_v61 }
 0x4b2   : > { %v4572_v20 = vpack.c.bf16 %v4020_v59, %v4019_v23  ;;  %v3959_v49 = vadd.f32 %v7278_v10, %v3920_v32  ;;  %v3921_v41 = vmul.f32 %v5396_v51, %v7266_v18  ;;  %v3811_v15 = vpop.f32.mrb[171].mxu1  ;;  %v3530_v59 = vadd.f32 %v7272_v30, %v3491_v21 }
 0x4b3   : > { %v4567_v38 = vpack.c.bf16 %v4018_v50, %v4017_v11  ;;  %v3957_v24 = vadd.f32 %v7278_v10, %v3918_v4  ;;  %v3919_v53 = vmul.f32 %v7266_v18, %v3811_v15  ;;  %v3531_v4 = vadd.f32 %v7272_v30, %v3492_v12 }
 0x4b4   : > { %4636 = vst [vmem:[%s7309_s17 + $0x18] sm:$0xff] %v4572_v20   ;;  %v3991_v52 = vadd.f32 %v3959_v49, %v3528_v22  ;;  %v3960_v44 = vadd.f32 %v7278_v10, %v3921_v41  ;;  %v3497_v20 = vmul.f32 %v7226_v5, %v7261_v6  ;;  %v3495_v41 = vmul.f32 %v7261_v6, %v7228_v62 }
 0x4b5   : > { %4635 = vst [vmem:[%s7309_s17 + $0x10] sm:$0xff] %v4567_v38   ;;  %v3989_v31 = vadd.f32 %v3957_v24, %v3526_v60  ;;  %v3958_v25 = vadd.f32 %v7278_v10, %v3919_v53  ;;  %v3498_v38 = vmul.f32 %v7230_v40, %v7261_v6 }
 0x4b6   : > { %v3992_v47 = vadd.f32 %v3960_v44, %v3529_v56  ;;  %v4023_v27 = vmax.f32 %v3991_v52, 0.0  ;;  %v3496_v44 = vmul.f32 %v7261_v6, %v7232_v13 }
 0x4b7   : > { %v3990_v43 = vadd.f32 %v3958_v25, %v3527_v8  ;;  %v5399_v35 = vpop.f32.mrb[172].mxu1  ;;  %v4021_v9 = vmax.f32 %v3989_v31, 0.0  ;;  %v3536_v25 = vadd.f32 %v7272_v30, %v3497_v20 }
 0x4b8   : > { %v4024_v55 = vmax.f32 %v3992_v47, 0.0  ;;  %v3924_v19 = vmul.f32 %v5399_v35, %v7266_v18  ;;  %v3824_v34 = vpop.f32.mrb[173].mxu1 }
 0x4b9   : > { %v4022_v36 = vmax.f32 %v3990_v43, 0.0  ;;  %v3922_v3 = vmul.f32 %v7266_v18, %v3824_v34  ;;  %v5400_v58 = vpop.f32.mrb[174].mxu1  ;;  %v3534_v43 = vadd.f32 %v7272_v30, %v3495_v41  ;;  %v3535_v34 = vadd.f32 %v7272_v30, %v3496_v44 }
 0x4ba   : > { %v4582_v17 = vpack.c.bf16 %v4024_v55, %v4023_v27  ;;  %v3963_v37 = vadd.f32 %v7278_v10, %v3924_v19  ;;  %v3925_v48 = vmul.f32 %v5400_v58, %v7266_v18  ;;  %v3827_v23 = vpop.f32.mrb[175].mxu1  ;;  %v3537_v27 = vadd.f32 %v7272_v30, %v3498_v38 }
 0x4bb   : > { %v4577_v32 = vpack.c.bf16 %v4022_v36, %v4021_v9  ;;  %v3961_v29 = vadd.f32 %v7278_v10, %v3922_v3  ;;  %v3923_v57 = vmul.f32 %v7266_v18, %v3827_v23  ;;  %v3501_v36 = vmul.f32 %v7234_v46, %v7261_v6 }
 0x4bc   : > { %4638 = vst [vmem:[%s7309_s17 + $0x28] sm:$0xff] %v4582_v17   ;;  %v3995_v11 = vadd.f32 %v3963_v37, %v3532_v16  ;;  %v3964_v50 = vadd.f32 %v7278_v10, %v3925_v48  ;;  %v3499_v58 = vmul.f32 %v7261_v6, %v7236_v1  ;;  %v3502_v37 = vmul.f32 %v7238_v39, %v7261_v6 }
 0x4bd   : > { %4637 = vst [vmem:[%s7309_s17 + $0x20] sm:$0xff] %v4577_v32   ;;  %v3993_v51 = vadd.f32 %v3961_v29, %v3530_v59  ;;  %v3962_v22 = vadd.f32 %v7278_v10, %v3923_v57  ;;  %v3500_v29 = vmul.f32 %v7261_v6, %v7240_v26  ;;  %v3503_v44 = vmul.f32 %v7261_v6, %v7244_v2 }
 0x4be   : > { %v3996_v49 = vadd.f32 %v3964_v50, %v3533_v0  ;;  %v4027_v24 = vmax.f32 %v3995_v11, 0.0  ;;  %v3540_v11 = vadd.f32 %v7272_v30, %v3501_v36  ;;  %v3541_v41 = vadd.f32 %v7272_v30, %v3502_v37 }
 0x4bf   : > { %v3994_v15 = vadd.f32 %v3962_v22, %v3531_v4  ;;  %v5403_v60 = vpop.f32.mrb[176].mxu1  ;;  %v4025_v8 = vmax.f32 %v3993_v51, 0.0  ;;  %v3538_v22 = vadd.f32 %v7272_v30, %v3499_v58  ;;  %v3539_v38 = vadd.f32 %v7272_v30, %v3500_v29 }
 0x4c0   : > { %v4028_v53 = vmax.f32 %v3996_v49, 0.0  ;;  %v3928_v56 = vmul.f32 %v5403_v60, %v7266_v18  ;;  %v3840_v52 = vpop.f32.mrb[177].mxu1 }
 0x4c1   : > { %v4026_v5 = vmax.f32 %v3994_v15, 0.0  ;;  %v3926_v31 = vmul.f32 %v7266_v18, %v3840_v52  ;;  %v5404_v62 = vpop.f32.mrb[178].mxu1 }
 0x4c2   : > { %v4592_v61 = vpack.c.bf16 %v4028_v53, %v4027_v24  ;;  %v3967_v40 = vadd.f32 %v7278_v10, %v3928_v56  ;;  %v3929_v47 = vmul.f32 %v5404_v62, %v7266_v18  ;;  %v3843_v21 = vpop.f32.mrb[179].mxu1  ;;  %v3505_v56 = vmul.f32 %v7242_v28, %v7261_v6 }
 0x4c3   : > { %v4587_v35 = vpack.c.bf16 %v4026_v5, %v4025_v8  ;;  %v3965_v45 = vadd.f32 %v7278_v10, %v3926_v31  ;;  %v3927_v13 = vmul.f32 %v7266_v18, %v3843_v21  ;;  %v3506_v31 = vmul.f32 %v7246_v63, %v7261_v6 }
 0x4c4   : > { %4640 = vst [vmem:[%s7309_s17 + $0x38] sm:$0xff] %v4592_v61   ;;  %v3999_v55 = vadd.f32 %v3967_v40, %v3536_v25  ;;  %v3968_v19 = vadd.f32 %v7278_v10, %v3929_v47  ;;  %v3504_v47 = vmul.f32 %v7261_v6, %v7248_v14 }
 0x4c5   : > { %4639 = vst [vmem:[%s7309_s17 + $0x30] sm:$0xff] %v4587_v35   ;;  %v3997_v12 = vadd.f32 %v3965_v45, %v3534_v43  ;;  %v3966_v9 = vadd.f32 %v7278_v10, %v3927_v13  ;;  %v3544_v35 = vadd.f32 %v7272_v30, %v3505_v56 }
 0x4c6   : > { %v4000_v3 = vadd.f32 %v3968_v19, %v3537_v27  ;;  %v4031_v48 = vmax.f32 %v3999_v55, 0.0  ;;  %v3542_v55 = vadd.f32 %v7272_v30, %v3503_v44 }
 0x4c7   : > { %v3998_v16 = vadd.f32 %v3966_v9, %v3535_v34  ;;  %v5407_v17 = vpop.f32.mrb[180].mxu1  ;;  %v4029_v57 = vmax.f32 %v3997_v12, 0.0  ;;  %v3545_v12 = vadd.f32 %v7272_v30, %v3506_v31 }
 0x4c8   : > { %v4032_v23 = vmax.f32 %v4000_v3, 0.0  ;;  %v3932_v59 = vmul.f32 %v5407_v17, %v7266_v18  ;;  %v3856_v32 = vpop.f32.mrb[181].mxu1  ;;  %v3543_v3 = vadd.f32 %v7272_v30, %v3504_v47  ;;  %v3509_v17 = vmul.f32 %v7250_v54, %v7261_v6 }
 0x4c9   : > { %v4030_v46 = vmax.f32 %v3998_v16, 0.0  ;;  %v3930_v0 = vmul.f32 %v7266_v18, %v3856_v32  ;;  %v5408_v1 = vpop.f32.mrb[182].mxu1  ;;  %v3510_v32 = vmul.f32 %v7254_v7, %v7261_v6 }
 0x4ca   : > { %v4602_v50 = vpack.c.bf16 %v4032_v23, %v4031_v48  ;;  %v3971_v39 = vadd.f32 %v7278_v10, %v3932_v59  ;;  %v3933_v4 = vmul.f32 %v5408_v1, %v7266_v18  ;;  %v3859_v51 = vpop.f32.mrb[183].mxu1  ;;  %v3507_v48 = vmul.f32 %v7261_v6, %v7252_v42 }
 0x4cb   : > { %v4597_v20 = vpack.c.bf16 %v4030_v46, %v4029_v57  ;;  %v3969_v49 = vadd.f32 %v7278_v10, %v3930_v0  ;;  %v3931_v26 = vmul.f32 %v7266_v18, %v3859_v51  ;;  %v3508_v1 = vmul.f32 %v7261_v6, %v7256_v33 }
 0x4cc   : > { %4642 = vst [vmem:[%s7309_s17 + $0x48] sm:$0xff] %v4602_v50   ;;  %v4003_v15 = vadd.f32 %v3971_v39, %v3540_v11  ;;  %v3972_v60 = vadd.f32 %v7278_v10, %v3933_v4  ;;  %v3548_v39 = vadd.f32 %v7272_v30, %v3509_v17 }
 0x4cd   : > { %4641 = vst [vmem:[%s7309_s17 + $0x40] sm:$0xff] %v4597_v20   ;;  %v4001_v24 = vadd.f32 %v3969_v49, %v3538_v22  ;;  %v3970_v53 = vadd.f32 %v7278_v10, %v3931_v26  ;;  %v3546_v20 = vadd.f32 %v7272_v30, %v3507_v48  ;;  %v3549_v26 = vadd.f32 %v7272_v30, %v3510_v32 }
 0x4ce   : > { %v4004_v52 = vadd.f32 %v3972_v60, %v3541_v41  ;;  %v4035_v62 = vmax.f32 %v4003_v15, 0.0  ;;  %v3547_v60 = vadd.f32 %v7272_v30, %v3508_v1 }
 0x4cf   : > { %v4002_v8 = vadd.f32 %v3970_v53, %v3539_v38  ;;  %v5411_v5 = vpop.f32.mrb[184].mxu1  ;;  %v4033_v21 = vmax.f32 %v4001_v24, 0.0 }
 0x4d0   : > { %v4036_v25 = vmax.f32 %v4004_v52, 0.0  ;;  %v3936_v61 = vmul.f32 %v5411_v5, %v7266_v18  ;;  %v3872_v40 = vpop.f32.mrb[185].mxu1 }
 0x4d1   : > { %v4034_v28 = vmax.f32 %v4002_v8, 0.0  ;;  %v3934_v43 = vmul.f32 %v7266_v18, %v3872_v40  ;;  %v5412_v2 = vpop.f32.mrb[186].mxu1 }
 0x4d2   : > { %v4612_v45 = vpack.c.bf16 %v4036_v25, %v4035_v62  ;;  %v3975_v63 = vadd.f32 %v7278_v10, %v3936_v61  ;;  %v3937_v13 = vmul.f32 %v5412_v2, %v7266_v18  ;;  %v3875_v27 = vpop.f32.mrb[187].mxu1 }
 0x4d3   : > { %v4607_v19 = vpack.c.bf16 %v4034_v28, %v4033_v21  ;;  %v3973_v34 = vadd.f32 %v7278_v10, %v3934_v43  ;;  %v3935_v14 = vmul.f32 %v7266_v18, %v3875_v27 }
 0x4d4   : > { %4644 = vst [vmem:[%s7309_s17 + $0x58] sm:$0xff] %v4612_v45   ;;  %v4007_v9 = vadd.f32 %v3975_v63, %v3544_v35  ;;  %v3976_v36 = vadd.f32 %v7278_v10, %v3937_v13 }
 0x4d5   : > { %4643 = vst [vmem:[%s7309_s17 + $0x50] sm:$0xff] %v4607_v19   ;;  %v4005_v58 = vadd.f32 %v3973_v34, %v3542_v55  ;;  %v3974_v16 = vadd.f32 %v7278_v10, %v3935_v14 }
 0x4d6   : > { %v4008_v37 = vadd.f32 %v3976_v36, %v3545_v12  ;;  %v4039_v29 = vmax.f32 %v4007_v9, 0.0 }
 0x4d7   : > { %v4006_v23 = vadd.f32 %v3974_v16, %v3543_v3  ;;  %v5415_v59 = vpop.f32.mrb[188].mxu1  ;;  %v4037_v11 = vmax.f32 %v4005_v58, 0.0 }
 0x4d8   : > { %v4040_v57 = vmax.f32 %v4008_v37, 0.0  ;;  %v3940_v46 = vmul.f32 %v5415_v59, %v7266_v18  ;;  %v3888_v0 = vpop.f32.mrb[189].mxu1 }
 0x4d9   : > { %v4038_v54 = vmax.f32 %v4006_v23, 0.0  ;;  %v3938_v50 = vmul.f32 %v7266_v18, %v3888_v0  ;;  %v5416_v42 = vpop.f32.mrb[190].mxu1 }
 0x4da   : > { %v4622_v4 = vpack.c.bf16 %v4040_v57, %v4039_v29  ;;  %v3979_v7 = vadd.f32 %v7278_v10, %v3940_v46  ;;  %v3941_v51 = vmul.f32 %v5416_v42, %v7266_v18  ;;  %v3891_v22 = vpop.f32.mrb[191].mxu1 }
 0x4db   : > { %v4617_v49 = vpack.c.bf16 %v4038_v54, %v4037_v11  ;;  %v3977_v33 = vadd.f32 %v7278_v10, %v3938_v50  ;;  %v3939_v6 = vmul.f32 %v7266_v18, %v3891_v22 }
 0x4dc   : > { %4646 = vst [vmem:[%s7309_s17 + $0x68] sm:$0xff] %v4622_v4   ;;  %v4011_v41 = vadd.f32 %v3979_v7, %v3548_v39  ;;  %v3980_v15 = vadd.f32 %v7278_v10, %v3941_v51 }
 0x4dd   : > { %4645 = vst [vmem:[%s7309_s17 + $0x60] sm:$0xff] %v4617_v49   ;;  %v4009_v38 = vadd.f32 %v3977_v33, %v3546_v20  ;;  %v3978_v24 = vadd.f32 %v7278_v10, %v3939_v6 }
 0x4de   : > { %v4012_v53 = vadd.f32 %v3980_v15, %v3549_v26  ;;  %v4043_v18 = vmax.f32 %v4011_v41, 0.0 }
 0x4df   : > { %v4010_v56 = vadd.f32 %v3978_v24, %v3547_v60  ;;  %v4041_v44 = vmax.f32 %v4009_v38, 0.0 }
 0x4e0   : > { %v4044_v52 = vmax.f32 %v4012_v53, 0.0 }
 0x4e1   : > { %v4042_v8 = vmax.f32 %v4010_v56, 0.0 }
 0x4e2   : > { %v4632_v5 = vpack.c.bf16 %v4044_v52, %v4043_v18 }
 0x4e3   : > { %v4627_v30 = vpack.c.bf16 %v4042_v8, %v4041_v44 }
 0x4e4   : > { %4648 = vst [vmem:[%s7309_s17 + $0x78] sm:$0xff] %v4632_v5  }
 0x4e5   : > { %4647 = vst [vmem:[%s7309_s17 + $0x70] sm:$0xff] %v4627_v30  }
 0x4e6   : > { %5953 = shalt.err (!%p5950_p13)
}
 0x4e7   : > { %s5954_s18 = scalar_lea.hbm %s7453_s8, 2048  ;;  %s5958_s17 = scalar_lea.hbm %s7554_s23, 4096 }
 0x4e8   : > { %p5955_p9 = scmp.ne.s32.totalorder %s7453_s8, %s5954_s18  ;;  %p5959_p4 = scmp.lt.u32.totalorder %s7453_s8, %s7554_s23 }
 0x4e9   : > { %p5960_p8 = scmp.lt.u32.totalorder %s5958_s17, %s5954_s18  ;;  %p5962_p3 = scmp.lt.u32.totalorder %s5954_s18, %s7453_s8 }
 0x4ea   : > { %p5956_p0 = pnand %p5955_p9, %p6268_p10 }
 0x4eb   : > { %p5961_p6 = por %p5960_p8, %p5959_p4 }
 0x4ec   : > { %p5957_p11 = pneg %p5956_p0 }
 0x4ed   : > { %p5963_p5 = por %p5962_p3, %p5961_p6 }
 0x4ef   : > { %p5964_p7 = pnand %p5963_p5, %p5957_p11 }
 0x4f1   : > { %5967 = shalt.err (!%p5964_p7)
}
 0x4f2   : > { %s6025_s25 = smov 64   ;;  %s6026_s14 = smov 4  }
 0x4f3   : > { %5595 = dma.vmem_to_hbm [thread:$0]  (%p6268_p10), %s7455_s20, 2048, %s7453_s8, %s4206_s29, %s6025_s25, %s6025_s25, %s6026_s14  }
 0x4f4 PF: > { %s7555_s16 = sld [smem:[#allocation17_spill]]  ;;  %s7556_s15 = sld [smem:[#allocation18_spill]] }
 0x4f5   : > { %p7558_p1 = scmp.ge.s32.totalorder %s6014_s28, 2 }
 0x4fa   : > { %s4234_s24 = sand.u32 1, %s7555_s16   ;;  %p7557_p12 = scmp.ne.s32.totalorder %s7556_s15, 0 }
 0x4fb   : > { %s4235_s18 = scalar_lea.sflag [#allocation5], %s4234_s24 }
 0x4fc   : > { %p5615_p2 = pnand %p7558_p1, %p7557_p12 }
 0x4fe   : > { %5997 = dma.done.wait (!%p5615_p2), %s4235_s18, 2048  }
 0x4ff   : > { %5999 = vsyncadd (!%p5615_p2), %s4235_s18, 4294965248  ;;  %p28_p13 = scmp.ge.s32.totalorder %s6258_s13, 4   ;;  %s7559_s25 = smov %s6006_s26 }
 0x500   : > { %s7560_s26 = smov %s6010_s27  ;;  %s7561_s27 = smov %s6274_s30 }
 0x501   : > { %s7562_s28 = smov %s6258_s13  ;;  %30 = sbr.rel (!%p28_p13) target bundleno = 13 (0xd), region = 138 }
 0x508   :  { %4240 = vsyncpa [#allocation4], 1 }
 0x509   :  { %4242 = vsyncpa [#allocation4 + $0x1], 1 }
 0x50a   :  { %4243 = vsyncpa [#allocation7], 1 }
 0x50b   :  { %4244 = vsyncpa [#allocation10], 1 }
 0x50c   :  { %4245 = vsyncpa [#allocation5], 1 }
 0x50d   :  { %4247 = vsyncpa [#allocation5 + $0x1], 1 }

</bundles_post_ra>
